<compile_context>
chip_gen: v6e
topology: v6e:2x2x1
jax: 0.10.0
libtpu: 0.0.40
codegen_flags: <defaults>
</compile_context>

<pallas_src>
import functools

import jax
import jax.numpy as jnp
from jax.experimental import pallas as pl
from jax.experimental.pallas import tpu as pltpu

BN_EPS = 1e-5
VMEM_LIMIT = 32 * 1024 * 1024


def _round_up(x, m):
    return (x + m - 1) // m * m


def _pick_tm(M):
    """Row-tile: >=2 grid steps when there is enough work (v7x has 2 TensorCores),
    a single tile for tiny layers (prefer fusion over splitting); multiple of 8."""
    Mp = _round_up(M, 8)
    if Mp <= 32:
        return Mp
    if Mp <= 1024:
        return _round_up((Mp + 1) // 2, 8)
    return 512


def _compiler_params():
    return pltpu.CompilerParams(dimension_semantics=("parallel",),
                                vmem_limit_bytes=VMEM_LIMIT)


# ----------------------------- Pallas kernels -----------------------------

def _mm_kernel(x_ref, w_ref, b_ref, o_ref, *, pre_relu, act_relu):
    """out = act(maybe_relu(x) @ w + b); x/w bf16 -> MXU, accum/bias/relu f32."""
    x = x_ref[...]
    if pre_relu:
        x = jnp.maximum(x, 0.0)
    acc = jnp.dot(x, w_ref[...], preferred_element_type=jnp.float32)
    acc = acc + b_ref[...]
    if act_relu:
        acc = jnp.maximum(acc, 0.0)
    o_ref[...] = acc.astype(o_ref.dtype)


def _conv_block_kernel(cols_ref, w1_ref, b1_ref, w2_ref, b2_ref, o_ref, *, cin, center):
    """Fused ConvBlock: relu -> 3x3 conv(+BN) -> relu -> 1x1 conv -> + residual.

    cols: (tm, 9*cin) bf16 im2col of the block input (3x3, pad=1); the residual
    is the untouched center tap, so it needs no separate HBM operand.  The
    (tm, 32) intermediate stays in vregs/VMEM."""
    cols = cols_ref[...]
    resid = cols[:, center * cin:(center + 1) * cin].astype(jnp.float32)
    x = jnp.maximum(cols, 0.0)
    h = jnp.dot(x, w1_ref[...], preferred_element_type=jnp.float32) + b1_ref[...]
    h = jnp.maximum(h, 0.0).astype(w2_ref.dtype)
    out = jnp.dot(h, w2_ref[...], preferred_element_type=jnp.float32) + b2_ref[...] + resid
    o_ref[...] = out.astype(o_ref.dtype)


def _qconv_vq_kernel(x_ref, wq_ref, bq_ref, e_ref, esq_ref, et_ref,
                     q_ref, ind_ref, sse_ref):
    """Fused: z = relu(enc) @ Wq + bq ; VQ nearest-code lookup of z.

    Distance uses only (-2*z.e + |e|^2): the per-row |z|^2 term is constant per
    row and cannot change the argmin.  One-hot gather uses the f32 codebook so
    q holds exact codebook rows.  Per-row sum((q - z)^2) is emitted for `diff`."""
    x = jnp.maximum(x_ref[...], 0.0)                                   # encoder's trailing ReLU
    z = jnp.dot(x, wq_ref[...], preferred_element_type=jnp.float32) + bq_ref[...]
    score = 2.0 * jnp.dot(z.astype(e_ref.dtype), e_ref[...],
                          preferred_element_type=jnp.float32) - esq_ref[...]   # (tm, K)
    mx = jnp.max(score, axis=1, keepdims=True)
    iota = jax.lax.broadcasted_iota(jnp.int32, score.shape, 1)
    # first-max index => same tie-break as torch.Tensor.max(dim=1)
    ind = jnp.min(jnp.where(score == mx, iota, jnp.int32(2 ** 31 - 1)),
                  axis=1, keepdims=True)                               # (tm, 1)
    onehot = (iota == ind).astype(et_ref.dtype)                        # (tm, K)
    q = jnp.dot(onehot, et_ref[...], preferred_element_type=jnp.float32)
    q_ref[...] = q
    ind_ref[...] = ind
    sse_ref[...] = jnp.sum((q - z) ** 2, axis=1, keepdims=True)


# ----------------------------- kernel wrappers -----------------------------

def matmul_bias(x, w, b, *, pre_relu=False, act_relu=False, out_dtype=jnp.bfloat16):
    """out = act(maybe_relu(x) @ w + b); x:(M,K), w:(K,N), b:(N,)."""
    M, K = x.shape
    N = w.shape[1]
    tm = _pick_tm(M)
    Mp = _round_up(M, tm)
    xb = x.astype(jnp.bfloat16)
    if Mp != M:
        xb = jnp.pad(xb, ((0, Mp - M), (0, 0)))
    wb = w.astype(jnp.bfloat16)
    b2 = b.reshape(1, N).astype(jnp.float32)

    kernel = functools.partial(_mm_kernel, pre_relu=pre_relu, act_relu=act_relu)
    out = pl.pallas_call(
        kernel,
        out_shape=jax.ShapeDtypeStruct((Mp, N), out_dtype),
        grid=(Mp // tm,),
        in_specs=[pl.BlockSpec((tm, K), lambda i: (i, 0)),
                  pl.BlockSpec((K, N), lambda i: (0, 0)),
                  pl.BlockSpec((1, N), lambda i: (0, 0))],
        out_specs=pl.BlockSpec((tm, N), lambda i: (i, 0)),
        compiler_params=_compiler_params(),
    )(xb, wb, b2)
    return out[:M] if Mp != M else out


def conv_block(x, p):
    """x: (B,H,W,C). out = x + Conv1x1(ReLU(BN(Conv3x3(ReLU(x)))))  (eval mode)."""
    B, H, W, C = x.shape
    w1, b1 = _fold_bn(p["w1"], p["b1"], p["bn"])
    cch = w1.shape[0]
    cols, oh, ow = _im2col(x.astype(jnp.bfloat16), 3, 1, 1)
    M = B * oh * ow
    cols = cols.reshape(M, 9 * C)
    w1m = jnp.transpose(w1, (2, 3, 1, 0)).reshape(9 * C, cch).astype(jnp.bfloat16)
    b1v = b1.reshape(1, cch).astype(jnp.float32)
    w2m = p["w2"].reshape(C, cch).T.astype(jnp.bfloat16)
    b2v = p["b2"].reshape(1, C).astype(jnp.float32)

    tm = _pick_tm(M)
    Mp = _round_up(M, tm)
    if Mp != M:
        cols = jnp.pad(cols, ((0, Mp - M), (0, 0)))

    kernel = functools.partial(_conv_block_kernel, cin=C, center=4)
    out = pl.pallas_call(
        kernel,
        out_shape=jax.ShapeDtypeStruct((Mp, C), jnp.bfloat16),
        grid=(Mp // tm,),
        in_specs=[pl.BlockSpec((tm, 9 * C), lambda i: (i, 0)),
                  pl.BlockSpec((9 * C, cch), lambda i: (0, 0)),
                  pl.BlockSpec((1, cch), lambda i: (0, 0)),
                  pl.BlockSpec((cch, C), lambda i: (0, 0)),
                  pl.BlockSpec((1, C), lambda i: (0, 0))],
        out_specs=pl.BlockSpec((tm, C), lambda i: (i, 0)),
        compiler_params=_compiler_params(),
    )(cols, w1m, b1v, w2m, b2v)
    out = out[:M] if Mp != M else out
    return out.reshape(B, oh, ow, C)


def quantize_conv_vq(enc, qc_w, qc_b, embed):
    """Fused quantize_conv (1x1, pre-ReLU) + VQ lookup.

    Returns (quantized (B,h,w,D) f32, indices (B,h,w) int32, diff scalar)."""
    B, H, W, C = enc.shape
    D, K = embed.shape
    M = B * H * W
    x = enc.reshape(M, C).astype(jnp.bfloat16)
    wq = qc_w.reshape(D, C).T.astype(jnp.bfloat16)                   # (C, D)
    bq = qc_b.reshape(1, D).astype(jnp.float32)
    e_bf = embed.astype(jnp.bfloat16)                                # (D, K) distance operand
    esq = jnp.sum(embed.astype(jnp.float32) ** 2, axis=0, keepdims=True)   # (1, K)
    et = embed.T.astype(jnp.float32)                                 # (K, D) exact gather

    tm = _pick_tm(M)
    Mp = _round_up(M, tm)
    if Mp != M:
        x = jnp.pad(x, ((0, Mp - M), (0, 0)))

    q, ind, sse = pl.pallas_call(
        _qconv_vq_kernel,
        out_shape=(jax.ShapeDtypeStruct((Mp, D), jnp.float32),
                   jax.ShapeDtypeStruct((Mp, 1), jnp.int32),
                   jax.ShapeDtypeStruct((Mp, 1), jnp.float32)),
        grid=(Mp // tm,),
        in_specs=[pl.BlockSpec((tm, C), lambda i: (i, 0)),
                  pl.BlockSpec((C, D), lambda i: (0, 0)),
                  pl.BlockSpec((1, D), lambda i: (0, 0)),
                  pl.BlockSpec((D, K), lambda i: (0, 0)),
                  pl.BlockSpec((1, K), lambda i: (0, 0)),
                  pl.BlockSpec((K, D), lambda i: (0, 0))],
        out_specs=(pl.BlockSpec((tm, D), lambda i: (i, 0)),
                   pl.BlockSpec((tm, 1), lambda i: (i, 0)),
                   pl.BlockSpec((tm, 1), lambda i: (i, 0))),
        compiler_params=_compiler_params(),
    )(x, wq, bq, e_bf, esq, et)
    if Mp != M:
        q, ind, sse = q[:M], ind[:M], sse[:M]
    diff = jnp.sum(sse) / (M * D)
    return q.reshape(B, H, W, D), ind[:, 0].reshape(B, H, W), diff


# ----------------------------- conv glue (im2col, bf16) -----------------------------

def _im2col(x, k, stride, padding):
    x = jnp.pad(x, ((0, 0), (padding, padding), (padding, padding), (0, 0)))
    B, H, W, C = x.shape
    oh = (H - k) // stride + 1
    ow = (W - k) // stride + 1
    patches = []
    for i in range(k):
        for j in range(k):
            patches.append(x[:, i:i + stride * (oh - 1) + 1:stride,
                             j:j + stride * (ow - 1) + 1:stride, :])
    cols = jnp.stack(patches, axis=3)              # (B, oh, ow, k*k, C)
    return cols.reshape(B, oh, ow, k * k * C), oh, ow


def _fold_bn(w, b, bn):
    """Fold eval-mode BatchNorm (over output channels) into conv weight/bias."""
    gamma, beta, mean, var = bn
    scale = gamma / jnp.sqrt(var + BN_EPS)
    w = w * scale[:, None, None, None]             # w: (Cout, Cin, kh, kw)
    b = (b - mean) * scale + beta
    return w, b


def conv2d(x, w, b, *, stride=1, padding=0, pre_relu=False, act_relu=False,
           bn=None, out_dtype=jnp.bfloat16):
    """x: NHWC.  w: PyTorch layout (Cout, Cin, kh, kw)."""
    if bn is not None:
        w, b = _fold_bn(w, b, bn)
    Cout, Cin, kh, kw = w.shape
    B = x.shape[0]
    if kh == 1 and kw == 1 and stride == 1 and padding == 0:
        _, H, W, C = x.shape
        cols = x.reshape(B * H * W, C)
        oh, ow = H, W
        wmat = w.reshape(Cout, Cin).T
    else:
        cols, oh, ow = _im2col(x.astype(jnp.bfloat16), kh, stride, padding)
        cols = cols.reshape(B * oh * ow, kh * kw * Cin)
        wmat = jnp.transpose(w, (2, 3, 1, 0)).reshape(kh * kw * Cin, Cout)
    out = matmul_bias(cols, wmat, b, pre_relu=pre_relu, act_relu=act_relu,
                      out_dtype=out_dtype)
    return out.reshape(B, oh, ow, Cout)


def conv_transpose2d(x, w, b, *, pre_relu=False, act_relu=False, bn=None,
                     out_dtype=jnp.bfloat16):
    """Sub-pixel ConvTranspose2d(k=4, stride=2, padding=1).  w: (Cin, Cout, 4, 4).

    Each output phase (r,s) in {0,1}^2 depends on a 2x2 input window, so we run
    one matmul: 3x3 im2col of the *input-resolution* activation against a
    (9*Cin, 4*Cout) packed weight (zeros on unused taps), then pixel-shuffle."""
    if bn is not None:
        gamma, beta, mean, var = bn
        scale = gamma / jnp.sqrt(var + BN_EPS)
        w = w * scale[None, :, None, None]         # BN is over Cout (axis 1 here)
        b = (b - mean) * scale + beta
    Cin, Cout, kh, kw = w.shape
    assert (kh, kw) == (4, 4)

    # (output phase, input-tap offset) -> transpose-conv kernel index
    kidx = {(0, -1): 3, (0, 0): 1, (1, 0): 2, (1, 1): 0}

    def sub_w(r, s):
        rows = []
        for dy in (-1, 0, 1):
            taps = []
            for dx in (-1, 0, 1):
                if (r, dy) in kidx and (s, dx) in kidx:
                    taps.append(w[:, :, kidx[(r, dy)], kidx[(s, dx)]])
                else:
                    taps.append(jnp.zeros((Cin, Cout), w.dtype))
            rows.append(jnp.stack(taps, axis=0))
        return jnp.stack(rows, axis=0)             # (3, 3, Cin, Cout)

    wp = jnp.stack([jnp.stack([sub_w(r, s) for s in (0, 1)], axis=0)
                    for r in (0, 1)], axis=0)      # (2, 2, 3, 3, Cin, Cout)
    wp = jnp.transpose(wp, (2, 3, 4, 0, 1, 5))     # (3, 3, Cin, 2, 2, Cout)
    wmat = wp.reshape(9 * Cin, 4 * Cout)
    bvec = jnp.tile(b.astype(jnp.float32), 4)      # bias per (r, s, co) column

    B, H, W, _ = x.shape
    cols, _, _ = _im2col(x.astype(jnp.bfloat16), 3, 1, 1)
    cols = cols.reshape(B * H * W, 9 * Cin)
    out = matmul_bias(cols, wmat, bvec, pre_relu=pre_relu, act_relu=act_relu,
                      out_dtype=out_dtype)
    out = out.reshape(B, H, W, 2, 2, Cout)
    out = jnp.transpose(out, (0, 1, 3, 2, 4, 5)).reshape(B, 2 * H, 2 * W, Cout)
    return out


# ----------------------------- model -----------------------------

def encoder(x, p):
    h = conv2d(x, p["w1"], p["b1"], stride=2, padding=1, bn=p["bn1"], act_relu=True)
    h = conv2d(h, p["w2"], p["b2"], stride=2, padding=1, bn=p["bn2"], act_relu=True)
    h = conv2d(h, p["w3"], p["b3"], stride=1, padding=1)
    for blk in p["blocks"]:
        h = conv_block(h, blk)
    return h          # trailing ReLU is fused (pre_relu) into the quantize_conv+VQ kernel


def decoder(x, p):
    h = conv2d(x, p["w1"], p["b1"], stride=1, padding=1)
    for blk in p["blocks"]:
        h = conv_block(h, blk)
    h = conv_transpose2d(h, p["wt1"], p["bt1"], pre_relu=True, bn=p["bn1"], act_relu=True)
    h = conv_transpose2d(h, p["wt2"], p["bt2"], out_dtype=jnp.float32)
    return h


def s_vqvae_forward(x_nchw, params):
    x = jnp.transpose(x_nchw, (0, 2, 3, 1))                          # NCHW -> NHWC
    enc = encoder(x, params["enc"])
    quant, embed_ind, diff = quantize_conv_vq(enc, params["qc_w"], params["qc_b"],
                                              params["embed"])
    # straight-through estimator: forward value == quantized codes
    dec = decoder(quant, params["dec"])
    dec = jnp.transpose(dec, (0, 3, 1, 2))                           # NHWC -> NCHW
    pooled = jnp.mean(quant, axis=(1, 2))                            # AdaptiveAvgPool2d(1)+Flatten
    # classifier head: (B,32)x(32,10) is launch-overhead territory -> plain jnp
    logits = pooled @ params["fc_w"].T.astype(jnp.float32) + params["fc_b"]
    return dec, diff, logits, embed_ind


# ----------------------------- deterministic init -----------------------------

def _bn(c):
    return (jnp.ones((c,), jnp.float32), jnp.zeros((c,), jnp.float32),
            jnp.zeros((c,), jnp.float32), jnp.ones((c,), jnp.float32))


def init_params(key, in_channel=3, channel=128, n_conv_block=2,
                n_conv_channel=32, embed_dim=32, n_embed=256, num_classes=10):
    keys = iter(jax.random.split(key, 128))

    def nrm(shape, scale=0.05):
        return scale * jax.random.normal(next(keys), shape, jnp.float32)

    def cblock(ch, cch):
        return {"w1": nrm((cch, ch, 3, 3)), "b1": nrm((cch,)), "bn": _bn(cch),
                "w2": nrm((ch, cch, 1, 1)), "b2": nrm((ch,))}

    enc = {
        "w1": nrm((channel // 2, in_channel, 4, 4)), "b1": nrm((channel // 2,)),
        "bn1": _bn(channel // 2),
        "w2": nrm((channel, channel // 2, 4, 4)), "b2": nrm((channel,)),
        "bn2": _bn(channel),
        "w3": nrm((channel, channel, 3, 3)), "b3": nrm((channel,)),
        "blocks": [cblock(channel, n_conv_channel) for _ in range(n_conv_block)],
    }
    dec = {
        "w1": nrm((channel, embed_dim, 3, 3)), "b1": nrm((channel,)),
        "blocks": [cblock(channel, n_conv_channel) for _ in range(n_conv_block)],
        "wt1": nrm((channel, channel // 2, 4, 4)), "bt1": nrm((channel // 2,)),
        "bn1": _bn(channel // 2),
        "wt2": nrm((channel // 2, in_channel, 4, 4)), "bt2": nrm((in_channel,)),
    }
    return {
        "enc": enc,
        "qc_w": nrm((embed_dim, channel, 1, 1)), "qc_b": nrm((embed_dim,)),
        "embed": jax.random.normal(next(keys), (embed_dim, n_embed), jnp.float32),
        "dec": dec,
        "fc_w": nrm((num_classes, embed_dim)), "fc_b": nrm((num_classes,)),
    }


# ----------------------------- main -----------------------------

if __name__ == "__main__":
    key = jax.random.PRNGKey(0)
    k_param, k_x = jax.random.split(key)
    params = init_params(k_param)

    B, C, H, W = 2, 3, 16, 16
    x = jax.random.normal(k_x, (B, C, H, W), jnp.float32)

    fwd = jax.jit(s_vqvae_forward)
    dec, diff, logits, embed_ind = fwd(x, params)
    jax.block_until_ready((dec, diff, logits, embed_ind))

    assert dec.shape == (B, C, H, W), dec.shape
    assert diff.shape == (), diff.shape
    assert logits.shape == (B, 10), logits.shape
    assert embed_ind.shape == (B, H // 4, W // 4), embed_ind.shape
    assert embed_ind.dtype == jnp.int32

    print("KERNEL_OK")
</pallas_src>

<mosaic_0001>
module attributes {stable_mosaic.version = 11 : i64} {
  func.func @_mm_kernel(%arg0: i32, %arg1: memref<64x48xbf16, #tpu.memory_space<vmem>>, %arg2: memref<48x64xbf16, #tpu.memory_space<vmem>>, %arg3: memref<1x64xf32, #tpu.memory_space<vmem>>, %arg4: memref<64x64xbf16, #tpu.memory_space<vmem>>) attributes {dimension_semantics = [#tpu.dimension_semantics<parallel>], iteration_bounds = array<i64: 2>, scalar_prefetch = 0 : i64, scratch_operands = 0 : i64, tpu.core_type = #tpu.core_type<tc>, window_params = [{transform_indices = @transform_0, window_bounds = array<i64: 64, 48>}, {pipeline_mode = #tpu.pipeline_mode<synchronous>, transform_indices = @transform_1, window_bounds = array<i64: 48, 64>}, {pipeline_mode = #tpu.pipeline_mode<synchronous>, transform_indices = @transform_2, window_bounds = array<i64: 1, 64>}, {transform_indices = @transform_3, window_bounds = array<i64: 64, 64>}]} {
    %c0 = arith.constant 0 : index
    %c0_0 = arith.constant 0 : index
    %0 = vector.load %arg1[%c0, %c0_0] : memref<64x48xbf16, #tpu.memory_space<vmem>>, vector<64x48xbf16>
    %c0_1 = arith.constant 0 : index
    %c0_2 = arith.constant 0 : index
    %1 = vector.load %arg2[%c0_1, %c0_2] : memref<48x64xbf16, #tpu.memory_space<vmem>>, vector<48x64xbf16>
    %cst = arith.constant dense<0.000000e+00> : vector<64x64xf32>
    %2 = tpu.matmul %0, %1, %cst {dimension_numbers = #tpu.dot_dimension_numbers<[1], [0], [0], [1], [0, 0, 1, 1], [], []>} : vector<64x48xbf16>, vector<48x64xbf16>, vector<64x64xf32> -> vector<64x64xf32>
    %c0_3 = arith.constant 0 : index
    %c0_4 = arith.constant 0 : index
    %3 = vector.load %arg3[%c0_3, %c0_4] : memref<1x64xf32, #tpu.memory_space<vmem>>, vector<1x64xf32>
    %4 = vector.broadcast %3 : vector<1x64xf32> to vector<64x64xf32>
    %5 = arith.addf %2, %4 : vector<64x64xf32>
    %cst_5 = arith.constant 0.000000e+00 : f32
    %6 = vector.broadcast %cst_5 : f32 to vector<64x64xf32>
    %7 = arith.maximumf %5, %6 : vector<64x64xf32>
    %8 = arith.truncf %7 : vector<64x64xf32> to vector<64x64xbf16>
    %c0_6 = arith.constant 0 : index
    %c0_7 = arith.constant 0 : index
    %9 = vector.load %arg4[%c0_6, %c0_7] : memref<64x64xbf16, #tpu.memory_space<vmem>>, vector<64x64xbf16>
    tpu.vector_store %arg4[%c0_6, %c0_7], %8 {strides = array<i32>} : memref<64x64xbf16, #tpu.memory_space<vmem>>, vector<64x64xbf16>,
    return
  }
  func.func @transform_0(%arg0: i32) -> (i32, i32) {
    %c0_i32 = arith.constant 0 : i32
    %c0_i32_0 = arith.constant 0 : i32
    return %arg0, %c0_i32 : i32, i32
  }
  func.func @transform_1(%arg0: i32) -> (i32, i32) {
    %c0_i32 = arith.constant 0 : i32
    %c0_i32_0 = arith.constant 0 : i32
    %c0_i32_1 = arith.constant 0 : i32
    return %c0_i32, %c0_i32_0 : i32, i32
  }
  func.func @transform_2(%arg0: i32) -> (i32, i32) {
    %c0_i32 = arith.constant 0 : i32
    %c0_i32_0 = arith.constant 0 : i32
    %c0_i32_1 = arith.constant 0 : i32
    return %c0_i32, %c0_i32_0 : i32, i32
  }
  func.func @transform_3(%arg0: i32) -> (i32, i32) {
    %c0_i32 = arith.constant 0 : i32
    %c0_i32_0 = arith.constant 0 : i32
    return %arg0, %c0_i32 : i32, i32
  }
}

module attributes {stable_mosaic.version = 11 : i64} {
  func.func @_mm_kernel(%arg0: i32, %arg1: memref<32x1024xbf16, #tpu.memory_space<vmem>>, %arg2: memref<1024x128xbf16, #tpu.memory_space<vmem>>, %arg3: memref<1x128xf32, #tpu.memory_space<vmem>>, %arg4: memref<32x128xbf16, #tpu.memory_space<vmem>>) attributes {dimension_semantics = [#tpu.dimension_semantics<parallel>], iteration_bounds = array<i64: 1>, scalar_prefetch = 0 : i64, scratch_operands = 0 : i64, tpu.core_type = #tpu.core_type<tc>, window_params = [{transform_indices = @transform_0, window_bounds = array<i64: 32, 1024>}, {pipeline_mode = #tpu.pipeline_mode<synchronous>, transform_indices = @transform_1, window_bounds = array<i64: 1024, 128>}, {pipeline_mode = #tpu.pipeline_mode<synchronous>, transform_indices = @transform_2, window_bounds = array<i64: 1, 128>}, {transform_indices = @transform_3, window_bounds = array<i64: 32, 128>}]} {
    %c0 = arith.constant 0 : index
    %c0_0 = arith.constant 0 : index
    %0 = vector.load %arg1[%c0, %c0_0] : memref<32x1024xbf16, #tpu.memory_space<vmem>>, vector<32x1024xbf16>
    %c0_1 = arith.constant 0 : index
    %c0_2 = arith.constant 0 : index
    %1 = vector.load %arg2[%c0_1, %c0_2] : memref<1024x128xbf16, #tpu.memory_space<vmem>>, vector<1024x128xbf16>
    %cst = arith.constant dense<0.000000e+00> : vector<32x128xf32>
    %2 = tpu.matmul %0, %1, %cst {dimension_numbers = #tpu.dot_dimension_numbers<[1], [0], [0], [1], [0, 0, 1, 1], [], []>} : vector<32x1024xbf16>, vector<1024x128xbf16>, vector<32x128xf32> -> vector<32x128xf32>
    %c0_3 = arith.constant 0 : index
    %c0_4 = arith.constant 0 : index
    %3 = vector.load %arg3[%c0_3, %c0_4] : memref<1x128xf32, #tpu.memory_space<vmem>>, vector<1x128xf32>
    %4 = vector.broadcast %3 : vector<1x128xf32> to vector<32x128xf32>
    %5 = arith.addf %2, %4 : vector<32x128xf32>
    %cst_5 = arith.constant 0.000000e+00 : f32
    %6 = vector.broadcast %cst_5 : f32 to vector<32x128xf32>
    %7 = arith.maximumf %5, %6 : vector<32x128xf32>
    %8 = arith.truncf %7 : vector<32x128xf32> to vector<32x128xbf16>
    %c0_6 = arith.constant 0 : index
    %c0_7 = arith.constant 0 : index
    %9 = vector.load %arg4[%c0_6, %c0_7] : memref<32x128xbf16, #tpu.memory_space<vmem>>, vector<32x128xbf16>
    tpu.vector_store %arg4[%c0_6, %c0_7], %8 {strides = array<i32>} : memref<32x128xbf16, #tpu.memory_space<vmem>>, vector<32x128xbf16>,
    return
  }
  func.func @transform_0(%arg0: i32) -> (i32, i32) {
    %c0_i32 = arith.constant 0 : i32
    %c0_i32_0 = arith.constant 0 : i32
    return %arg0, %c0_i32 : i32, i32
  }
  func.func @transform_1(%arg0: i32) -> (i32, i32) {
    %c0_i32 = arith.constant 0 : i32
    %c0_i32_0 = arith.constant 0 : i32
    %c0_i32_1 = arith.constant 0 : i32
    return %c0_i32, %c0_i32_0 : i32, i32
  }
  func.func @transform_2(%arg0: i32) -> (i32, i32) {
    %c0_i32 = arith.constant 0 : i32
    %c0_i32_0 = arith.constant 0 : i32
    %c0_i32_1 = arith.constant 0 : i32
    return %c0_i32, %c0_i32_0 : i32, i32
  }
  func.func @transform_3(%arg0: i32) -> (i32, i32) {
    %c0_i32 = arith.constant 0 : i32
    %c0_i32_0 = arith.constant 0 : i32
    return %arg0, %c0_i32 : i32, i32
  }
}

module attributes {stable_mosaic.version = 11 : i64} {
  func.func @_mm_kernel(%arg0: i32, %arg1: memref<32x1152xbf16, #tpu.memory_space<vmem>>, %arg2: memref<1152x128xbf16, #tpu.memory_space<vmem>>, %arg3: memref<1x128xf32, #tpu.memory_space<vmem>>, %arg4: memref<32x128xbf16, #tpu.memory_space<vmem>>) attributes {dimension_semantics = [#tpu.dimension_semantics<parallel>], iteration_bounds = array<i64: 1>, scalar_prefetch = 0 : i64, scratch_operands = 0 : i64, tpu.core_type = #tpu.core_type<tc>, window_params = [{transform_indices = @transform_0, window_bounds = array<i64: 32, 1152>}, {pipeline_mode = #tpu.pipeline_mode<synchronous>, transform_indices = @transform_1, window_bounds = array<i64: 1152, 128>}, {pipeline_mode = #tpu.pipeline_mode<synchronous>, transform_indices = @transform_2, window_bounds = array<i64: 1, 128>}, {transform_indices = @transform_3, window_bounds = array<i64: 32, 128>}]} {
    %c0 = arith.constant 0 : index
    %c0_0 = arith.constant 0 : index
    %0 = vector.load %arg1[%c0, %c0_0] : memref<32x1152xbf16, #tpu.memory_space<vmem>>, vector<32x1152xbf16>
    %c0_1 = arith.constant 0 : index
    %c0_2 = arith.constant 0 : index
    %1 = vector.load %arg2[%c0_1, %c0_2] : memref<1152x128xbf16, #tpu.memory_space<vmem>>, vector<1152x128xbf16>
    %cst = arith.constant dense<0.000000e+00> : vector<32x128xf32>
    %2 = tpu.matmul %0, %1, %cst {dimension_numbers = #tpu.dot_dimension_numbers<[1], [0], [0], [1], [0, 0, 1, 1], [], []>} : vector<32x1152xbf16>, vector<1152x128xbf16>, vector<32x128xf32> -> vector<32x128xf32>
    %c0_3 = arith.constant 0 : index
    %c0_4 = arith.constant 0 : index
    %3 = vector.load %arg3[%c0_3, %c0_4] : memref<1x128xf32, #tpu.memory_space<vmem>>, vector<1x128xf32>
    %4 = vector.broadcast %3 : vector<1x128xf32> to vector<32x128xf32>
    %5 = arith.addf %2, %4 : vector<32x128xf32>
    %6 = arith.truncf %5 : vector<32x128xf32> to vector<32x128xbf16>
    %c0_5 = arith.constant 0 : index
    %c0_6 = arith.constant 0 : index
    %7 = vector.load %arg4[%c0_5, %c0_6] : memref<32x128xbf16, #tpu.memory_space<vmem>>, vector<32x128xbf16>
    tpu.vector_store %arg4[%c0_5, %c0_6], %6 {strides = array<i32>} : memref<32x128xbf16, #tpu.memory_space<vmem>>, vector<32x128xbf16>,
    return
  }
  func.func @transform_0(%arg0: i32) -> (i32, i32) {
    %c0_i32 = arith.constant 0 : i32
    %c0_i32_0 = arith.constant 0 : i32
    return %arg0, %c0_i32 : i32, i32
  }
  func.func @transform_1(%arg0: i32) -> (i32, i32) {
    %c0_i32 = arith.constant 0 : i32
    %c0_i32_0 = arith.constant 0 : i32
    %c0_i32_1 = arith.constant 0 : i32
    return %c0_i32, %c0_i32_0 : i32, i32
  }
  func.func @transform_2(%arg0: i32) -> (i32, i32) {
    %c0_i32 = arith.constant 0 : i32
    %c0_i32_0 = arith.constant 0 : i32
    %c0_i32_1 = arith.constant 0 : i32
    return %c0_i32, %c0_i32_0 : i32, i32
  }
  func.func @transform_3(%arg0: i32) -> (i32, i32) {
    %c0_i32 = arith.constant 0 : i32
    %c0_i32_0 = arith.constant 0 : i32
    return %arg0, %c0_i32 : i32, i32
  }
}

module attributes {stable_mosaic.version = 11 : i64} {
  func.func @_conv_block_kernel(%arg0: i32, %arg1: memref<32x1152xbf16, #tpu.memory_space<vmem>>, %arg2: memref<1152x32xbf16, #tpu.memory_space<vmem>>, %arg3: memref<1x32xf32, #tpu.memory_space<vmem>>, %arg4: memref<32x128xbf16, #tpu.memory_space<vmem>>, %arg5: memref<1x128xf32, #tpu.memory_space<vmem>>, %arg6: memref<32x128xbf16, #tpu.memory_space<vmem>>) attributes {dimension_semantics = [#tpu.dimension_semantics<parallel>], iteration_bounds = array<i64: 1>, scalar_prefetch = 0 : i64, scratch_operands = 0 : i64, tpu.core_type = #tpu.core_type<tc>, window_params = [{transform_indices = @transform_0, window_bounds = array<i64: 32, 1152>}, {pipeline_mode = #tpu.pipeline_mode<synchronous>, transform_indices = @transform_1, window_bounds = array<i64: 1152, 32>}, {pipeline_mode = #tpu.pipeline_mode<synchronous>, transform_indices = @transform_2, window_bounds = array<i64: 1, 32>}, {pipeline_mode = #tpu.pipeline_mode<synchronous>, transform_indices = @transform_3, window_bounds = array<i64: 32, 128>}, {pipeline_mode = #tpu.pipeline_mode<synchronous>, transform_indices = @transform_4, window_bounds = array<i64: 1, 128>}, {transform_indices = @transform_5, window_bounds = array<i64: 32, 128>}]} {
    %c0 = arith.constant 0 : index
    %c0_0 = arith.constant 0 : index
    %0 = vector.load %arg1[%c0, %c0_0] : memref<32x1152xbf16, #tpu.memory_space<vmem>>, vector<32x1152xbf16>
    %1 = vector.extract_strided_slice %0 {offsets = [0, 512], sizes = [32, 128], strides = [1, 1]} : vector<32x1152xbf16> to vector<32x128xbf16>
    %2 = arith.extf %1 : vector<32x128xbf16> to vector<32x128xf32>
    %cst = arith.constant 0.000000e+00 : bf16
    %3 = vector.broadcast %cst : bf16 to vector<32x1152xbf16>
    %4 = arith.maximumf %0, %3 : vector<32x1152xbf16>
    %c0_1 = arith.constant 0 : index
    %c0_2 = arith.constant 0 : index
    %5 = vector.load %arg2[%c0_1, %c0_2] : memref<1152x32xbf16, #tpu.memory_space<vmem>>, vector<1152x32xbf16>
    %cst_3 = arith.constant dense<0.000000e+00> : vector<32x32xf32>
    %6 = tpu.matmul %4, %5, %cst_3 {dimension_numbers = #tpu.dot_dimension_numbers<[1], [0], [0], [1], [0, 0, 1, 1], [], []>} : vector<32x1152xbf16>, vector<1152x32xbf16>, vector<32x32xf32> -> vector<32x32xf32>
    %c0_4 = arith.constant 0 : index
    %c0_5 = arith.constant 0 : index
    %7 = vector.load %arg3[%c0_4, %c0_5] : memref<1x32xf32, #tpu.memory_space<vmem>>, vector<1x32xf32>
    %8 = vector.broadcast %7 : vector<1x32xf32> to vector<32x32xf32>
    %9 = arith.addf %6, %8 : vector<32x32xf32>
    %cst_6 = arith.constant 0.000000e+00 : f32
    %10 = vector.broadcast %cst_6 : f32 to vector<32x32xf32>
    %11 = arith.maximumf %9, %10 : vector<32x32xf32>
    %12 = arith.truncf %11 : vector<32x32xf32> to vector<32x32xbf16>
    %c0_7 = arith.constant 0 : index
    %c0_8 = arith.constant 0 : index
    %13 = vector.load %arg4[%c0_7, %c0_8] : memref<32x128xbf16, #tpu.memory_space<vmem>>, vector<32x128xbf16>
    %cst_9 = arith.constant dense<0.000000e+00> : vector<32x128xf32>
    %14 = tpu.matmul %12, %13, %cst_9 {dimension_numbers = #tpu.dot_dimension_numbers<[1], [0], [0], [1], [0, 0, 1, 1], [], []>} : vector<32x32xbf16>, vector<32x128xbf16>, vector<32x128xf32> -> vector<32x128xf32>
    %c0_10 = arith.constant 0 : index
    %c0_11 = arith.constant 0 : index
    %15 = vector.load %arg5[%c0_10, %c0_11] : memref<1x128xf32, #tpu.memory_space<vmem>>, vector<1x128xf32>
    %16 = vector.broadcast %15 : vector<1x128xf32> to vector<32x128xf32>
    %17 = arith.addf %14, %16 : vector<32x128xf32>
    %18 = arith.addf %17, %2 : vector<32x128xf32>
    %19 = arith.truncf %18 : vector<32x128xf32> to vector<32x128xbf16>
    %c0_12 = arith.constant 0 : index
    %c0_13 = arith.constant 0 : index
    %20 = vector.load %arg6[%c0_12, %c0_13] : memref<32x128xbf16, #tpu.memory_space<vmem>>, vector<32x128xbf16>
    tpu.vector_store %arg6[%c0_12, %c0_13], %19 {strides = array<i32>} : memref<32x128xbf16, #tpu.memory_space<vmem>>, vector<32x128xbf16>,
    return
  }
  func.func @transform_0(%arg0: i32) -> (i32, i32) {
    %c0_i32 = arith.constant 0 : i32
    %c0_i32_0 = arith.constant 0 : i32
    return %arg0, %c0_i32 : i32, i32
  }
  func.func @transform_1(%arg0: i32) -> (i32, i32) {
    %c0_i32 = arith.constant 0 : i32
    %c0_i32_0 = arith.constant 0 : i32
    %c0_i32_1 = arith.constant 0 : i32
    return %c0_i32, %c0_i32_0 : i32, i32
  }
  func.func @transform_2(%arg0: i32) -> (i32, i32) {
    %c0_i32 = arith.constant 0 : i32
    %c0_i32_0 = arith.constant 0 : i32
    %c0_i32_1 = arith.constant 0 : i32
    return %c0_i32, %c0_i32_0 : i32, i32
  }
  func.func @transform_3(%arg0: i32) -> (i32, i32) {
    %c0_i32 = arith.constant 0 : i32
    %c0_i32_0 = arith.constant 0 : i32
    %c0_i32_1 = arith.constant 0 : i32
    return %c0_i32, %c0_i32_0 : i32, i32
  }
  func.func @transform_4(%arg0: i32) -> (i32, i32) {
    %c0_i32 = arith.constant 0 : i32
    %c0_i32_0 = arith.constant 0 : i32
    %c0_i32_1 = arith.constant 0 : i32
    return %c0_i32, %c0_i32_0 : i32, i32
  }
  func.func @transform_5(%arg0: i32) -> (i32, i32) {
    %c0_i32 = arith.constant 0 : i32
    %c0_i32_0 = arith.constant 0 : i32
    return %arg0, %c0_i32 : i32, i32
  }
}

module attributes {stable_mosaic.version = 11 : i64} {
  func.func @_qconv_vq_kernel(%arg0: i32, %arg1: memref<32x128xbf16, #tpu.memory_space<vmem>>, %arg2: memref<128x32xbf16, #tpu.memory_space<vmem>>, %arg3: memref<1x32xf32, #tpu.memory_space<vmem>>, %arg4: memref<32x256xbf16, #tpu.memory_space<vmem>>, %arg5: memref<1x256xf32, #tpu.memory_space<vmem>>, %arg6: memref<256x32xf32, #tpu.memory_space<vmem>>, %arg7: memref<32x32xf32, #tpu.memory_space<vmem>>, %arg8: memref<32x1xi32, #tpu.memory_space<vmem>>, %arg9: memref<32x1xf32, #tpu.memory_space<vmem>>) attributes {dimension_semantics = [#tpu.dimension_semantics<parallel>], iteration_bounds = array<i64: 1>, scalar_prefetch = 0 : i64, scratch_operands = 0 : i64, tpu.core_type = #tpu.core_type<tc>, window_params = [{transform_indices = @transform_0, window_bounds = array<i64: 32, 128>}, {pipeline_mode = #tpu.pipeline_mode<synchronous>, transform_indices = @transform_1, window_bounds = array<i64: 128, 32>}, {pipeline_mode = #tpu.pipeline_mode<synchronous>, transform_indices = @transform_2, window_bounds = array<i64: 1, 32>}, {pipeline_mode = #tpu.pipeline_mode<synchronous>, transform_indices = @transform_3, window_bounds = array<i64: 32, 256>}, {pipeline_mode = #tpu.pipeline_mode<synchronous>, transform_indices = @transform_4, window_bounds = array<i64: 1, 256>}, {pipeline_mode = #tpu.pipeline_mode<synchronous>, transform_indices = @transform_5, window_bounds = array<i64: 256, 32>}, {transform_indices = @transform_6, window_bounds = array<i64: 32, 32>}, {transform_indices = @transform_7, window_bounds = array<i64: 32, 1>}, {transform_indices = @transform_8, window_bounds = array<i64: 32, 1>}]} {
    %c0 = arith.constant 0 : index
    %c0_0 = arith.constant 0 : index
    %0 = vector.load %arg1[%c0, %c0_0] : memref<32x128xbf16, #tpu.memory_space<vmem>>, vector<32x128xbf16>
    %cst = arith.constant 0.000000e+00 : bf16
    %1 = vector.broadcast %cst : bf16 to vector<32x128xbf16>
    %2 = arith.maximumf %0, %1 : vector<32x128xbf16>
    %c0_1 = arith.constant 0 : index
    %c0_2 = arith.constant 0 : index
    %3 = vector.load %arg2[%c0_1, %c0_2] : memref<128x32xbf16, #tpu.memory_space<vmem>>, vector<128x32xbf16>
    %cst_3 = arith.constant dense<0.000000e+00> : vector<32x32xf32>
    %4 = tpu.matmul %2, %3, %cst_3 {dimension_numbers = #tpu.dot_dimension_numbers<[1], [0], [0], [1], [0, 0, 1, 1], [], []>} : vector<32x128xbf16>, vector<128x32xbf16>, vector<32x32xf32> -> vector<32x32xf32>
    %c0_4 = arith.constant 0 : index
    %c0_5 = arith.constant 0 : index
    %5 = vector.load %arg3[%c0_4, %c0_5] : memref<1x32xf32, #tpu.memory_space<vmem>>, vector<1x32xf32>
    %6 = vector.broadcast %5 : vector<1x32xf32> to vector<32x32xf32>
    %7 = arith.addf %4, %6 : vector<32x32xf32>
    %8 = arith.truncf %7 : vector<32x32xf32> to vector<32x32xbf16>
    %c0_6 = arith.constant 0 : index
    %c0_7 = arith.constant 0 : index
    %9 = vector.load %arg4[%c0_6, %c0_7] : memref<32x256xbf16, #tpu.memory_space<vmem>>, vector<32x256xbf16>
    %cst_8 = arith.constant dense<0.000000e+00> : vector<32x256xf32>
    %10 = tpu.matmul %8, %9, %cst_8 {dimension_numbers = #tpu.dot_dimension_numbers<[1], [0], [0], [1], [0, 0, 1, 1], [], []>} : vector<32x32xbf16>, vector<32x256xbf16>, vector<32x256xf32> -> vector<32x256xf32>
    %cst_9 = arith.constant 2.000000e+00 : f32
    %11 = vector.broadcast %cst_9 : f32 to vector<32x256xf32>
    %12 = arith.mulf %11, %10 : vector<32x256xf32>
    %c0_10 = arith.constant 0 : index
    %c0_11 = arith.constant 0 : index
    %13 = vector.load %arg5[%c0_10, %c0_11] : memref<1x256xf32, #tpu.memory_space<vmem>>, vector<1x256xf32>
    %14 = vector.broadcast %13 : vector<1x256xf32> to vector<32x256xf32>
    %15 = arith.subf %12, %14 : vector<32x256xf32>
    %cst_12 = arith.constant dense<0xFF800000> : vector<32xf32>
    %16 = vector.multi_reduction <maximumf>, %15, %cst_12 [1] : vector<32x256xf32> to vector<32xf32>
    %17 = vector.shape_cast %16 : vector<32xf32> to vector<32x1xf32>
    %18 = tpu.iota {dimensions = array<i32: 1>} : vector<32x256xi32>
    %19 = vector.broadcast %17 : vector<32x1xf32> to vector<32x256xf32>
    %20 = arith.cmpf oeq, %15, %19 : vector<32x256xf32>
    %c2147483647_i32 = arith.constant 2147483647 : i32
    %21 = vector.broadcast %c2147483647_i32 : i32 to vector<32x256xi32>
    %22 = arith.select %20, %18, %21 : vector<32x256xi1>, vector<32x256xi32>
    %cst_13 = arith.constant dense<2147483647> : vector<32xi32>
    %23 = vector.multi_reduction <minsi>, %22, %cst_13 [1] : vector<32x256xi32> to vector<32xi32>
    %24 = vector.shape_cast %23 : vector<32xi32> to vector<32x1xi32>
    %25 = vector.broadcast %24 : vector<32x1xi32> to vector<32x256xi32>
    %26 = arith.cmpi eq, %18, %25 : vector<32x256xi32>
    %27 = arith.extui %26 : vector<32x256xi1> to vector<32x256xi32>
    %28 = arith.sitofp %27 : vector<32x256xi32> to vector<32x256xf32>
    %c0_14 = arith.constant 0 : index
    %c0_15 = arith.constant 0 : index
    %29 = vector.load %arg6[%c0_14, %c0_15] : memref<256x32xf32, #tpu.memory_space<vmem>>, vector<256x32xf32>
    %cst_16 = arith.constant dense<0.000000e+00> : vector<32x32xf32>
    %30 = tpu.matmul %28, %29, %cst_16 {dimension_numbers = #tpu.dot_dimension_numbers<[1], [0], [0], [1], [0, 0, 1, 1], [], []>} : vector<32x256xf32>, vector<256x32xf32>, vector<32x32xf32> -> vector<32x32xf32>
    %c0_17 = arith.constant 0 : index
    %c0_18 = arith.constant 0 : index
    %31 = vector.load %arg7[%c0_17, %c0_18] : memref<32x32xf32, #tpu.memory_space<vmem>>, vector<32x32xf32>
    tpu.vector_store %arg7[%c0_17, %c0_18], %30 {strides = array<i32>} : memref<32x32xf32, #tpu.memory_space<vmem>>, vector<32x32xf32>,
    %c0_19 = arith.constant 0 : index
    %c0_20 = arith.constant 0 : index
    %32 = vector.load %arg8[%c0_19, %c0_20] : memref<32x1xi32, #tpu.memory_space<vmem>>, vector<32x1xi32>
    tpu.vector_store %arg8[%c0_19, %c0_20], %24 {strides = array<i32>} : memref<32x1xi32, #tpu.memory_space<vmem>>, vector<32x1xi32>,
    %33 = arith.subf %30, %7 : vector<32x32xf32>
    %34 = arith.mulf %33, %33 : vector<32x32xf32>
    %cst_21 = arith.constant dense<0.000000e+00> : vector<32xf32>
    %35 = vector.multi_reduction <add>, %34, %cst_21 [1] : vector<32x32xf32> to vector<32xf32>
    %36 = vector.shape_cast %35 : vector<32xf32> to vector<32x1xf32>
    %c0_22 = arith.constant 0 : index
    %c0_23 = arith.constant 0 : index
    %37 = vector.load %arg9[%c0_22, %c0_23] : memref<32x1xf32, #tpu.memory_space<vmem>>, vector<32x1xf32>
    tpu.vector_store %arg9[%c0_22, %c0_23], %36 {strides = array<i32>} : memref<32x1xf32, #tpu.memory_space<vmem>>, vector<32x1xf32>,
    return
  }
  func.func @transform_0(%arg0: i32) -> (i32, i32) {
    %c0_i32 = arith.constant 0 : i32
    %c0_i32_0 = arith.constant 0 : i32
    return %arg0, %c0_i32 : i32, i32
  }
  func.func @transform_1(%arg0: i32) -> (i32, i32) {
    %c0_i32 = arith.constant 0 : i32
    %c0_i32_0 = arith.constant 0 : i32
    %c0_i32_1 = arith.constant 0 : i32
    return %c0_i32, %c0_i32_0 : i32, i32
  }
  func.func @transform_2(%arg0: i32) -> (i32, i32) {
    %c0_i32 = arith.constant 0 : i32
    %c0_i32_0 = arith.constant 0 : i32
    %c0_i32_1 = arith.constant 0 : i32
    return %c0_i32, %c0_i32_0 : i32, i32
  }
  func.func @transform_3(%arg0: i32) -> (i32, i32) {
    %c0_i32 = arith.constant 0 : i32
    %c0_i32_0 = arith.constant 0 : i32
    %c0_i32_1 = arith.constant 0 : i32
    return %c0_i32, %c0_i32_0 : i32, i32
  }
  func.func @transform_4(%arg0: i32) -> (i32, i32) {
    %c0_i32 = arith.constant 0 : i32
    %c0_i32_0 = arith.constant 0 : i32
    %c0_i32_1 = arith.constant 0 : i32
    return %c0_i32, %c0_i32_0 : i32, i32
  }
  func.func @transform_5(%arg0: i32) -> (i32, i32) {
    %c0_i32 = arith.constant 0 : i32
    %c0_i32_0 = arith.constant 0 : i32
    %c0_i32_1 = arith.constant 0 : i32
    return %c0_i32, %c0_i32_0 : i32, i32
  }
  func.func @transform_6(%arg0: i32) -> (i32, i32) {
    %c0_i32 = arith.constant 0 : i32
    %c0_i32_0 = arith.constant 0 : i32
    return %arg0, %c0_i32 : i32, i32
  }
  func.func @transform_7(%arg0: i32) -> (i32, i32) {
    %c0_i32 = arith.constant 0 : i32
    %c0_i32_0 = arith.constant 0 : i32
    return %arg0, %c0_i32 : i32, i32
  }
  func.func @transform_8(%arg0: i32) -> (i32, i32) {
    %c0_i32 = arith.constant 0 : i32
    %c0_i32_0 = arith.constant 0 : i32
    return %arg0, %c0_i32 : i32, i32
  }
}

module attributes {stable_mosaic.version = 11 : i64} {
  func.func @_mm_kernel(%arg0: i32, %arg1: memref<32x288xbf16, #tpu.memory_space<vmem>>, %arg2: memref<288x128xbf16, #tpu.memory_space<vmem>>, %arg3: memref<1x128xf32, #tpu.memory_space<vmem>>, %arg4: memref<32x128xbf16, #tpu.memory_space<vmem>>) attributes {dimension_semantics = [#tpu.dimension_semantics<parallel>], iteration_bounds = array<i64: 1>, scalar_prefetch = 0 : i64, scratch_operands = 0 : i64, tpu.core_type = #tpu.core_type<tc>, window_params = [{transform_indices = @transform_0, window_bounds = array<i64: 32, 288>}, {pipeline_mode = #tpu.pipeline_mode<synchronous>, transform_indices = @transform_1, window_bounds = array<i64: 288, 128>}, {pipeline_mode = #tpu.pipeline_mode<synchronous>, transform_indices = @transform_2, window_bounds = array<i64: 1, 128>}, {transform_indices = @transform_3, window_bounds = array<i64: 32, 128>}]} {
    %c0 = arith.constant 0 : index
    %c0_0 = arith.constant 0 : index
    %0 = vector.load %arg1[%c0, %c0_0] : memref<32x288xbf16, #tpu.memory_space<vmem>>, vector<32x288xbf16>
    %c0_1 = arith.constant 0 : index
    %c0_2 = arith.constant 0 : index
    %1 = vector.load %arg2[%c0_1, %c0_2] : memref<288x128xbf16, #tpu.memory_space<vmem>>, vector<288x128xbf16>
    %cst = arith.constant dense<0.000000e+00> : vector<32x128xf32>
    %2 = tpu.matmul %0, %1, %cst {dimension_numbers = #tpu.dot_dimension_numbers<[1], [0], [0], [1], [0, 0, 1, 1], [], []>} : vector<32x288xbf16>, vector<288x128xbf16>, vector<32x128xf32> -> vector<32x128xf32>
    %c0_3 = arith.constant 0 : index
    %c0_4 = arith.constant 0 : index
    %3 = vector.load %arg3[%c0_3, %c0_4] : memref<1x128xf32, #tpu.memory_space<vmem>>, vector<1x128xf32>
    %4 = vector.broadcast %3 : vector<1x128xf32> to vector<32x128xf32>
    %5 = arith.addf %2, %4 : vector<32x128xf32>
    %6 = arith.truncf %5 : vector<32x128xf32> to vector<32x128xbf16>
    %c0_5 = arith.constant 0 : index
    %c0_6 = arith.constant 0 : index
    %7 = vector.load %arg4[%c0_5, %c0_6] : memref<32x128xbf16, #tpu.memory_space<vmem>>, vector<32x128xbf16>
    tpu.vector_store %arg4[%c0_5, %c0_6], %6 {strides = array<i32>} : memref<32x128xbf16, #tpu.memory_space<vmem>>, vector<32x128xbf16>,
    return
  }
  func.func @transform_0(%arg0: i32) -> (i32, i32) {
    %c0_i32 = arith.constant 0 : i32
    %c0_i32_0 = arith.constant 0 : i32
    return %arg0, %c0_i32 : i32, i32
  }
  func.func @transform_1(%arg0: i32) -> (i32, i32) {
    %c0_i32 = arith.constant 0 : i32
    %c0_i32_0 = arith.constant 0 : i32
    %c0_i32_1 = arith.constant 0 : i32
    return %c0_i32, %c0_i32_0 : i32, i32
  }
  func.func @transform_2(%arg0: i32) -> (i32, i32) {
    %c0_i32 = arith.constant 0 : i32
    %c0_i32_0 = arith.constant 0 : i32
    %c0_i32_1 = arith.constant 0 : i32
    return %c0_i32, %c0_i32_0 : i32, i32
  }
  func.func @transform_3(%arg0: i32) -> (i32, i32) {
    %c0_i32 = arith.constant 0 : i32
    %c0_i32_0 = arith.constant 0 : i32
    return %arg0, %c0_i32 : i32, i32
  }
}

module attributes {stable_mosaic.version = 11 : i64} {
  func.func @_mm_kernel(%arg0: i32, %arg1: memref<32x1152xbf16, #tpu.memory_space<vmem>>, %arg2: memref<1152x256xbf16, #tpu.memory_space<vmem>>, %arg3: memref<1x256xf32, #tpu.memory_space<vmem>>, %arg4: memref<32x256xbf16, #tpu.memory_space<vmem>>) attributes {dimension_semantics = [#tpu.dimension_semantics<parallel>], iteration_bounds = array<i64: 1>, scalar_prefetch = 0 : i64, scratch_operands = 0 : i64, tpu.core_type = #tpu.core_type<tc>, window_params = [{transform_indices = @transform_0, window_bounds = array<i64: 32, 1152>}, {pipeline_mode = #tpu.pipeline_mode<synchronous>, transform_indices = @transform_1, window_bounds = array<i64: 1152, 256>}, {pipeline_mode = #tpu.pipeline_mode<synchronous>, transform_indices = @transform_2, window_bounds = array<i64: 1, 256>}, {transform_indices = @transform_3, window_bounds = array<i64: 32, 256>}]} {
    %c0 = arith.constant 0 : index
    %c0_0 = arith.constant 0 : index
    %0 = vector.load %arg1[%c0, %c0_0] : memref<32x1152xbf16, #tpu.memory_space<vmem>>, vector<32x1152xbf16>
    %cst = arith.constant 0.000000e+00 : bf16
    %1 = vector.broadcast %cst : bf16 to vector<32x1152xbf16>
    %2 = arith.maximumf %0, %1 : vector<32x1152xbf16>
    %c0_1 = arith.constant 0 : index
    %c0_2 = arith.constant 0 : index
    %3 = vector.load %arg2[%c0_1, %c0_2] : memref<1152x256xbf16, #tpu.memory_space<vmem>>, vector<1152x256xbf16>
    %cst_3 = arith.constant dense<0.000000e+00> : vector<32x256xf32>
    %4 = tpu.matmul %2, %3, %cst_3 {dimension_numbers = #tpu.dot_dimension_numbers<[1], [0], [0], [1], [0, 0, 1, 1], [], []>} : vector<32x1152xbf16>, vector<1152x256xbf16>, vector<32x256xf32> -> vector<32x256xf32>
    %c0_4 = arith.constant 0 : index
    %c0_5 = arith.constant 0 : index
    %5 = vector.load %arg3[%c0_4, %c0_5] : memref<1x256xf32, #tpu.memory_space<vmem>>, vector<1x256xf32>
    %6 = vector.broadcast %5 : vector<1x256xf32> to vector<32x256xf32>
    %7 = arith.addf %4, %6 : vector<32x256xf32>
    %cst_6 = arith.constant 0.000000e+00 : f32
    %8 = vector.broadcast %cst_6 : f32 to vector<32x256xf32>
    %9 = arith.maximumf %7, %8 : vector<32x256xf32>
    %10 = arith.truncf %9 : vector<32x256xf32> to vector<32x256xbf16>
    %c0_7 = arith.constant 0 : index
    %c0_8 = arith.constant 0 : index
    %11 = vector.load %arg4[%c0_7, %c0_8] : memref<32x256xbf16, #tpu.memory_space<vmem>>, vector<32x256xbf16>
    tpu.vector_store %arg4[%c0_7, %c0_8], %10 {strides = array<i32>} : memref<32x256xbf16, #tpu.memory_space<vmem>>, vector<32x256xbf16>,
    return
  }
  func.func @transform_0(%arg0: i32) -> (i32, i32) {
    %c0_i32 = arith.constant 0 : i32
    %c0_i32_0 = arith.constant 0 : i32
    return %arg0, %c0_i32 : i32, i32
  }
  func.func @transform_1(%arg0: i32) -> (i32, i32) {
    %c0_i32 = arith.constant 0 : i32
    %c0_i32_0 = arith.constant 0 : i32
    %c0_i32_1 = arith.constant 0 : i32
    return %c0_i32, %c0_i32_0 : i32, i32
  }
  func.func @transform_2(%arg0: i32) -> (i32, i32) {
    %c0_i32 = arith.constant 0 : i32
    %c0_i32_0 = arith.constant 0 : i32
    %c0_i32_1 = arith.constant 0 : i32
    return %c0_i32, %c0_i32_0 : i32, i32
  }
  func.func @transform_3(%arg0: i32) -> (i32, i32) {
    %c0_i32 = arith.constant 0 : i32
    %c0_i32_0 = arith.constant 0 : i32
    return %arg0, %c0_i32 : i32, i32
  }
}

module attributes {stable_mosaic.version = 11 : i64} {
  func.func @_mm_kernel(%arg0: i32, %arg1: memref<64x576xbf16, #tpu.memory_space<vmem>>, %arg2: memref<576x12xbf16, #tpu.memory_space<vmem>>, %arg3: memref<1x12xf32, #tpu.memory_space<vmem>>, %arg4: memref<64x12xf32, #tpu.memory_space<vmem>>) attributes {dimension_semantics = [#tpu.dimension_semantics<parallel>], iteration_bounds = array<i64: 2>, scalar_prefetch = 0 : i64, scratch_operands = 0 : i64, tpu.core_type = #tpu.core_type<tc>, window_params = [{transform_indices = @transform_0, window_bounds = array<i64: 64, 576>}, {pipeline_mode = #tpu.pipeline_mode<synchronous>, transform_indices = @transform_1, window_bounds = array<i64: 576, 12>}, {pipeline_mode = #tpu.pipeline_mode<synchronous>, transform_indices = @transform_2, window_bounds = array<i64: 1, 12>}, {transform_indices = @transform_3, window_bounds = array<i64: 64, 12>}]} {
    %c0 = arith.constant 0 : index
    %c0_0 = arith.constant 0 : index
    %0 = vector.load %arg1[%c0, %c0_0] : memref<64x576xbf16, #tpu.memory_space<vmem>>, vector<64x576xbf16>
    %c0_1 = arith.constant 0 : index
    %c0_2 = arith.constant 0 : index
    %1 = vector.load %arg2[%c0_1, %c0_2] : memref<576x12xbf16, #tpu.memory_space<vmem>>, vector<576x12xbf16>
    %cst = arith.constant dense<0.000000e+00> : vector<64x12xf32>
    %2 = tpu.matmul %0, %1, %cst {dimension_numbers = #tpu.dot_dimension_numbers<[1], [0], [0], [1], [0, 0, 1, 1], [], []>} : vector<64x576xbf16>, vector<576x12xbf16>, vector<64x12xf32> -> vector<64x12xf32>
    %c0_3 = arith.constant 0 : index
    %c0_4 = arith.constant 0 : index
    %3 = vector.load %arg3[%c0_3, %c0_4] : memref<1x12xf32, #tpu.memory_space<vmem>>, vector<1x12xf32>
    %4 = vector.broadcast %3 : vector<1x12xf32> to vector<64x12xf32>
    %5 = arith.addf %2, %4 : vector<64x12xf32>
    %c0_5 = arith.constant 0 : index
    %c0_6 = arith.constant 0 : index
    %6 = vector.load %arg4[%c0_5, %c0_6] : memref<64x12xf32, #tpu.memory_space<vmem>>, vector<64x12xf32>
    tpu.vector_store %arg4[%c0_5, %c0_6], %5 {strides = array<i32>} : memref<64x12xf32, #tpu.memory_space<vmem>>, vector<64x12xf32>,
    return
  }
  func.func @transform_0(%arg0: i32) -> (i32, i32) {
    %c0_i32 = arith.constant 0 : i32
    %c0_i32_0 = arith.constant 0 : i32
    return %arg0, %c0_i32 : i32, i32
  }
  func.func @transform_1(%arg0: i32) -> (i32, i32) {
    %c0_i32 = arith.constant 0 : i32
    %c0_i32_0 = arith.constant 0 : i32
    %c0_i32_1 = arith.constant 0 : i32
    return %c0_i32, %c0_i32_0 : i32, i32
  }
  func.func @transform_2(%arg0: i32) -> (i32, i32) {
    %c0_i32 = arith.constant 0 : i32
    %c0_i32_0 = arith.constant 0 : i32
    %c0_i32_1 = arith.constant 0 : i32
    return %c0_i32, %c0_i32_0 : i32, i32
  }
  func.func @transform_3(%arg0: i32) -> (i32, i32) {
    %c0_i32 = arith.constant 0 : i32
    %c0_i32_0 = arith.constant 0 : i32
    return %arg0, %c0_i32 : i32, i32
  }
}

</mosaic_0001>

<bundles_post_ra>
// kernel: s_vqvae_forward.11
= control target key start
LH: loop header
LB: loop body
LE: loop exit
PB: predicated region body
PF: predicated region fallthrough
CT: control target
= control target key end

     0   :  { %s526_s12 = smov 0   ;;  %s576_s0 = inlined_call_operand.vmem [shape: bf16[128,48], index: 0, kind: input, shape index: {}]   ;;  %s577_s1 = inlined_call_operand.vmem [shape: bf16[48,64], index: 1, kind: input, shape index: {}]   ;;  %s578_s2 = inlined_call_operand.vmem [shape: f32[1,64], index: 2, kind: input, shape index: {}]   ;;  %s579_s3 = inlined_call_operand.vmem [shape: bf16[128,64], index: 3, kind: output, shape index: {}]  }
   0x1 LB: > { %s417_s13 = sadd.s32 4294967295, %s504_s12   ;;  %p421_p0 = scmp.ge.s32.totalorder %s504_s12, 1  ;;  %s504_s12 = sphi %s526_s12, %s13_s12  }
   0x2   : > { %p138_p1 = scmp.lt.s32.totalorder %s504_s12, 3 }
   0x4   : > { %p139_p2 = pnand %p421_p0, %p138_p1 }
   0x5   : > { %s422_s16 = sshll.u32 (!%p139_p2), %s417_s13, 3 }
   0x6   : > { %142 = sbr.rel (%p139_p2) target bundleno = 231 (0xe7), region = 32  ;;  %p163_p3 = scmp.lt.s32.totalorder (!%p139_p2), %s422_s16, 15 }
   0xb   : > { %v491_v0 = vld [vmem:[%s577_s1 + $0x10] sm:$0xff]   ;;  %v492_v1 = vld [vmem:[%s577_s1 + $0x8] sm:$0xff]   ;;  %s581_s16 = smov (!%p163_p3, %s422_s16), 15  ;;  %v493_v2 = vld [vmem:[%s577_s1] sm:$0xff]   ;;  %vm234_vm0 = vcmask 392192   ;;  %vm352_vm1 = vcmask 519168  }
   0xc   : > { %463 = vmatprep.subr.bf16.mxu0 %v491_v0  ;;  %477 = vmatprep.subr.bf16.mxu1 %v491_v0  ;;  %s423_s21 = sshll.u32 %s581_s16, 2  ;;  %v426_v7 = vld [vmem:[%s578_s2] ss:$0 sm:$0xff] }
   0xd   : > { %464 = vmatpush3.bf16.msra.mxu0 %v491_v0  ;;  %480 = vmatpush3.bf16.msra.mxu1 %v491_v0  ;;  %s166_s24 = scalar_lea.vmem %s576_s0, %s423_s21  ;;  %s555_s29 = scalar_lea.vmem %s579_s3, %s423_s21 }
   0xe   : > { %465 = vmatprep.subr.bf16.mxu0 %v492_v1  ;;  %478 = vmatprep.subr.bf16.mxu1 %v492_v1  ;;  %v494_v3 = vld [vmem:[%s166_s24] sm:$0xff]   ;;  %v495_v4 = vld [vmem:[%s166_s24 + $0x10] sm:$0xff]   ;;  %v496_v5 = vld [vmem:[%s166_s24 + $0x8] sm:$0xff]  }
   0xf   : > { %469 = vmatprep.mubr.msk.bf16.mxu0 %vm234_vm0, %v494_v3  ;;  %473 = vmatprep.mubr.msk.bf16.mxu1 %vm234_vm0, %v495_v4  ;;  %v497_v6 = vld [vmem:[%s166_s24 + $0x18] sm:$0xff]  }
  0x11   : > { %466 = vmatpush3.bf16.msra.mxu0 %v492_v1  ;;  %481 = vmatpush3.bf16.msra.mxu1 %v492_v1 }
  0x12   : > { %467 = vmatprep.subr.bf16.mxu0 %v493_v2  ;;  %479 = vmatprep.subr.bf16.mxu1 %v493_v2 }
  0x15   : > { %468 = vmatpush3.bf16.msra.mxu0 %v493_v2  ;;  %482 = vmatpush3.bf16.msra.mxu1 %v493_v2 }
  0x18   : > { %470 = vmatmul.mubr.msk.bf16.vlgmr.msra.gmra.mxu0 %vm234_vm0, %v496_v5  ;;  %474 = vmatmul.mubr.msk.bf16.vlgmr.msra.gmra.mxu1 %vm234_vm0, %v497_v6 }
  0xd8   : > { %v471_v8 = vpop.f32.mrf.mxu0  ;;  %v475_v9 = vpop.f32.mrf.mxu1 }
  0xd9   : > { %v290_v10 = vadd.f32 %v471_v8, %v426_v7  ;;  %v306_v11 = vadd.f32 %v475_v9, %v426_v7 }
  0xda   : > { %v281_v12 = vpop.f32.mrf.mxu0  ;;  %v297_v13 = vpop.f32.mrf.mxu1 }
  0xdb   : > { %v314_v14 = vmax.f32 %v290_v10, 0.0  ;;  %v318_v15 = vmax.f32 %v306_v11, 0.0  ;;  %v282_v16 = vadd.f32 %v426_v7, %v281_v12  ;;  %v298_v17 = vadd.f32 %v426_v7, %v297_v13 }
  0xdc   : > { %v472_v18 = vpop.f32.mrf.mxu0  ;;  %v476_v19 = vpop.f32.mrf.mxu1 }
  0xdd   : > { %v450_v20 = vpack.c.bf16 %v314_v14, %v314_v14  ;;  %v454_v21 = vpack.c.bf16 %v318_v15, %v318_v15  ;;  %v312_v22 = vmax.f32 %v282_v16, 0.0  ;;  %v316_v23 = vmax.f32 %v298_v17, 0.0 }
  0xde   : > { %v293_v24 = vadd.f32 %v472_v18, %v426_v7  ;;  %v309_v25 = vadd.f32 %v476_v19, %v426_v7  ;;  %v284_v26 = vpop.f32.mrf.mxu0  ;;  %v300_v27 = vpop.f32.mrf.mxu1 }
  0xdf   : > { %355 = vst.msk [vmem:[%s555_s29 + $0x8] sm:$0xf] %vm352_vm1, %v450_v20  ;;  %359 = vst.msk [vmem:[%s555_s29 + $0x18] sm:$0xf] %vm352_vm1, %v454_v21  ;;  %v448_v28 = vpack.c.bf16 %v312_v22, %v312_v22  ;;  %v452_v29 = vpack.c.bf16 %v316_v23, %v316_v23  ;;  %v285_v30 = vadd.f32 %v426_v7, %v284_v26 }
  0xe0   : > { %v301_v31 = vadd.f32 %v426_v7, %v300_v27  ;;  %v315_v32 = vmax.f32 %v293_v24, 0.0  ;;  %v319_v33 = vmax.f32 %v309_v25, 0.0 }
  0xe1   : > { %353 = vst.msk [vmem:[%s555_s29] sm:$0xf] %vm352_vm1, %v448_v28  ;;  %357 = vst.msk [vmem:[%s555_s29 + $0x10] sm:$0xf] %vm352_vm1, %v452_v29  ;;  %v313_v34 = vmax.f32 %v285_v30, 0.0 }
  0xe2   : > { %v317_v35 = vmax.f32 %v301_v31, 0.0  ;;  %v451_v36 = vpack.c.bf16 %v315_v32, %v315_v32  ;;  %v455_v37 = vpack.c.bf16 %v319_v33, %v319_v33 }
  0xe3   : > { %v449_v38 = vpack.c.bf16 %v313_v34, %v313_v34 }
  0xe4   : > { %v453_v39 = vpack.c.bf16 %v317_v35, %v317_v35  ;;  %356 = vst.msk [vmem:[%s555_s29 + $0xc] sm:$0xf] %vm352_vm1, %v451_v36  ;;  %360 = vst.msk [vmem:[%s555_s29 + $0x1c] sm:$0xf] %vm352_vm1, %v455_v37 }
  0xe5   : > { %354 = vst.msk [vmem:[%s555_s29 + $0x4] sm:$0xf] %vm352_vm1, %v449_v38 }
  0xe6   : > { %358 = vst.msk [vmem:[%s555_s29 + $0x14] sm:$0xf] %vm352_vm1, %v453_v39 }
  0xe7 PF: > { %s13_s12 = sadd.s32 1, %s504_s12  }
  0xe8   : > { %p10_p4 = scmp.ge.s32.totalorder %s13_s12, 4  }
  0xea   :  { %12 = sbr.rel (!%p10_p4) target bundleno = 1 (0x1), region = 62 }

// kernel: s_vqvae_forward.12
= control target key start
LH: loop header
LB: loop body
LE: loop exit
PB: predicated region body
PF: predicated region fallthrough
CT: control target
= control target key end

     0   :  { %s1399_s1 = inlined_call_operand.vmem [shape: bf16[1024,128], index: 1, kind: input, shape index: {}]   ;;  %s1400_s0 = inlined_call_operand.vmem [shape: bf16[32,1024], index: 0, kind: input, shape index: {}]   ;;  %s1401_s2 = inlined_call_operand.vmem [shape: f32[1,128], index: 2, kind: input, shape index: {}]   ;;  %s1402_s3 = inlined_call_operand.vmem [shape: bf16[32,128], index: 3, kind: output, shape index: {}]  }
   0x1   :  { %v1066_v0 = vld [vmem:[%s1399_s1 + $0x78] sm:$0xff]   ;;  %v1070_v4 = vld [vmem:[%s1399_s1 + $0x70] sm:$0xff]   ;;  %v1074_v8 = vld [vmem:[%s1399_s1 + $0x68] sm:$0xff]  }
   0x2   :  { %v1067_v1 = vld [vmem:[%s1399_s1 + $0xf8] sm:$0xff]   ;;  %954 = vmatprep.subr.bf16.mxu0 %v1066_v0  ;;  %v1071_v5 = vld [vmem:[%s1399_s1 + $0xf0] sm:$0xff]   ;;  %v1075_v9 = vld [vmem:[%s1399_s1 + $0xe8] sm:$0xff]  }
   0x3   :  { %v1068_v2 = vld [vmem:[%s1399_s1 + $0x38] sm:$0xff]   ;;  %982 = vmatprep.subr.bf16.mxu1 %v1067_v1  ;;  %v1072_v6 = vld [vmem:[%s1399_s1 + $0x30] sm:$0xff]   ;;  %v1076_v10 = vld [vmem:[%s1399_s1 + $0x28] sm:$0xff]  }
   0x4   :  { %v1069_v3 = vld [vmem:[%s1399_s1 + $0xb8] sm:$0xff]   ;;  %955 = vmatpush3.bf16.msra.mxu0 %v1068_v2  ;;  %v1073_v7 = vld [vmem:[%s1399_s1 + $0xb0] sm:$0xff]   ;;  %v1077_v11 = vld [vmem:[%s1399_s1 + $0xa8] sm:$0xff]  }
   0x5   :  { %983 = vmatpush3.bf16.msra.mxu1 %v1069_v3  ;;  %956 = vmatprep.subr.bf16.mxu0 %v1070_v4  ;;  %v1078_v12 = vld [vmem:[%s1399_s1 + $0x60] sm:$0xff]   ;;  %v1082_v16 = vld [vmem:[%s1399_s1 + $0x58] sm:$0xff]   ;;  %v1086_v20 = vld [vmem:[%s1399_s1 + $0x50] sm:$0xff]  }
   0x6   :  { %984 = vmatprep.subr.bf16.mxu1 %v1071_v5  ;;  %v1079_v13 = vld [vmem:[%s1399_s1 + $0xe0] sm:$0xff]   ;;  %v1083_v17 = vld [vmem:[%s1399_s1 + $0xd8] sm:$0xff]   ;;  %v1087_v21 = vld [vmem:[%s1399_s1 + $0xd0] sm:$0xff]  }
   0x7   :  { %v1080_v14 = vld [vmem:[%s1399_s1 + $0x20] sm:$0xff]   ;;  %v1084_v18 = vld [vmem:[%s1399_s1 + $0x18] sm:$0xff]   ;;  %v1088_v22 = vld [vmem:[%s1399_s1 + $0x10] sm:$0xff]  }
   0x8   :  { %957 = vmatpush3.bf16.msra.mxu0 %v1072_v6  ;;  %v1081_v15 = vld [vmem:[%s1399_s1 + $0xa0] sm:$0xff]   ;;  %v1085_v19 = vld [vmem:[%s1399_s1 + $0x98] sm:$0xff]   ;;  %v1089_v23 = vld [vmem:[%s1399_s1 + $0x90] sm:$0xff]  }
   0x9   :  { %985 = vmatpush3.bf16.msra.mxu1 %v1073_v7  ;;  %958 = vmatprep.subr.bf16.mxu0 %v1074_v8  ;;  %v1090_v24 = vld [vmem:[%s1399_s1 + $0x48] sm:$0xff]   ;;  %v1094_v28 = vld [vmem:[%s1399_s1 + $0x40] sm:$0xff]   ;;  %v1098_v40 = vld [vmem:[%s1399_s1 + $0x178] sm:$0xff]  }
   0xa   :  { %986 = vmatprep.subr.bf16.mxu1 %v1075_v9  ;;  %v1091_v25 = vld [vmem:[%s1399_s1 + $0xc8] sm:$0xff]   ;;  %v1095_v29 = vld [vmem:[%s1399_s1 + $0xc0] sm:$0xff]   ;;  %v1099_v41 = vld [vmem:[%s1399_s1 + $0x1f8] sm:$0xff]  }
   0xb   :  { %v1092_v26 = vld [vmem:[%s1399_s1 + $0x8] sm:$0xff]   ;;  %v1096_v30 = vld [vmem:[%s1399_s1] sm:$0xff]   ;;  %v1100_v42 = vld [vmem:[%s1399_s1 + $0x138] sm:$0xff]  }
   0xc   :  { %959 = vmatpush3.bf16.msra.mxu0 %v1076_v10  ;;  %v1093_v27 = vld [vmem:[%s1399_s1 + $0x88] sm:$0xff]   ;;  %v1097_v31 = vld [vmem:[%s1399_s1 + $0x80] sm:$0xff]   ;;  %v1101_v43 = vld [vmem:[%s1399_s1 + $0x1b8] sm:$0xff]  }
   0xd   :  { %987 = vmatpush3.bf16.msra.mxu1 %v1077_v11  ;;  %960 = vmatprep.subr.bf16.mxu0 %v1078_v12  ;;  %v15_v32 = vld [vmem:[%s1400_s0] sm:$0xff]  ;;  %v16_v34 = vld [vmem:[%s1400_s0 + $0x8] sm:$0xff]  ;;  %v1102_v44 = vld [vmem:[%s1399_s1 + $0x170] sm:$0xff]  }
   0xe   :  { %988 = vmatprep.subr.bf16.mxu1 %v1079_v13  ;;  %v19_v33 = vld [vmem:[%s1400_s0 + $0x20] sm:$0xff]  ;;  %v20_v37 = vld [vmem:[%s1400_s0 + $0x28] sm:$0xff]  ;;  %v1103_v45 = vld [vmem:[%s1399_s1 + $0x1f0] sm:$0xff]  }
   0xf   :  { %v855_v35 = vcombine.low %v15_v32, %v19_v33  ;;  %v856_v36 = vcombine.high %v15_v32, %v19_v33  ;;  %v857_v38 = vcombine.low %v16_v34, %v20_v37  ;;  %v858_v39 = vcombine.high %v16_v34, %v20_v37  ;;  %v1104_v46 = vld [vmem:[%s1399_s1 + $0x130] sm:$0xff]   ;;  %v1106_v48 = vld [vmem:[%s1399_s1 + $0x168] sm:$0xff]   ;;  %v1110_v52 = vld [vmem:[%s1399_s1 + $0x160] sm:$0xff]  }
  0x10   :  { %961 = vmatpush3.bf16.msra.mxu0 %v1080_v14  ;;  %v1105_v47 = vld [vmem:[%s1399_s1 + $0x1b0] sm:$0xff]   ;;  %v1107_v49 = vld [vmem:[%s1399_s1 + $0x1e8] sm:$0xff]   ;;  %v1111_v53 = vld [vmem:[%s1399_s1 + $0x1e0] sm:$0xff]  }
  0x11   :  { %989 = vmatpush3.bf16.msra.mxu1 %v1081_v15  ;;  %962 = vmatprep.subr.bf16.mxu0 %v1082_v16  ;;  %v1108_v50 = vld [vmem:[%s1399_s1 + $0x128] sm:$0xff]   ;;  %v1112_v54 = vld [vmem:[%s1399_s1 + $0x120] sm:$0xff]   ;;  %v1114_v56 = vld [vmem:[%s1399_s1 + $0x158] sm:$0xff]  }
  0x12   :  { %990 = vmatprep.subr.bf16.mxu1 %v1083_v17  ;;  %662 = vmatprep.mubr.bf16.mxu0 %v856_v36  ;;  %v1109_v51 = vld [vmem:[%s1399_s1 + $0x1a8] sm:$0xff]   ;;  %v1113_v55 = vld [vmem:[%s1399_s1 + $0x1a0] sm:$0xff]   ;;  %v1115_v57 = vld [vmem:[%s1399_s1 + $0x1d8] sm:$0xff]  }
  0x13   :  { %711 = vmatprep.mubr.bf16.mxu1 %v858_v39  ;;  %v23_v58 = vld [vmem:[%s1400_s0 + $0x40] sm:$0xff]  ;;  %v1116_v61 = vld [vmem:[%s1399_s1 + $0x118] sm:$0xff]   ;;  %v24_v0 = vld [vmem:[%s1400_s0 + $0x48] sm:$0xff] }
  0x14   :  { %963 = vmatpush3.bf16.msra.mxu0 %v1084_v18  ;;  %v27_v59 = vld [vmem:[%s1400_s0 + $0x60] sm:$0xff]  ;;  %v1117_v63 = vld [vmem:[%s1399_s1 + $0x198] sm:$0xff]   ;;  %v28_v1 = vld [vmem:[%s1400_s0 + $0x68] sm:$0xff] }
  0x15   :  { %991 = vmatpush3.bf16.msra.mxu1 %v1085_v19  ;;  %964 = vmatprep.subr.bf16.mxu0 %v1086_v20  ;;  %v864_v60 = vcombine.high %v23_v58, %v27_v59  ;;  %v863_v62 = vcombine.low %v23_v58, %v27_v59  ;;  %v866_v2 = vcombine.high %v24_v0, %v28_v1  ;;  %v1118_v4 = vld [vmem:[%s1399_s1 + $0x150] sm:$0xff]   ;;  %v1122_v8 = vld [vmem:[%s1399_s1 + $0x148] sm:$0xff]   ;;  %v1126_v12 = vld [vmem:[%s1399_s1 + $0x140] sm:$0xff]  }
  0x16   :  { %992 = vmatprep.subr.bf16.mxu1 %v1087_v21  ;;  %v865_v3 = vcombine.low %v24_v0, %v28_v1  ;;  %v1119_v5 = vld [vmem:[%s1399_s1 + $0x1d0] sm:$0xff]   ;;  %v1123_v9 = vld [vmem:[%s1399_s1 + $0x1c8] sm:$0xff]   ;;  %v1127_v13 = vld [vmem:[%s1399_s1 + $0x1c0] sm:$0xff]  }
  0x17   :  { %v1120_v6 = vld [vmem:[%s1399_s1 + $0x110] sm:$0xff]   ;;  %v1124_v10 = vld [vmem:[%s1399_s1 + $0x108] sm:$0xff]   ;;  %v1128_v14 = vld [vmem:[%s1399_s1 + $0x100] sm:$0xff]  }
  0x18   :  { %965 = vmatpush3.bf16.msra.mxu0 %v1088_v22  ;;  %v1121_v7 = vld [vmem:[%s1399_s1 + $0x190] sm:$0xff]   ;;  %v1125_v11 = vld [vmem:[%s1399_s1 + $0x188] sm:$0xff]   ;;  %v1129_v15 = vld [vmem:[%s1399_s1 + $0x180] sm:$0xff]  }
  0x19   :  { %993 = vmatpush3.bf16.msra.mxu1 %v1089_v23  ;;  %966 = vmatprep.subr.bf16.mxu0 %v1090_v24  ;;  %v17_v16 = vld [vmem:[%s1400_s0 + $0x10] sm:$0xff]  ;;  %v18_v18 = vld [vmem:[%s1400_s0 + $0x18] sm:$0xff] }
  0x1a   :  { %994 = vmatprep.subr.bf16.mxu1 %v1091_v25  ;;  %v21_v17 = vld [vmem:[%s1400_s0 + $0x30] sm:$0xff]  ;;  %v22_v19 = vld [vmem:[%s1400_s0 + $0x38] sm:$0xff] }
  0x1b   :  { %v859_v20 = vcombine.low %v17_v16, %v21_v17  ;;  %v860_v21 = vcombine.high %v17_v16, %v21_v17  ;;  %v861_v22 = vcombine.low %v18_v18, %v22_v19  ;;  %v862_v23 = vcombine.high %v18_v18, %v22_v19  ;;  %v25_v24 = vld [vmem:[%s1400_s0 + $0x50] sm:$0xff] }
  0x1c   :  { %967 = vmatpush3.bf16.msra.mxu0 %v1092_v26  ;;  %v29_v25 = vld [vmem:[%s1400_s0 + $0x70] sm:$0xff]  ;;  %v26_v26 = vld [vmem:[%s1400_s0 + $0x58] sm:$0xff] }
  0x1d   :  { %995 = vmatpush3.bf16.msra.mxu1 %v1093_v27  ;;  %968 = vmatprep.subr.bf16.mxu0 %v1094_v28  ;;  %v868_v27 = vcombine.high %v25_v24, %v29_v25  ;;  %v30_v28 = vld [vmem:[%s1400_s0 + $0x78] sm:$0xff] }
  0x1e   :  { %996 = vmatprep.subr.bf16.mxu1 %v1095_v29  ;;  %v870_v29 = vcombine.high %v26_v26, %v30_v28 }
  0x20   :  { %969 = vmatpush3.bf16.msra.mxu0 %v1096_v30  ;;  %v867_v30 = vcombine.low %v25_v24, %v29_v25 }
  0x21   :  { %997 = vmatpush3.bf16.msra.mxu1 %v1097_v31  ;;  %1010 = vmatprep.subr.bf16.mxu0 %v1098_v40  ;;  %v869_v31 = vcombine.low %v26_v26, %v30_v28 }
  0x22   :  { %1038 = vmatprep.subr.bf16.mxu1 %v1099_v41 }
  0x23   :  { %663 = vmatmul.mubr.bf16.vlgmr.msra.gmra.mxu0 %v855_v35 }
  0x24   :  { %712 = vmatmul.mubr.bf16.vlgmr.msra.gmra.mxu1 %v857_v38  ;;  %1011 = vmatpush3.bf16.msra.mxu0 %v1100_v42 }
  0x25   :  { %1039 = vmatpush3.bf16.msra.mxu1 %v1101_v43  ;;  %1012 = vmatprep.subr.bf16.mxu0 %v1102_v44 }
  0x26   :  { %1040 = vmatprep.subr.bf16.mxu1 %v1103_v45  ;;  %670 = vmatprep.mubr.bf16.mxu0 %v864_v60 }
  0x27   :  { %719 = vmatprep.mubr.bf16.mxu1 %v866_v2 }
  0x28   :  { %1013 = vmatpush3.bf16.msra.mxu0 %v1104_v46 }
  0x29   :  { %1041 = vmatpush3.bf16.msra.mxu1 %v1105_v47  ;;  %1014 = vmatprep.subr.bf16.mxu0 %v1106_v48  ;;  %v854_v47 = vld [vmem:[%s1401_s2] ss:$0 sm:$0xff] }
  0x2a   :  { %1042 = vmatprep.subr.bf16.mxu1 %v1107_v49 }
  0x2b   :  { %671 = vmatmul.mubr.bf16.gmra.mxu0 %v863_v62 }
  0x2c   :  { %1015 = vmatpush3.bf16.msra.mxu0 %v1108_v50  ;;  %720 = vmatmul.mubr.bf16.gmra.mxu1 %v865_v3 }
  0x2d   :  { %1043 = vmatpush3.bf16.msra.mxu1 %v1109_v51  ;;  %1016 = vmatprep.subr.bf16.mxu0 %v1110_v52 }
  0x2e   :  { %1044 = vmatprep.subr.bf16.mxu1 %v1111_v53  ;;  %760 = vmatprep.mubr.bf16.mxu0 %v860_v21 }
  0x2f   :  { %809 = vmatprep.mubr.bf16.mxu1 %v862_v23 }
  0x30   :  { %1017 = vmatpush3.bf16.msra.mxu0 %v1112_v54 }
  0x31   :  { %1045 = vmatpush3.bf16.msra.mxu1 %v1113_v55  ;;  %1018 = vmatprep.subr.bf16.mxu0 %v1114_v56 }
  0x32   :  { %1046 = vmatprep.subr.bf16.mxu1 %v1115_v57 }
  0x34   :  { %1019 = vmatpush3.bf16.msra.mxu0 %v1116_v61 }
  0x35   :  { %1047 = vmatpush3.bf16.msra.mxu1 %v1117_v63  ;;  %1020 = vmatprep.subr.bf16.mxu0 %v1118_v4 }
  0x36   :  { %1048 = vmatprep.subr.bf16.mxu1 %v1119_v5 }
  0x38   :  { %1021 = vmatpush3.bf16.msra.mxu0 %v1120_v6 }
  0x39   :  { %1049 = vmatpush3.bf16.msra.mxu1 %v1121_v7  ;;  %1022 = vmatprep.subr.bf16.mxu0 %v1122_v8 }
  0x3a   :  { %1050 = vmatprep.subr.bf16.mxu1 %v1123_v9 }
  0x3c   :  { %1023 = vmatpush3.bf16.msra.mxu0 %v1124_v10 }
  0x3d   :  { %1051 = vmatpush3.bf16.msra.mxu1 %v1125_v11  ;;  %1024 = vmatprep.subr.bf16.mxu0 %v1126_v12 }
  0x3e   :  { %1052 = vmatprep.subr.bf16.mxu1 %v1127_v13 }
  0x40   :  { %1025 = vmatpush3.bf16.msra.mxu0 %v1128_v14 }
  0x41   :  { %1053 = vmatpush3.bf16.msra.mxu1 %v1129_v15 }
  0x43   :  { %761 = vmatmul.mubr.bf16.vlgmr.msra.gmra.mxu0 %v859_v20 }
  0x44   :  { %810 = vmatmul.mubr.bf16.vlgmr.msra.gmra.mxu1 %v861_v22  ;;  %768 = vmatprep.mubr.bf16.mxu0 %v868_v27 }
  0x45   :  { %817 = vmatprep.mubr.bf16.mxu1 %v870_v29 }
  0x4b   :  { %769 = vmatmul.mubr.bf16.gmra.mxu0 %v867_v30 }
  0x4c   :  { %818 = vmatmul.mubr.bf16.gmra.mxu1 %v869_v31 }
  0xe3   :  { %v970_v32 = vpop.f32.mrf.mxu0 }
  0xe4   :  { %v998_v33 = vpop.f32.mrf.mxu1 }
  0xe5   :  { %v971_v34 = vpop.f32.mrf.mxu0 }
  0xe6   :  { %v999_v35 = vpop.f32.mrf.mxu1  ;;  %v972_v46 = vadd.f32 %v971_v34, %v970_v32 }
  0xe7   :  { %v973_v36 = vpop.f32.mrf.mxu0  ;;  %v1000_v51 = vadd.f32 %v999_v35, %v998_v33 }
  0xe8   :  { %v1001_v37 = vpop.f32.mrf.mxu1  ;;  %v665_v50 = vadd.f32 %v972_v46, %v854_v47 }
  0xe9   :  { %v974_v38 = vpop.f32.mrf.mxu0 }
  0xea   :  { %v1002_v39 = vpop.f32.mrf.mxu1  ;;  %v975_v52 = vadd.f32 %v974_v38, %v973_v36  ;;  %v714_v58 = vadd.f32 %v1000_v51, %v665_v50 }
  0xeb   :  { %v976_v40 = vpop.f32.mrf.mxu0  ;;  %v1003_v63 = vadd.f32 %v1002_v39, %v1001_v37 }
  0xec   :  { %v1004_v41 = vpop.f32.mrf.mxu1  ;;  %v668_v59 = vadd.f32 %v975_v52, %v854_v47 }
  0xed   :  { %v977_v42 = vpop.f32.mrf.mxu0 }
  0xee   :  { %v1005_v43 = vpop.f32.mrf.mxu1  ;;  %v978_v55 = vadd.f32 %v977_v42, %v976_v40  ;;  %v717_v5 = vadd.f32 %v1003_v63, %v668_v59 }
  0xef   :  { %v979_v44 = vpop.f32.mrf.mxu0  ;;  %v1006_v2 = vadd.f32 %v1005_v43, %v1004_v41 }
  0xf0   :  { %v1007_v45 = vpop.f32.mrf.mxu1  ;;  %v673_v1 = vadd.f32 %v978_v55, %v854_v47 }
  0xf1   :  { %v980_v48 = vpop.f32.mrf.mxu0 }
  0xf2   :  { %v1008_v49 = vpop.f32.mrf.mxu1  ;;  %v981_v6 = vadd.f32 %v980_v48, %v979_v44  ;;  %v722_v14 = vadd.f32 %v1006_v2, %v673_v1 }
  0xf3   :  { %v1009_v18 = vadd.f32 %v1008_v49, %v1007_v45 }
  0xf4   :  { %v676_v17 = vadd.f32 %v981_v6, %v854_v47 }
  0xf6   :  { %v725_v28 = vadd.f32 %v1009_v18, %v676_v17 }
 0x103   :  { %v1026_v53 = vpop.f32.mrf.mxu0 }
 0x104   :  { %v1054_v54 = vpop.f32.mrf.mxu1 }
 0x105   :  { %v1027_v56 = vpop.f32.mrf.mxu0 }
 0x106   :  { %v1055_v57 = vpop.f32.mrf.mxu1  ;;  %v1028_v60 = vadd.f32 %v1027_v56, %v1026_v53 }
 0x107   :  { %v1029_v61 = vpop.f32.mrf.mxu0  ;;  %v1056_v7 = vadd.f32 %v1055_v57, %v1054_v54 }
 0x108   :  { %v1057_v62 = vpop.f32.mrf.mxu1  ;;  %v763_v0 = vadd.f32 %v1028_v60, %v714_v58 }
 0x109   :  { %v1030_v3 = vpop.f32.mrf.mxu0 }
 0x10a   :  { %v1058_v4 = vpop.f32.mrf.mxu1  ;;  %v1031_v8 = vadd.f32 %v1030_v3, %v1029_v61  ;;  %v812_v11 = vadd.f32 %v1056_v7, %v763_v0 }
 0x10b   :  { %v1032_v9 = vpop.f32.mrf.mxu0  ;;  %v1059_v13 = vadd.f32 %v1058_v4, %v1057_v62 }
 0x10c   :  { %v1060_v10 = vpop.f32.mrf.mxu1  ;;  %v766_v12 = vadd.f32 %v1031_v8, %v717_v5  ;;  %v826_v23 = vmax.f32 %v812_v11, 0.0 }
 0x10d   :  { %v1033_v15 = vpop.f32.mrf.mxu0 }
 0x10e   :  { %v1061_v16 = vpop.f32.mrf.mxu1  ;;  %v815_v19 = vadd.f32 %v1059_v13, %v766_v12  ;;  %v1034_v20 = vadd.f32 %v1033_v15, %v1032_v9 }
 0x10f   :  { %v1035_v21 = vpop.f32.mrf.mxu0  ;;  %v1062_v30 = vadd.f32 %v1061_v16, %v1060_v10 }
 0x110   :  { %v1063_v22 = vpop.f32.mrf.mxu1  ;;  %v827_v24 = vmax.f32 %v815_v19, 0.0  ;;  %v771_v25 = vadd.f32 %v1034_v20, %v722_v14 }
 0x111   :  { %v1036_v26 = vpop.f32.mrf.mxu0 }
 0x112   :  { %v1064_v27 = vpop.f32.mrf.mxu1  ;;  %v946_v29 = vpack.c.bf16 %v827_v24, %v826_v23  ;;  %v1037_v31 = vadd.f32 %v1036_v26, %v1035_v21  ;;  %v820_v32 = vadd.f32 %v1062_v30, %v771_v25 }
 0x113   :  { %v1065_v34 = vadd.f32 %v1064_v27, %v1063_v22 }
 0x114   :  { %947 = vst [vmem:[%s1402_s3] sm:$0xff] %v946_v29   ;;  %v774_v33 = vadd.f32 %v1037_v31, %v725_v28  ;;  %v828_v36 = vmax.f32 %v820_v32, 0.0 }
 0x116   :  { %v823_v35 = vadd.f32 %v1065_v34, %v774_v33 }
 0x118   :  { %v829_v37 = vmax.f32 %v823_v35, 0.0 }
 0x11a   :  { %v951_v38 = vpack.c.bf16 %v829_v37, %v828_v36 }
 0x11c   :  { %953 = vst [vmem:[%s1402_s3 + $0x8] sm:$0xff] %v951_v38  }

// kernel: s_vqvae_forward.13
= control target key start
LH: loop header
LB: loop body
LE: loop exit
PB: predicated region body
PF: predicated region fallthrough
CT: control target
= control target key end

     0   :  { %s1628_s1 = inlined_call_operand.vmem [shape: bf16[1152,128], index: 1, kind: input, shape index: {}]   ;;  %s1629_s0 = inlined_call_operand.vmem [shape: bf16[32,1152], index: 0, kind: input, shape index: {}]   ;;  %s1630_s2 = inlined_call_operand.vmem [shape: f32[1,128], index: 2, kind: input, shape index: {}]   ;;  %s1631_s3 = inlined_call_operand.vmem [shape: bf16[32,128], index: 3, kind: output, shape index: {}]  }
   0x1   :  { %v1231_v0 = vld [vmem:[%s1628_s1 + $0x78] sm:$0xff]   ;;  %v1235_v4 = vld [vmem:[%s1628_s1 + $0x70] sm:$0xff]   ;;  %v1239_v8 = vld [vmem:[%s1628_s1 + $0x68] sm:$0xff]  }
   0x2   :  { %v1232_v1 = vld [vmem:[%s1628_s1 + $0x38] sm:$0xff]   ;;  %1089 = vmatprep.subr.bf16.mxu0 %v1231_v0  ;;  %v1236_v5 = vld [vmem:[%s1628_s1 + $0x30] sm:$0xff]   ;;  %v1240_v9 = vld [vmem:[%s1628_s1 + $0x28] sm:$0xff]  }
   0x3   :  { %v1233_v2 = vld [vmem:[%s1628_s1 + $0xf8] sm:$0xff]   ;;  %1090 = vmatpush3.bf16.msra.mxu0 %v1232_v1  ;;  %v1237_v6 = vld [vmem:[%s1628_s1 + $0xf0] sm:$0xff]   ;;  %v1241_v10 = vld [vmem:[%s1628_s1 + $0xe8] sm:$0xff]  }
   0x4   :  { %v1234_v3 = vld [vmem:[%s1628_s1 + $0xb8] sm:$0xff]   ;;  %1117 = vmatprep.subr.bf16.mxu1 %v1233_v2  ;;  %1091 = vmatprep.subr.bf16.mxu0 %v1235_v4  ;;  %v1238_v7 = vld [vmem:[%s1628_s1 + $0xb0] sm:$0xff]   ;;  %v1242_v11 = vld [vmem:[%s1628_s1 + $0xa8] sm:$0xff]  }
   0x5   :  { %1118 = vmatpush3.bf16.msra.mxu1 %v1234_v3  ;;  %v1243_v12 = vld [vmem:[%s1628_s1 + $0x60] sm:$0xff]   ;;  %v1247_v16 = vld [vmem:[%s1628_s1 + $0x58] sm:$0xff]   ;;  %v1251_v20 = vld [vmem:[%s1628_s1 + $0x50] sm:$0xff]  }
   0x6   :  { %1119 = vmatprep.subr.bf16.mxu1 %v1237_v6  ;;  %v1244_v13 = vld [vmem:[%s1628_s1 + $0x20] sm:$0xff]   ;;  %v1248_v17 = vld [vmem:[%s1628_s1 + $0x18] sm:$0xff]   ;;  %v1252_v21 = vld [vmem:[%s1628_s1 + $0x10] sm:$0xff]  }
   0x7   :  { %1092 = vmatpush3.bf16.msra.mxu0 %v1236_v5  ;;  %v1245_v14 = vld [vmem:[%s1628_s1 + $0xe0] sm:$0xff]   ;;  %v1249_v18 = vld [vmem:[%s1628_s1 + $0xd8] sm:$0xff]   ;;  %v1253_v22 = vld [vmem:[%s1628_s1 + $0xd0] sm:$0xff]  }
   0x8   :  { %1093 = vmatprep.subr.bf16.mxu0 %v1239_v8  ;;  %v1246_v15 = vld [vmem:[%s1628_s1 + $0xa0] sm:$0xff]   ;;  %v1250_v19 = vld [vmem:[%s1628_s1 + $0x98] sm:$0xff]   ;;  %v1254_v23 = vld [vmem:[%s1628_s1 + $0x90] sm:$0xff]  }
   0x9   :  { %1120 = vmatpush3.bf16.msra.mxu1 %v1238_v7  ;;  %v1255_v24 = vld [vmem:[%s1628_s1 + $0x48] sm:$0xff]   ;;  %v1259_v28 = vld [vmem:[%s1628_s1 + $0x40] sm:$0xff]   ;;  %v1266_v34 = vld [vmem:[%s1628_s1 + $0x178] sm:$0xff]  }
   0xa   :  { %1121 = vmatprep.subr.bf16.mxu1 %v1241_v10  ;;  %v1256_v25 = vld [vmem:[%s1628_s1 + $0x8] sm:$0xff]   ;;  %v1260_v29 = vld [vmem:[%s1628_s1] sm:$0xff]   ;;  %v1270_v37 = vld [vmem:[%s1628_s1 + $0x138] sm:$0xff]  }
   0xb   :  { %1094 = vmatpush3.bf16.msra.mxu0 %v1240_v9  ;;  %v1257_v26 = vld [vmem:[%s1628_s1 + $0xc8] sm:$0xff]   ;;  %v1261_v30 = vld [vmem:[%s1628_s1 + $0xc0] sm:$0xff]   ;;  %v1271_v38 = vld [vmem:[%s1628_s1 + $0x1f8] sm:$0xff]  }
   0xc   :  { %1095 = vmatprep.subr.bf16.mxu0 %v1243_v12  ;;  %v1258_v27 = vld [vmem:[%s1628_s1 + $0x88] sm:$0xff]   ;;  %v1262_v31 = vld [vmem:[%s1629_s0] ss:$36 sps:$4 sm:$0xff]   ;;  %v1272_v39 = vld [vmem:[%s1628_s1 + $0x1b8] sm:$0xff]  }
   0xd   :  { %1122 = vmatpush3.bf16.msra.mxu1 %v1242_v11  ;;  %v1264_v32 = vld [vmem:[%s1629_s0 + $0x4] ss:$36 sps:$4 sm:$0xff]   ;;  %v1269_v36 = vld [vmem:[%s1629_s0 + $0xc] ss:$36 sps:$4 sm:$0xff]   ;;  %v1285_v52 = vld [vmem:[%s1628_s1 + $0x158] sm:$0xff]  }
   0xe   :  { %1123 = vmatprep.subr.bf16.mxu1 %v1245_v14  ;;  %v1265_v33 = vld [vmem:[%s1628_s1 + $0x80] sm:$0xff]   ;;  %742 = vmatprep.mubr.bf16.mxu0 %v1264_v32  ;;  %v1267_v35 = vld [vmem:[%s1629_s0 + $0x8] ss:$36 sps:$4 sm:$0xff]   ;;  %v1273_v40 = vld [vmem:[%s1628_s1 + $0x170] sm:$0xff]  }
   0xf   :  { %1096 = vmatpush3.bf16.msra.mxu0 %v1244_v13  ;;  %791 = vmatprep.mubr.bf16.mxu1 %v1269_v36  ;;  %v1274_v41 = vld [vmem:[%s1628_s1 + $0x130] sm:$0xff]   ;;  %v1277_v44 = vld [vmem:[%s1628_s1 + $0x168] sm:$0xff]   ;;  %v1281_v48 = vld [vmem:[%s1628_s1 + $0x160] sm:$0xff]  }
  0x10   :  { %1097 = vmatprep.subr.bf16.mxu0 %v1247_v16  ;;  %v1275_v42 = vld [vmem:[%s1628_s1 + $0x1f0] sm:$0xff]   ;;  %v1278_v45 = vld [vmem:[%s1628_s1 + $0x128] sm:$0xff]   ;;  %v1282_v49 = vld [vmem:[%s1628_s1 + $0x120] sm:$0xff]  }
  0x11   :  { %1124 = vmatpush3.bf16.msra.mxu1 %v1246_v15  ;;  %v1276_v43 = vld [vmem:[%s1628_s1 + $0x1b0] sm:$0xff]   ;;  %v1279_v46 = vld [vmem:[%s1628_s1 + $0x1e8] sm:$0xff]   ;;  %v1283_v50 = vld [vmem:[%s1628_s1 + $0x1e0] sm:$0xff]  }
  0x12   :  { %1125 = vmatprep.subr.bf16.mxu1 %v1249_v18  ;;  %v1280_v47 = vld [vmem:[%s1628_s1 + $0x1a8] sm:$0xff]   ;;  %v1284_v51 = vld [vmem:[%s1628_s1 + $0x1a0] sm:$0xff]   ;;  %v1286_v53 = vld [vmem:[%s1628_s1 + $0x118] sm:$0xff]  }
  0x13   :  { %1098 = vmatpush3.bf16.msra.mxu0 %v1248_v17  ;;  %v1287_v54 = vld [vmem:[%s1629_s0 + $0x4c] ss:$36 sps:$4 sm:$0xff]   ;;  %v1289_v55 = vld [vmem:[%s1628_s1 + $0x1d8] sm:$0xff]   ;;  %v1303_v4 = vld [vmem:[%s1628_s1 + $0x140] sm:$0xff]  }
  0x14   :  { %1099 = vmatprep.subr.bf16.mxu0 %v1251_v20  ;;  %v1290_v56 = vld [vmem:[%s1629_s0 + $0x48] ss:$36 sps:$4 sm:$0xff]   ;;  %v1291_v57 = vld [vmem:[%s1628_s1 + $0x198] sm:$0xff]   ;;  %v1294_v59 = vld [vmem:[%s1628_s1 + $0x150] sm:$0xff]  }
  0x15   :  { %1126 = vmatpush3.bf16.msra.mxu1 %v1250_v19  ;;  %v1292_v58 = vld [vmem:[%s1629_s0 + $0x54] ss:$36 sps:$4 sm:$0xff]   ;;  %v1299_v0 = vld [vmem:[%s1628_s1 + $0x148] sm:$0xff]   ;;  %v1304_v5 = vld [vmem:[%s1628_s1 + $0x100] sm:$0xff]  }
  0x16   :  { %1127 = vmatprep.subr.bf16.mxu1 %v1253_v22  ;;  %v1295_v60 = vld [vmem:[%s1629_s0 + $0x50] ss:$36 sps:$4 sm:$0xff]   ;;  %v1300_v1 = vld [vmem:[%s1628_s1 + $0x108] sm:$0xff]   ;;  %v1305_v6 = vld [vmem:[%s1628_s1 + $0x1c0] sm:$0xff]  }
  0x17   :  { %1100 = vmatpush3.bf16.msra.mxu0 %v1252_v21  ;;  %v1296_v61 = vld [vmem:[%s1628_s1 + $0x110] sm:$0xff]   ;;  %v1301_v2 = vld [vmem:[%s1628_s1 + $0x1c8] sm:$0xff]   ;;  %v1309_v9 = vld [vmem:[%s1628_s1 + $0x180] sm:$0xff]  }
  0x18   :  { %1101 = vmatprep.subr.bf16.mxu0 %v1255_v24  ;;  %v1297_v62 = vld [vmem:[%s1628_s1 + $0x1d0] sm:$0xff]   ;;  %v1302_v3 = vld [vmem:[%s1628_s1 + $0x188] sm:$0xff]   ;;  %v1310_v10 = vld [vmem:[%s1628_s1 + $0x238] sm:$0xff]  }
  0x19   :  { %1128 = vmatpush3.bf16.msra.mxu1 %v1254_v23  ;;  %v1298_v63 = vld [vmem:[%s1628_s1 + $0x190] sm:$0xff]   ;;  %v1311_v11 = vld [vmem:[%s1629_s0 + $0x18] ss:$36 sps:$4 sm:$0xff]   ;;  %v1318_v16 = vld [vmem:[%s1628_s1 + $0x228] sm:$0xff]  }
  0x1a   :  { %1129 = vmatprep.subr.bf16.mxu1 %v1257_v26  ;;  %v1306_v7 = vld [vmem:[%s1629_s0 + $0x10] ss:$36 sps:$4 sm:$0xff]   ;;  %v1313_v12 = vld [vmem:[%s1629_s0 + $0x1c] ss:$36 sps:$4 sm:$0xff]   ;;  %v1319_v17 = vld [vmem:[%s1629_s0 + $0x64] ss:$36 sps:$4 sm:$0xff]  }
  0x1b   :  { %1102 = vmatpush3.bf16.msra.mxu0 %v1256_v25  ;;  %v1308_v8 = vld [vmem:[%s1629_s0 + $0x14] ss:$36 sps:$4 sm:$0xff]   ;;  %v1315_v14 = vld [vmem:[%s1629_s0 + $0x5c] ss:$36 sps:$4 sm:$0xff]   ;;  %v1325_v23 = vld [vmem:[%s1628_s1 + $0x208] sm:$0xff]  }
  0x1c   :  { %1103 = vmatprep.subr.bf16.mxu0 %v1259_v28  ;;  %v1314_v13 = vld [vmem:[%s1628_s1 + $0x230] sm:$0xff]   ;;  %v1317_v15 = vld [vmem:[%s1629_s0 + $0x58] ss:$36 sps:$4 sm:$0xff]   ;;  %v1321_v18 = vld [vmem:[%s1629_s0 + $0x60] ss:$36 sps:$4 sm:$0xff]  }
  0x1d   :  { %1130 = vmatpush3.bf16.msra.mxu1 %v1258_v27  ;;  %v1322_v19 = vld [vmem:[%s1628_s1 + $0x220] sm:$0xff]   ;;  %v1323_v20 = vld [vmem:[%s1628_s1 + $0x218] sm:$0xff]   ;;  %v1324_v22 = vld [vmem:[%s1628_s1 + $0x210] sm:$0xff]  }
  0x1e   :  { %1131 = vmatprep.subr.bf16.mxu1 %v1261_v30  ;;  %v1327_v21 = vld [vmem:[%s1629_s0 + $0x20] ss:$36 sps:$4 sm:$0xff]   ;;  %v1328_v25 = vld [vmem:[%s1629_s0 + $0x68] ss:$36 sps:$4 sm:$0xff]  }
  0x1f   :  { %1104 = vmatpush3.bf16.msra.mxu0 %v1260_v29  ;;  %v1326_v24 = vld [vmem:[%s1628_s1 + $0x200] sm:$0xff]  }
  0x20   :  { %1145 = vmatprep.subr.bf16.mxu0 %v1266_v34 }
  0x21   :  { %1132 = vmatpush3.bf16.msra.mxu1 %v1265_v33 }
  0x22   :  { %743 = vmatmul.mubr.bf16.vlgmr.msra.gmra.mxu0 %v1262_v31  ;;  %1173 = vmatprep.subr.bf16.mxu1 %v1271_v38 }
  0x23   :  { %1146 = vmatpush3.bf16.msra.mxu0 %v1270_v37  ;;  %750 = vmatprep.mubr.bf16.mxu0 %v1287_v54 }
  0x24   :  { %792 = vmatmul.mubr.bf16.vlgmr.msra.gmra.mxu1 %v1267_v35  ;;  %1147 = vmatprep.subr.bf16.mxu0 %v1273_v40 }
  0x25   :  { %1174 = vmatpush3.bf16.msra.mxu1 %v1272_v39  ;;  %799 = vmatprep.mubr.bf16.mxu1 %v1292_v58 }
  0x26   :  { %1175 = vmatprep.subr.bf16.mxu1 %v1275_v42 }
  0x27   :  { %1148 = vmatpush3.bf16.msra.mxu0 %v1274_v41 }
  0x28   :  { %1149 = vmatprep.subr.bf16.mxu0 %v1277_v44 }
  0x29   :  { %1176 = vmatpush3.bf16.msra.mxu1 %v1276_v43 }
  0x2a   :  { %1177 = vmatprep.subr.bf16.mxu1 %v1279_v46  ;;  %751 = vmatmul.mubr.bf16.gmra.mxu0 %v1290_v56 }
  0x2b   :  { %1150 = vmatpush3.bf16.msra.mxu0 %v1278_v45  ;;  %840 = vmatprep.mubr.bf16.mxu0 %v1308_v8 }
  0x2c   :  { %1151 = vmatprep.subr.bf16.mxu0 %v1281_v48  ;;  %800 = vmatmul.mubr.bf16.gmra.mxu1 %v1295_v60 }
  0x2d   :  { %1178 = vmatpush3.bf16.msra.mxu1 %v1280_v47  ;;  %889 = vmatprep.mubr.bf16.mxu1 %v1313_v12 }
  0x2e   :  { %1179 = vmatprep.subr.bf16.mxu1 %v1283_v50 }
  0x2f   :  { %1152 = vmatpush3.bf16.msra.mxu0 %v1282_v49 }
  0x30   :  { %1153 = vmatprep.subr.bf16.mxu0 %v1285_v52 }
  0x31   :  { %1180 = vmatpush3.bf16.msra.mxu1 %v1284_v51 }
  0x32   :  { %1181 = vmatprep.subr.bf16.mxu1 %v1289_v55 }
  0x33   :  { %1154 = vmatpush3.bf16.msra.mxu0 %v1286_v53 }
  0x34   :  { %1155 = vmatprep.subr.bf16.mxu0 %v1294_v59  ;;  %v979_v59 = vld [vmem:[%s1630_s2] ss:$0 sm:$0xff] }
  0x35   :  { %1182 = vmatpush3.bf16.msra.mxu1 %v1291_v57 }
  0x36   :  { %1183 = vmatprep.subr.bf16.mxu1 %v1297_v62 }
  0x37   :  { %1156 = vmatpush3.bf16.msra.mxu0 %v1296_v61 }
  0x38   :  { %1157 = vmatprep.subr.bf16.mxu0 %v1299_v0 }
  0x39   :  { %1184 = vmatpush3.bf16.msra.mxu1 %v1298_v63 }
  0x3a   :  { %1185 = vmatprep.subr.bf16.mxu1 %v1301_v2 }
  0x3b   :  { %1158 = vmatpush3.bf16.msra.mxu0 %v1300_v1 }
  0x3c   :  { %1159 = vmatprep.subr.bf16.mxu0 %v1303_v4 }
  0x3d   :  { %1186 = vmatpush3.bf16.msra.mxu1 %v1302_v3 }
  0x3e   :  { %1187 = vmatprep.subr.bf16.mxu1 %v1305_v6 }
  0x3f   :  { %1160 = vmatpush3.bf16.msra.mxu0 %v1304_v5 }
  0x40   :  { %1211 = vmatprep.subr.bf16.mxu0 %v1310_v10 }
  0x41   :  { %1188 = vmatpush3.bf16.msra.mxu1 %v1309_v9 }
  0x42   :  { %841 = vmatmul.mubr.bf16.vlgmr.msra.gmra.mxu0 %v1306_v7 }
  0x43   :  { %1212 = vmatpush3.bf16.msra.mxu0 %v1310_v10  ;;  %848 = vmatprep.mubr.bf16.mxu0 %v1315_v14 }
  0x44   :  { %890 = vmatmul.mubr.bf16.vlgmr.msra.gmra.mxu1 %v1311_v11  ;;  %1213 = vmatprep.subr.bf16.mxu0 %v1314_v13 }
  0x45   :  { %897 = vmatprep.mubr.bf16.mxu1 %v1319_v17 }
  0x47   :  { %1214 = vmatpush3.bf16.msra.mxu0 %v1314_v13 }
  0x48   :  { %1215 = vmatprep.subr.bf16.mxu0 %v1318_v16 }
  0x4a   :  { %849 = vmatmul.mubr.bf16.gmra.mxu0 %v1317_v15 }
  0x4b   :  { %1216 = vmatpush3.bf16.msra.mxu0 %v1318_v16  ;;  %1227 = vmatprep.mubr.bf16.mxu0 %v1327_v21 }
  0x4c   :  { %898 = vmatmul.mubr.bf16.gmra.mxu1 %v1321_v18  ;;  %1217 = vmatprep.subr.bf16.mxu0 %v1322_v19 }
  0x4f   :  { %1218 = vmatpush3.bf16.msra.mxu0 %v1322_v19 }
  0x50   :  { %1219 = vmatprep.subr.bf16.mxu0 %v1323_v20 }
  0x53   :  { %1220 = vmatpush3.bf16.msra.mxu0 %v1323_v20 }
  0x54   :  { %1221 = vmatprep.subr.bf16.mxu0 %v1324_v22 }
  0x57   :  { %1222 = vmatpush3.bf16.msra.mxu0 %v1324_v22 }
  0x58   :  { %1223 = vmatprep.subr.bf16.mxu0 %v1325_v23 }
  0x5b   :  { %1224 = vmatpush3.bf16.msra.mxu0 %v1325_v23 }
  0x5c   :  { %1225 = vmatprep.subr.bf16.mxu0 %v1326_v24 }
  0x5f   :  { %1226 = vmatpush3.bf16.msra.mxu0 %v1326_v24 }
  0x62   :  { %1228 = vmatmul.mubr.bf16.vlgmr.msra.gmra.mxu0 %v1328_v25 }
  0xe2   :  { %v1105_v26 = vpop.f32.mrf.mxu0 }
  0xe4   :  { %v1133_v27 = vpop.f32.mrf.mxu1  ;;  %v1106_v28 = vpop.f32.mrf.mxu0 }
  0xe5   :  { %v1107_v57 = vadd.f32 %v1106_v28, %v1105_v26 }
  0xe6   :  { %v1134_v29 = vpop.f32.mrf.mxu1  ;;  %v1108_v30 = vpop.f32.mrf.mxu0 }
  0xe7   :  { %v745_v2 = vadd.f32 %v1107_v57, %v979_v59  ;;  %v1135_v3 = vadd.f32 %v1134_v29, %v1133_v27 }
  0xe8   :  { %v1136_v31 = vpop.f32.mrf.mxu1  ;;  %v1109_v32 = vpop.f32.mrf.mxu0 }
  0xe9   :  { %v1110_v58 = vadd.f32 %v1109_v32, %v1108_v30  ;;  %v794_v13 = vadd.f32 %v1135_v3, %v745_v2 }
  0xea   :  { %v1111_v33 = vpop.f32.mrf.mxu0  ;;  %v1137_v34 = vpop.f32.mrf.mxu1 }
  0xeb   :  { %v748_v4 = vadd.f32 %v1110_v58, %v979_v59  ;;  %v1138_v5 = vadd.f32 %v1137_v34, %v1136_v31 }
  0xec   :  { %v1139_v35 = vpop.f32.mrf.mxu1  ;;  %v1112_v36 = vpop.f32.mrf.mxu0 }
  0xed   :  { %v1113_v55 = vadd.f32 %v1112_v36, %v1111_v33  ;;  %v797_v14 = vadd.f32 %v1138_v5, %v748_v4 }
  0xee   :  { %v1140_v37 = vpop.f32.mrf.mxu1  ;;  %v1114_v38 = vpop.f32.mrf.mxu0 }
  0xef   :  { %v753_v62 = vadd.f32 %v1113_v55, %v979_v59  ;;  %v1141_v63 = vadd.f32 %v1140_v37, %v1139_v35 }
  0xf0   :  { %v1142_v39 = vpop.f32.mrf.mxu1  ;;  %v1115_v40 = vpop.f32.mrf.mxu0 }
  0xf1   :  { %v1116_v56 = vadd.f32 %v1115_v40, %v1114_v38  ;;  %v802_v9 = vadd.f32 %v1141_v63, %v753_v62 }
  0xf2   :  { %v1143_v42 = vpop.f32.mrf.mxu1 }
  0xf3   :  { %v756_v0 = vadd.f32 %v1116_v56, %v979_v59  ;;  %v1144_v1 = vadd.f32 %v1143_v42, %v1142_v39 }
  0xf5   :  { %v805_v10 = vadd.f32 %v1144_v1, %v756_v0 }
 0x102   :  { %v1161_v41 = vpop.f32.mrf.mxu0 }
 0x104   :  { %v1162_v43 = vpop.f32.mrf.mxu0  ;;  %v1189_v44 = vpop.f32.mrf.mxu1 }
 0x105   :  { %v1163_v11 = vadd.f32 %v1162_v43, %v1161_v41 }
 0x106   :  { %v1164_v45 = vpop.f32.mrf.mxu0  ;;  %v1190_v46 = vpop.f32.mrf.mxu1 }
 0x107   :  { %v843_v20 = vadd.f32 %v1163_v11, %v794_v13  ;;  %v1191_v21 = vadd.f32 %v1190_v46, %v1189_v44 }
 0x108   :  { %v1165_v47 = vpop.f32.mrf.mxu0  ;;  %v1192_v48 = vpop.f32.mrf.mxu1 }
 0x109   :  { %v1166_v12 = vadd.f32 %v1165_v47, %v1164_v45  ;;  %v892_v29 = vadd.f32 %v1191_v21, %v843_v20 }
 0x10a   :  { %v1167_v49 = vpop.f32.mrf.mxu0  ;;  %v1193_v50 = vpop.f32.mrf.mxu1 }
 0x10b   :  { %v846_v22 = vadd.f32 %v1166_v12, %v797_v14  ;;  %v1194_v23 = vadd.f32 %v1193_v50, %v1192_v48 }
 0x10c   :  { %v1168_v51 = vpop.f32.mrf.mxu0  ;;  %v1195_v52 = vpop.f32.mrf.mxu1 }
 0x10d   :  { %v1169_v6 = vadd.f32 %v1168_v51, %v1167_v49  ;;  %v895_v31 = vadd.f32 %v1194_v23, %v846_v22 }
 0x10e   :  { %v1170_v53 = vpop.f32.mrf.mxu0  ;;  %v1196_v54 = vpop.f32.mrf.mxu1 }
 0x10f   :  { %v851_v15 = vadd.f32 %v1169_v6, %v802_v9  ;;  %v1197_v16 = vadd.f32 %v1196_v54, %v1195_v52 }
 0x110   :  { %v1171_v60 = vpop.f32.mrf.mxu0  ;;  %v1198_v61 = vpop.f32.mrf.mxu1 }
 0x111   :  { %v1172_v7 = vadd.f32 %v1171_v60, %v1170_v53  ;;  %v900_v25 = vadd.f32 %v1197_v16, %v851_v15 }
 0x112   :  { %v1199_v8 = vpop.f32.mrf.mxu1 }
 0x113   :  { %v854_v17 = vadd.f32 %v1172_v7, %v805_v10  ;;  %v1200_v18 = vadd.f32 %v1199_v8, %v1198_v61 }
 0x115   :  { %v903_v26 = vadd.f32 %v1200_v18, %v854_v17 }
 0x122   :  { %v1229_v19 = vpop.f32.mrf.mxu0 }
 0x123   :  { %v949_v28 = vadd.f32 %v1229_v19, %v900_v25 }
 0x124   :  { %v940_v24 = vpop.f32.mrf.mxu0 }
 0x125   :  { %v941_v33 = vadd.f32 %v940_v24, %v892_v29 }
 0x126   :  { %v1230_v27 = vpop.f32.mrf.mxu0 }
 0x127   :  { %v952_v30 = vadd.f32 %v1230_v27, %v903_v26 }
 0x128   :  { %v943_v32 = vpop.f32.mrf.mxu0 }
 0x129   :  { %v1086_v34 = vpack.c.bf16 %v952_v30, %v949_v28  ;;  %v944_v35 = vadd.f32 %v943_v32, %v895_v31 }
 0x12b   :  { %1088 = vst [vmem:[%s1631_s3 + $0x8] sm:$0xff] %v1086_v34   ;;  %v1081_v36 = vpack.c.bf16 %v944_v35, %v941_v33 }
 0x12d   :  { %1082 = vst [vmem:[%s1631_s3] sm:$0xff] %v1081_v36  }

// kernel: s_vqvae_forward.14
= control target key start
LH: loop header
LB: loop body
LE: loop exit
PB: predicated region body
PF: predicated region fallthrough
CT: control target
= control target key end

     0   :  { %v1442_v33 = vmov 0   ;;  %vm1014_vm0 = vcmask 261120   ;;  %s1803_s1 = inlined_call_operand.vmem [shape: bf16[1152,32], index: 1, kind: input, shape index: {}]   ;;  %s1804_s0 = inlined_call_operand.vmem [shape: bf16[32,1152], index: 0, kind: input, shape index: {}]   ;;  %s1805_s3 = inlined_call_operand.vmem [shape: bf16[32,128], index: 3, kind: input, shape index: {}]   ;;  %s1806_s2 = inlined_call_operand.vmem [shape: f32[1,32], index: 2, kind: input, shape index: {}]   ;;  %s1807_s4 = inlined_call_operand.vmem [shape: f32[1,128], index: 4, kind: input, shape index: {}]   ;;  %s1808_s5 = inlined_call_operand.vmem [shape: bf16[32,128], index: 5, kind: output, shape index: {}]  }
   0x1   :  { %v1368_v0 = vld [vmem:[%s1803_s1 + $0x78] sm:$0xff]   ;;  %v1372_v4 = vld [vmem:[%s1803_s1 + $0x70] sm:$0xff]   ;;  %v1376_v8 = vld [vmem:[%s1803_s1 + $0x68] sm:$0xff]  }
   0x2   :  { %v1369_v1 = vld [vmem:[%s1803_s1 + $0x38] sm:$0xff]   ;;  %1213 = vmatprep.subr.bf16.mxu0 %v1368_v0  ;;  %v1373_v5 = vld [vmem:[%s1803_s1 + $0x30] sm:$0xff]   ;;  %v1377_v9 = vld [vmem:[%s1803_s1 + $0x28] sm:$0xff]  }
   0x3   :  { %v1370_v2 = vld [vmem:[%s1803_s1 + $0xf8] sm:$0xff]   ;;  %1214 = vmatpush3.bf16.msra.mxu0 %v1369_v1  ;;  %v1374_v6 = vld [vmem:[%s1803_s1 + $0xf0] sm:$0xff]   ;;  %v1378_v10 = vld [vmem:[%s1803_s1 + $0xe8] sm:$0xff]  }
   0x4   :  { %v1371_v3 = vld [vmem:[%s1803_s1 + $0xb8] sm:$0xff]   ;;  %1241 = vmatprep.subr.bf16.mxu1 %v1370_v2  ;;  %1215 = vmatprep.subr.bf16.mxu0 %v1372_v4  ;;  %v1375_v7 = vld [vmem:[%s1803_s1 + $0xb0] sm:$0xff]   ;;  %v1379_v11 = vld [vmem:[%s1803_s1 + $0xa8] sm:$0xff]  }
   0x5   :  { %1242 = vmatpush3.bf16.msra.mxu1 %v1371_v3  ;;  %v1380_v12 = vld [vmem:[%s1803_s1 + $0x60] sm:$0xff]   ;;  %v1384_v16 = vld [vmem:[%s1803_s1 + $0x58] sm:$0xff]   ;;  %v1388_v20 = vld [vmem:[%s1803_s1 + $0x50] sm:$0xff]  }
   0x6   :  { %1243 = vmatprep.subr.bf16.mxu1 %v1374_v6  ;;  %v1381_v13 = vld [vmem:[%s1803_s1 + $0x20] sm:$0xff]   ;;  %v1385_v17 = vld [vmem:[%s1803_s1 + $0x18] sm:$0xff]   ;;  %v1389_v21 = vld [vmem:[%s1803_s1 + $0x10] sm:$0xff]  }
   0x7   :  { %1216 = vmatpush3.bf16.msra.mxu0 %v1373_v5  ;;  %v1382_v14 = vld [vmem:[%s1803_s1 + $0xe0] sm:$0xff]   ;;  %v1386_v18 = vld [vmem:[%s1803_s1 + $0xd8] sm:$0xff]   ;;  %v1390_v22 = vld [vmem:[%s1803_s1 + $0xd0] sm:$0xff]  }
   0x8   :  { %1217 = vmatprep.subr.bf16.mxu0 %v1376_v8  ;;  %v1383_v15 = vld [vmem:[%s1803_s1 + $0xa0] sm:$0xff]   ;;  %v1387_v19 = vld [vmem:[%s1803_s1 + $0x98] sm:$0xff]   ;;  %v1391_v23 = vld [vmem:[%s1803_s1 + $0x90] sm:$0xff]  }
   0x9   :  { %1244 = vmatpush3.bf16.msra.mxu1 %v1375_v7  ;;  %v1392_v24 = vld [vmem:[%s1803_s1 + $0x48] sm:$0xff]   ;;  %v1396_v28 = vld [vmem:[%s1803_s1 + $0x40] sm:$0xff]   ;;  %v1400_v37 = vld [vmem:[%s1803_s1 + $0x178] sm:$0xff]  }
   0xa   :  { %1245 = vmatprep.subr.bf16.mxu1 %v1378_v10  ;;  %v1393_v25 = vld [vmem:[%s1803_s1 + $0x8] sm:$0xff]   ;;  %v1397_v29 = vld [vmem:[%s1803_s1] sm:$0xff]   ;;  %v1401_v44 = vld [vmem:[%s1803_s1 + $0x138] sm:$0xff]  }
   0xb   :  { %1218 = vmatpush3.bf16.msra.mxu0 %v1377_v9  ;;  %v1394_v26 = vld [vmem:[%s1803_s1 + $0xc8] sm:$0xff]   ;;  %v1398_v30 = vld [vmem:[%s1803_s1 + $0xc0] sm:$0xff]   ;;  %v1402_v45 = vld [vmem:[%s1803_s1 + $0x1f8] sm:$0xff]  }
   0xc   :  { %1219 = vmatprep.subr.bf16.mxu0 %v1380_v12  ;;  %v1395_v27 = vld [vmem:[%s1803_s1 + $0x88] sm:$0xff]   ;;  %v21_v31 = vld [vmem:[%s1804_s0] sm:$0xff]  ;;  %v1403_v48 = vld [vmem:[%s1803_s1 + $0x1b8] sm:$0xff]  }
   0xd   :  { %1246 = vmatpush3.bf16.msra.mxu1 %v1379_v11  ;;  %v26_v32 = vld [vmem:[%s1804_s0 + $0x24] sm:$0xff]  ;;  %v45_v34 = vmax.bf16 %v1442_v33, %v21_v31  ;;  %v27_v41 = vld [vmem:[%s1804_s0 + $0x2c] sm:$0xff]  ;;  %v1416_v61 = vld [vmem:[%s1803_s1 + $0x158] sm:$0xff]  }
   0xe   :  { %1247 = vmatprep.subr.bf16.mxu1 %v1382_v14  ;;  %v50_v35 = vmax.bf16 %v1442_v33, %v26_v32  ;;  %v1399_v36 = vld [vmem:[%s1803_s1 + $0x80] sm:$0xff]   ;;  %v22_v38 = vld [vmem:[%s1804_s0 + $0x8] sm:$0xff]  ;;  %v51_v43 = vmax.bf16 %v1442_v33, %v27_v41  ;;  %v1404_v49 = vld [vmem:[%s1803_s1 + $0x170] sm:$0xff]  }
   0xf   :  { %1220 = vmatpush3.bf16.msra.mxu0 %v1381_v13  ;;  %v46_v42 = vmax.bf16 %v1442_v33, %v22_v38  ;;  %v1405_v50 = vld [vmem:[%s1803_s1 + $0x130] sm:$0xff]   ;;  %v1408_v53 = vld [vmem:[%s1803_s1 + $0x168] sm:$0xff]   ;;  %v1412_v57 = vld [vmem:[%s1803_s1 + $0x160] sm:$0xff]  }
  0x10   :  { %1221 = vmatprep.subr.bf16.mxu0 %v1384_v16  ;;  %v1100_v39 = vcombine.high %v45_v34, %v50_v35  ;;  %v1099_v40 = vcombine.low %v45_v34, %v50_v35  ;;  %v1406_v51 = vld [vmem:[%s1803_s1 + $0x1f0] sm:$0xff]   ;;  %v1409_v54 = vld [vmem:[%s1803_s1 + $0x128] sm:$0xff]   ;;  %v1413_v58 = vld [vmem:[%s1803_s1 + $0x120] sm:$0xff]  }
  0x11   :  { %1248 = vmatpush3.bf16.msra.mxu1 %v1383_v15  ;;  %v1102_v46 = vcombine.high %v46_v42, %v51_v43  ;;  %v1101_v47 = vcombine.low %v46_v42, %v51_v43  ;;  %v1407_v52 = vld [vmem:[%s1803_s1 + $0x1b0] sm:$0xff]   ;;  %v1410_v55 = vld [vmem:[%s1803_s1 + $0x1e8] sm:$0xff]   ;;  %v1414_v59 = vld [vmem:[%s1803_s1 + $0x1e0] sm:$0xff]  }
  0x12   :  { %1249 = vmatprep.subr.bf16.mxu1 %v1386_v18  ;;  %772 = vmatprep.mubr.bf16.mxu0 %v1100_v39  ;;  %v1411_v56 = vld [vmem:[%s1803_s1 + $0x1a8] sm:$0xff]   ;;  %v1415_v60 = vld [vmem:[%s1803_s1 + $0x1a0] sm:$0xff]   ;;  %v1417_v62 = vld [vmem:[%s1803_s1 + $0x118] sm:$0xff]  }
  0x13   :  { %1222 = vmatpush3.bf16.msra.mxu0 %v1385_v17  ;;  %821 = vmatprep.mubr.bf16.mxu1 %v1102_v46  ;;  %v31_v63 = vld [vmem:[%s1804_s0 + $0x48] sm:$0xff]  ;;  %v1418_v3 = vld [vmem:[%s1803_s1 + $0x1d8] sm:$0xff]   ;;  %v32_v7 = vld [vmem:[%s1804_s0 + $0x50] sm:$0xff] }
  0x14   :  { %1223 = vmatprep.subr.bf16.mxu0 %v1388_v20  ;;  %v36_v0 = vld [vmem:[%s1804_s0 + $0x6c] sm:$0xff]  ;;  %v55_v1 = vmax.bf16 %v1442_v33, %v31_v63  ;;  %v1419_v4 = vld [vmem:[%s1803_s1 + $0x198] sm:$0xff]   ;;  %v56_v9 = vmax.bf16 %v1442_v33, %v32_v7 }
  0x15   :  { %1250 = vmatpush3.bf16.msra.mxu1 %v1387_v19  ;;  %v60_v2 = vmax.bf16 %v1442_v33, %v36_v0  ;;  %v37_v8 = vld [vmem:[%s1804_s0 + $0x74] sm:$0xff]  ;;  %v1424_v17 = vld [vmem:[%s1803_s1 + $0x148] sm:$0xff]   ;;  %v29_v31 = vld [vmem:[%s1804_s0 + $0x3c] sm:$0xff] }
  0x16   :  { %1251 = vmatprep.subr.bf16.mxu1 %v1390_v22  ;;  %v61_v10 = vmax.bf16 %v1442_v33, %v37_v8  ;;  %v1420_v11 = vld [vmem:[%s1803_s1 + $0x150] sm:$0xff]   ;;  %v1425_v18 = vld [vmem:[%s1803_s1 + $0x108] sm:$0xff]   ;;  %v1429_v22 = vld [vmem:[%s1803_s1 + $0x100] sm:$0xff]  }
  0x17   :  { %1224 = vmatpush3.bf16.msra.mxu0 %v1389_v21  ;;  %v1109_v5 = vcombine.high %v55_v1, %v60_v2  ;;  %v1108_v6 = vcombine.low %v55_v1, %v60_v2  ;;  %v1421_v12 = vld [vmem:[%s1803_s1 + $0x110] sm:$0xff]   ;;  %v1426_v19 = vld [vmem:[%s1803_s1 + $0x1c8] sm:$0xff]   ;;  %v1428_v21 = vld [vmem:[%s1803_s1 + $0x140] sm:$0xff]  }
  0x18   :  { %1225 = vmatprep.subr.bf16.mxu0 %v1392_v24  ;;  %v1111_v13 = vcombine.high %v56_v9, %v61_v10  ;;  %v1110_v14 = vcombine.low %v56_v9, %v61_v10  ;;  %v1422_v15 = vld [vmem:[%s1803_s1 + $0x1d0] sm:$0xff]   ;;  %v1427_v20 = vld [vmem:[%s1803_s1 + $0x188] sm:$0xff]   ;;  %v1728_v38 = vld [vmem:[%s1804_s0 + $0x58] sm:$0xff] }
  0x19   :  { %1252 = vmatpush3.bf16.msra.mxu1 %v1391_v23  ;;  %v1423_v16 = vld [vmem:[%s1803_s1 + $0x190] sm:$0xff]   ;;  %v1430_v23 = vld [vmem:[%s1803_s1 + $0x1c0] sm:$0xff]   ;;  %v57_v42 = vmax.bf16 %v1442_v33, %v1728_v38  ;;  %v1436_v0 = vld [vmem:[%s1803_s1 + $0x218] sm:$0xff]  }
  0x1a   :  { %1253 = vmatprep.subr.bf16.mxu1 %v1394_v26  ;;  %v1697_v24 = vld [vmem:[%s1804_s0 + $0x10] sm:$0xff]  ;;  %v1733_v39 = vld [vmem:[%s1804_s0 + $0x7c] sm:$0xff] }
  0x1b   :  { %1226 = vmatpush3.bf16.msra.mxu0 %v1393_v25  ;;  %v1702_v25 = vld [vmem:[%s1804_s0 + $0x34] sm:$0xff]  ;;  %v47_v26 = vmax.bf16 %v1442_v33, %v1697_v24  ;;  %v62_v43 = vmax.bf16 %v1442_v33, %v1733_v39  ;;  %v1439_v2 = vld [vmem:[%s1803_s1 + $0x200] sm:$0xff]  }
  0x1c   :  { %1227 = vmatprep.subr.bf16.mxu0 %v1396_v28  ;;  %v1431_v28 = vld [vmem:[%s1803_s1 + $0x180] sm:$0xff]   ;;  %v1437_v1 = vld [vmem:[%s1803_s1 + $0x210] sm:$0xff]  }
  0x1d   :  { %1254 = vmatpush3.bf16.msra.mxu1 %v1395_v27  ;;  %v52_v27 = vmax.bf16 %v1442_v33, %v1702_v25 }
  0x1e   :  { %1255 = vmatprep.subr.bf16.mxu1 %v1398_v30  ;;  %v24_v30 = vld [vmem:[%s1804_s0 + $0x18] sm:$0xff] }
  0x1f   :  { %1228 = vmatpush3.bf16.msra.mxu0 %v1397_v29  ;;  %v1432_v29 = vld [vmem:[%s1803_s1 + $0x238] sm:$0xff]   ;;  %v1103_v32 = vcombine.low %v47_v26, %v52_v27  ;;  %v1104_v34 = vcombine.high %v47_v26, %v52_v27  ;;  %v48_v35 = vmax.bf16 %v1442_v33, %v24_v30 }
  0x20   :  { %1269 = vmatprep.subr.bf16.mxu0 %v1400_v37  ;;  %v1433_v37 = vld [vmem:[%s1803_s1 + $0x230] sm:$0xff]  }
  0x21   :  { %1256 = vmatpush3.bf16.msra.mxu1 %v1399_v36  ;;  %v53_v36 = vmax.bf16 %v1442_v33, %v29_v31 }
  0x22   :  { %773 = vmatmul.mubr.bf16.vlgmr.msra.gmra.mxu0 %v1099_v40  ;;  %1297 = vmatprep.subr.bf16.mxu1 %v1402_v45  ;;  %v39_v45 = vld [vmem:[%s1804_s0 + $0x84] sm:$0xff] }
  0x23   :  { %1270 = vmatpush3.bf16.msra.mxu0 %v1401_v44  ;;  %780 = vmatprep.mubr.bf16.mxu0 %v1109_v5  ;;  %v1105_v40 = vcombine.low %v48_v35, %v53_v36  ;;  %v1106_v41 = vcombine.high %v48_v35, %v53_v36  ;;  %v34_v44 = vld [vmem:[%s1804_s0 + $0x60] sm:$0xff] }
  0x24   :  { %822 = vmatmul.mubr.bf16.vlgmr.msra.gmra.mxu1 %v1101_v47  ;;  %1271 = vmatprep.subr.bf16.mxu0 %v1404_v49  ;;  %v58_v46 = vmax.bf16 %v1442_v33, %v34_v44  ;;  %v1113_v47 = vcombine.high %v57_v42, %v62_v43  ;;  %v1434_v49 = vld [vmem:[%s1803_s1 + $0x228] sm:$0xff]  }
  0x25   :  { %1298 = vmatpush3.bf16.msra.mxu1 %v1403_v48  ;;  %829 = vmatprep.mubr.bf16.mxu1 %v1111_v13  ;;  %v63_v48 = vmax.bf16 %v1442_v33, %v39_v45 }
  0x26   :  { %1299 = vmatprep.subr.bf16.mxu1 %v1406_v51  ;;  %v1112_v51 = vcombine.low %v57_v42, %v62_v43 }
  0x27   :  { %1272 = vmatpush3.bf16.msra.mxu0 %v1405_v50  ;;  %v1115_v50 = vcombine.high %v58_v46, %v63_v48 }
  0x28   :  { %1273 = vmatprep.subr.bf16.mxu0 %v1408_v53  ;;  %v30_v53 = vld [vmem:[%s1804_s0 + $0x44] sm:$0xf] }
  0x29   :  { %1300 = vmatpush3.bf16.msra.mxu1 %v1407_v52  ;;  %v25_v52 = vld [vmem:[%s1804_s0 + $0x20] sm:$0xf] }
  0x2a   :  { %1301 = vmatprep.subr.bf16.mxu1 %v1410_v55  ;;  %781 = vmatmul.mubr.bf16.gmra.mxu0 %v1108_v6  ;;  %v1435_v55 = vld [vmem:[%s1803_s1 + $0x220] sm:$0xff]  }
  0x2b   :  { %1274 = vmatpush3.bf16.msra.mxu0 %v1409_v54  ;;  %870 = vmatprep.mubr.bf16.mxu0 %v1104_v34  ;;  %v1114_v54 = vcombine.low %v58_v46, %v63_v48 }
  0x2c   :  { %1275 = vmatprep.subr.bf16.mxu0 %v1412_v57  ;;  %830 = vmatmul.mubr.bf16.gmra.mxu1 %v1110_v14  ;;  %v54_v57 = vmax.bf16 %v1442_v33, %v30_v53 }
  0x2d   :  { %1302 = vmatpush3.bf16.msra.mxu1 %v1411_v56  ;;  %919 = vmatprep.mubr.bf16.mxu1 %v1106_v41  ;;  %v49_v56 = vmax.bf16 %v1442_v33, %v25_v52  ;;  %v1098_v41 = vld [vmem:[%s1806_s2] ss:$0 sm:$0xff] }
  0x2e   :  { %1303 = vmatprep.subr.bf16.mxu1 %v1414_v59  ;;  %v40_v59 = vld [vmem:[%s1804_s0 + $0x8c] sm:$0xf] }
  0x2f   :  { %1276 = vmatpush3.bf16.msra.mxu0 %v1413_v58  ;;  %v35_v58 = vld [vmem:[%s1804_s0 + $0x68] sm:$0xf] }
  0x30   :  { %1277 = vmatprep.subr.bf16.mxu0 %v1416_v61  ;;  %v64_v61 = vmax.bf16 %v1442_v33, %v40_v59 }
  0x31   :  { %1304 = vmatpush3.bf16.msra.mxu1 %v1415_v60  ;;  %v59_v60 = vmax.bf16 %v1442_v33, %v35_v58  ;;  %v1438_v33 = vld [vmem:[%s1803_s1 + $0x208] sm:$0xff]  }
  0x32   :  { %1305 = vmatprep.subr.bf16.mxu1 %v1418_v3  ;;  %v1440_v3 = vld [vmem:[%s1805_s3 + $0x8] sm:$0xff]  }
  0x33   :  { %1278 = vmatpush3.bf16.msra.mxu0 %v1417_v62  ;;  %v1107_v62 = vcombine.low %v49_v56, %v54_v57  ;;  %v1116_v63 = vcombine.low %v59_v60, %v64_v61 }
  0x34   :  { %1279 = vmatprep.subr.bf16.mxu0 %v1420_v11 }
  0x35   :  { %1306 = vmatpush3.bf16.msra.mxu1 %v1419_v4  ;;  %v1441_v4 = vld [vmem:[%s1805_s3] sm:$0xff]  }
  0x36   :  { %1307 = vmatprep.subr.bf16.mxu1 %v1422_v15 }
  0x37   :  { %1280 = vmatpush3.bf16.msra.mxu0 %v1421_v12 }
  0x38   :  { %1281 = vmatprep.subr.bf16.mxu0 %v1424_v17 }
  0x39   :  { %1308 = vmatpush3.bf16.msra.mxu1 %v1423_v16 }
  0x3a   :  { %1309 = vmatprep.subr.bf16.mxu1 %v1426_v19 }
  0x3b   :  { %1282 = vmatpush3.bf16.msra.mxu0 %v1425_v18 }
  0x3c   :  { %1283 = vmatprep.subr.bf16.mxu0 %v1428_v21 }
  0x3d   :  { %1310 = vmatpush3.bf16.msra.mxu1 %v1427_v20 }
  0x3e   :  { %1311 = vmatprep.subr.bf16.mxu1 %v1430_v23 }
  0x3f   :  { %1284 = vmatpush3.bf16.msra.mxu0 %v1429_v22 }
  0x40   :  { %1339 = vmatprep.subr.bf16.mxu0 %v1432_v29 }
  0x41   :  { %1312 = vmatpush3.bf16.msra.mxu1 %v1431_v28 }
  0x42   :  { %871 = vmatmul.mubr.bf16.vlgmr.msra.gmra.mxu0 %v1103_v32  ;;  %1359 = vmatprep.subr.bf16.mxu1 %v1440_v3 }
  0x43   :  { %1340 = vmatpush3.bf16.msra.mxu0 %v1432_v29  ;;  %878 = vmatprep.mubr.bf16.mxu0 %v1113_v47 }
  0x44   :  { %920 = vmatmul.mubr.bf16.vlgmr.msra.gmra.mxu1 %v1105_v40  ;;  %1341 = vmatprep.subr.bf16.mxu0 %v1433_v37 }
  0x45   :  { %927 = vmatprep.mubr.bf16.mxu1 %v1115_v50  ;;  %1360 = vmatpush3.bf16.msra.mxu1 %v1440_v3 }
  0x46   :  { %1361 = vmatprep.subr.bf16.mxu1 %v1441_v4 }
  0x47   :  { %1342 = vmatpush3.bf16.msra.mxu0 %v1433_v37 }
  0x48   :  { %1343 = vmatprep.subr.bf16.mxu0 %v1434_v49 }
  0x49   :  { %1362 = vmatpush3.bf16.msra.mxu1 %v1441_v4 }
  0x4a   :  { %879 = vmatmul.mubr.bf16.gmra.mxu0 %v1112_v51 }
  0x4b   :  { %1344 = vmatpush3.bf16.msra.mxu0 %v1434_v49  ;;  %1355 = vmatprep.mubr.bf16.mxu0 %v1107_v62 }
  0x4c   :  { %928 = vmatmul.mubr.bf16.gmra.mxu1 %v1114_v54  ;;  %1345 = vmatprep.subr.bf16.mxu0 %v1435_v55 }
  0x4f   :  { %1346 = vmatpush3.bf16.msra.mxu0 %v1435_v55 }
  0x50   :  { %1347 = vmatprep.subr.bf16.mxu0 %v1436_v0 }
  0x53   :  { %1348 = vmatpush3.bf16.msra.mxu0 %v1436_v0 }
  0x54   :  { %1349 = vmatprep.subr.bf16.mxu0 %v1437_v1 }
  0x57   :  { %1350 = vmatpush3.bf16.msra.mxu0 %v1437_v1 }
  0x58   :  { %1351 = vmatprep.subr.bf16.mxu0 %v1438_v33 }
  0x5b   :  { %1352 = vmatpush3.bf16.msra.mxu0 %v1438_v33 }
  0x5c   :  { %1353 = vmatprep.subr.bf16.mxu0 %v1439_v2 }
  0x5f   :  { %1354 = vmatpush3.bf16.msra.mxu0 %v1439_v2 }
  0x62   :  { %1356 = vmatmul.mubr.bf16.vlgmr.msra.gmra.mxu0 %v1116_v63 }
  0xe2   :  { %v1229_v5 = vpop.f32.mrf.mxu0 }
  0xe4   :  { %v1257_v6 = vpop.f32.mrf.mxu1  ;;  %v1230_v7 = vpop.f32.mrf.mxu0 }
  0xe5   :  { %v1231_v37 = vadd.f32 %v1230_v7, %v1229_v5 }
  0xe6   :  { %v1258_v8 = vpop.f32.mrf.mxu1  ;;  %v1232_v9 = vpop.f32.mrf.mxu0 }
  0xe7   :  { %v775_v46 = vadd.f32 %v1231_v37, %v1098_v41  ;;  %v1259_v47 = vadd.f32 %v1258_v8, %v1257_v6  ;;  %v42_v37 = vunpack.c.l.bf16 %v1702_v25 }
  0xe8   :  { %v1260_v10 = vpop.f32.mrf.mxu1  ;;  %v1233_v11 = vpop.f32.mrf.mxu0 }
  0xe9   :  { %v1234_v42 = vadd.f32 %v1233_v11, %v1232_v9  ;;  %v824_v58 = vadd.f32 %v1259_v47, %v775_v46 }
  0xea   :  { %v1261_v12 = vpop.f32.mrf.mxu1  ;;  %v1235_v13 = vpop.f32.mrf.mxu0 }
  0xeb   :  { %v778_v50 = vadd.f32 %v1234_v42, %v1098_v41  ;;  %v1262_v51 = vadd.f32 %v1261_v12, %v1260_v10 }
  0xec   :  { %v1263_v14 = vpop.f32.mrf.mxu1  ;;  %v1236_v15 = vpop.f32.mrf.mxu0 }
  0xed   :  { %v1237_v43 = vadd.f32 %v1236_v15, %v1235_v13  ;;  %v827_v61 = vadd.f32 %v1262_v51, %v778_v50 }
  0xee   :  { %v1264_v16 = vpop.f32.mrf.mxu1  ;;  %v1238_v17 = vpop.f32.mrf.mxu0 }
  0xef   :  { %v783_v52 = vadd.f32 %v1237_v43, %v1098_v41  ;;  %v1265_v53 = vadd.f32 %v1264_v16, %v1263_v14 }
  0xf0   :  { %v1266_v18 = vpop.f32.mrf.mxu1  ;;  %v1239_v19 = vpop.f32.mrf.mxu0 }
  0xf1   :  { %v1240_v40 = vadd.f32 %v1239_v19, %v1238_v17  ;;  %v832_v62 = vadd.f32 %v1265_v53, %v783_v52 }
  0xf2   :  { %v1267_v20 = vpop.f32.mrf.mxu1 }
  0xf3   :  { %v786_v48 = vadd.f32 %v1240_v40, %v1098_v41  ;;  %v1268_v49 = vadd.f32 %v1267_v20, %v1266_v18 }
  0xf5   :  { %v835_v59 = vadd.f32 %v1268_v49, %v786_v48 }
 0x102   :  { %v1285_v21 = vpop.f32.mrf.mxu0 }
 0x104   :  { %v1286_v22 = vpop.f32.mrf.mxu0  ;;  %v1313_v23 = vpop.f32.mrf.mxu1 }
 0x105   :  { %v1287_v54 = vadd.f32 %v1286_v22, %v1285_v21 }
 0x106   :  { %v1288_v26 = vpop.f32.mrf.mxu0  ;;  %v1314_v27 = vpop.f32.mrf.mxu1 }
 0x107   :  { %v873_v63 = vadd.f32 %v1287_v54, %v824_v58  ;;  %v1315_v0 = vadd.f32 %v1314_v27, %v1313_v23  ;;  %v1189_v27 = vld [vmem:[%s1807_s4] ss:$0 sm:$0xff] }
 0x108   :  { %v1289_v28 = vpop.f32.mrf.mxu0  ;;  %v1316_v29 = vpop.f32.mrf.mxu1 }
 0x109   :  { %v1290_v60 = vadd.f32 %v1289_v28, %v1288_v26  ;;  %v922_v8 = vadd.f32 %v1315_v0, %v873_v63 }
 0x10a   :  { %v1291_v30 = vpop.f32.mrf.mxu0  ;;  %v1317_v31 = vpop.f32.mrf.mxu1 }
 0x10b   :  { %v876_v5 = vadd.f32 %v1290_v60, %v827_v61  ;;  %v1318_v6 = vadd.f32 %v1317_v31, %v1316_v29  ;;  %v43_v29 = vunpack.c.l.bf16 %v1728_v38  ;;  %v44_v31 = vunpack.c.l.bf16 %v1733_v39 }
 0x10c   :  { %v1292_v32 = vpop.f32.mrf.mxu0  ;;  %v1319_v34 = vpop.f32.mrf.mxu1 }
 0x10d   :  { %v1293_v56 = vadd.f32 %v1292_v32, %v1291_v30  ;;  %v925_v14 = vadd.f32 %v1318_v6, %v876_v5 }
 0x10e   :  { %v1294_v35 = vpop.f32.mrf.mxu0  ;;  %v1320_v36 = vpop.f32.mrf.mxu1 }
 0x10f   :  { %v881_v2 = vadd.f32 %v1293_v56, %v832_v62  ;;  %v1321_v3 = vadd.f32 %v1320_v36, %v1319_v34  ;;  %v41_v34 = vunpack.c.l.bf16 %v1697_v24 }
 0x110   :  { %v1295_v44 = vpop.f32.mrf.mxu0  ;;  %v1322_v45 = vpop.f32.mrf.mxu1 }
 0x111   :  { %v1296_v55 = vadd.f32 %v1295_v44, %v1294_v35  ;;  %v930_v10 = vadd.f32 %v1321_v3, %v881_v2 }
 0x112   :  { %v1323_v57 = vpop.f32.mrf.mxu1 }
 0x113   :  { %v884_v1 = vadd.f32 %v1296_v55, %v835_v59  ;;  %v1324_v33 = vadd.f32 %v1323_v57, %v1322_v45 }
 0x115   :  { %v933_v9 = vadd.f32 %v1324_v33, %v884_v1 }
 0x122   :  { %v1357_v4 = vpop.f32.mrf.mxu0 }
 0x123   :  { %v979_v15 = vadd.f32 %v1357_v4, %v930_v10 }
 0x124   :  { %v970_v7 = vpop.f32.mrf.mxu0 }
 0x125   :  { %v971_v12 = vadd.f32 %v970_v7, %v922_v8  ;;  %v987_v21 = vmax.f32 %v979_v15, 0.0 }
 0x126   :  { %v1358_v11 = vpop.f32.mrf.mxu0 }
 0x127   :  { %v982_v13 = vadd.f32 %v1358_v11, %v933_v9  ;;  %v985_v19 = vmax.f32 %v971_v12, 0.0 }
 0x128   :  { %v973_v16 = vpop.f32.mrf.mxu0 }
 0x129   :  { %v974_v17 = vadd.f32 %v973_v16, %v925_v14  ;;  %v988_v18 = vmax.f32 %v982_v13, 0.0 }
 0x12b   :  { %v986_v20 = vmax.f32 %v974_v17, 0.0  ;;  %v990_v23 = vpack.c.bf16 %v988_v18, %v987_v21 }
 0x12d   :  { %v989_v22 = vpack.c.bf16 %v986_v20, %v985_v19 }
 0x12f   :  { %1363 = vmatprep.mubr.msk.bf16.mxu1 %vm1014_vm0, %v989_v22 }
 0x130   :  { %1364 = vmatmul.mubr.msk.bf16.vlgmr.msra.gmra.mxu1 %vm1014_vm0, %v990_v23 }
 0x1f0   :  { %v1365_v26 = vpop.f32.mrf.mxu1 }
 0x1f1   :  { %v1064_v30 = vadd.f32 %v1365_v26, %v1189_v27 }
 0x1f2   :  { %v1055_v28 = vpop.f32.mrf.mxu1 }
 0x1f3   :  { %v1056_v35 = vadd.f32 %v1189_v27, %v1055_v28  ;;  %v1072_v41 = vadd.f32 %v1064_v30, %v43_v29 }
 0x1f4   :  { %v1366_v32 = vpop.f32.mrf.mxu1 }
 0x1f5   :  { %v1067_v36 = vadd.f32 %v1366_v32, %v1189_v27  ;;  %v1070_v44 = vadd.f32 %v1056_v35, %v41_v34 }
 0x1f6   :  { %v1058_v40 = vpop.f32.mrf.mxu1 }
 0x1f7   :  { %v1073_v42 = vadd.f32 %v1067_v36, %v44_v31  ;;  %v1059_v43 = vadd.f32 %v1189_v27, %v1058_v40 }
 0x1f9   :  { %v1210_v45 = vpack.c.bf16 %v1073_v42, %v1072_v41  ;;  %v1071_v46 = vadd.f32 %v1059_v43, %v42_v37 }
 0x1fb   :  { %1212 = vst [vmem:[%s1808_s5 + $0x8] sm:$0xff] %v1210_v45   ;;  %v1205_v38 = vpack.c.bf16 %v1071_v46, %v1070_v44 }
 0x1fd   :  { %1206 = vst [vmem:[%s1808_s5] sm:$0xff] %v1205_v38  }

// kernel: s_vqvae_forward.16
= control target key start
LH: loop header
LB: loop body
LE: loop exit
PB: predicated region body
PF: predicated region fallthrough
CT: control target
= control target key end

     0   :  { %v685_v1 = vmov 0   ;;  %vm193_vm0 = vcmask 261120   ;;  %v263_v34 = vlaneseq  ;;  %s1005_s1 = inlined_call_operand.vmem [shape: bf16[128,32], index: 1, kind: input, shape index: {}]   ;;  %s1006_s0 = inlined_call_operand.vmem [shape: bf16[32,128], index: 0, kind: input, shape index: {}]   ;;  %s1007_s3 = inlined_call_operand.vmem [shape: bf16[32,256], index: 3, kind: input, shape index: {}]   ;;  %s1008_s2 = inlined_call_operand.vmem [shape: f32[1,32], index: 2, kind: input, shape index: {}]   ;;  %s1009_s4 = inlined_call_operand.vmem [shape: f32[1,256], index: 4, kind: input, shape index: {}]   ;;  %s1010_s5 = inlined_call_operand.vmem [shape: f32[256,32], index: 5, kind: input, shape index: {}]   ;;  %s1011_s7 = inlined_call_operand.vmem [shape: s32[32,1], index: 7, kind: output, shape index: {1}]   ;;  %s1012_s6 = inlined_call_operand.vmem [shape: f32[32,32], index: 6, kind: output, shape index: {0}]   ;;  %s1013_s8 = inlined_call_operand.vmem [shape: f32[32,1], index: 8, kind: output, shape index: {2}]  }
   0x1   :  { %v671_v0 = vld [vmem:[%s1005_s1 + $0x38] sm:$0xff]   ;;  %232 = vmatprep.mubr.bf16.mxu1 %v685_v1  ;;  %v672_v2 = vld [vmem:[%s1005_s1 + $0x30] sm:$0xff]   ;;  %v673_v3 = vld [vmem:[%s1005_s1 + $0x28] sm:$0xff]  }
   0x2   :  { %649 = vmatprep.subr.bf16.mxu0 %v671_v0  ;;  %v674_v4 = vld [vmem:[%s1005_s1 + $0x20] sm:$0xff]   ;;  %v675_v10 = vld [vmem:[%s1005_s1 + $0x18] sm:$0xff]   ;;  %v676_v11 = vld [vmem:[%s1005_s1 + $0x10] sm:$0xff]   ;;  %v264_v35 = vshrl.u32 %v263_v34, 7 }
   0x3   :  { %650 = vmatpush3.bf16.msra.mxu0 %v671_v0  ;;  %v27_v5 = vld [vmem:[%s1006_s0] sm:$0xf]  ;;  %v28_v6 = vld [vmem:[%s1006_s0 + $0x4] sm:$0xf]  ;;  %v677_v12 = vld [vmem:[%s1005_s1 + $0x8] sm:$0xff]  }
   0x4   :  { %651 = vmatprep.subr.bf16.mxu0 %v672_v2  ;;  %v31_v7 = vmax.bf16 %v685_v1, %v27_v5  ;;  %v32_v8 = vmax.bf16 %v685_v1, %v28_v6  ;;  %v29_v13 = vld [vmem:[%s1006_s0 + $0x8] sm:$0xf]  ;;  %v30_v14 = vld [vmem:[%s1006_s0 + $0xc] sm:$0xf]  ;;  %v678_v15 = vld [vmem:[%s1005_s1] sm:$0xff]   ;;  %v265_v36 = vsub.s32 0, %v264_v35 }
   0x5   :  { %v33_v16 = vmax.bf16 %v685_v1, %v29_v13  ;;  %v34_v17 = vmax.bf16 %v685_v1, %v30_v14  ;;  %v679_v19 = vld [vmem:[%s1007_s3 + $0x14] ss:$8 sps:$4 sm:$0xff]   ;;  %v681_v20 = vld [vmem:[%s1007_s3 + $0x10] ss:$8 sps:$4 sm:$0xff]   ;;  %v682_v21 = vld [vmem:[%s1007_s3 + $0x4] ss:$8 sps:$4 sm:$0xff]  }
   0x6   :  { %v563_v9 = vcombine.low %v31_v7, %v32_v8  ;;  %212 = vmatprep.subr.bf16.mxu1 %v679_v19  ;;  %v684_v22 = vld [vmem:[%s1007_s3] ss:$8 sps:$4 sm:$0xff]   ;;  %v269_v37 = vsub.s32 1, %v264_v35  ;;  %v800_v5 = vand.u32 127, %v263_v34  ;;  %v431_v35 = vld [vmem:[%s1010_s5 + $0xf8] sm:$0xff] }
   0x7   :  { %652 = vmatpush3.bf16.msra.mxu0 %v672_v2  ;;  %v564_v18 = vcombine.low %v33_v16, %v34_v17  ;;  %213 = vmatpush1.bf16.msra.mxu1 %v681_v20  ;;  %v562_v26 = vld [vmem:[%s1008_s2] ss:$0 sm:$0xff] }
   0x8   :  { %653 = vmatprep.subr.bf16.mxu0 %v673_v3  ;;  %665 = vmatprep.mubr.bf16.mxu0 %v563_v9  ;;  %v261_v38 = vld [vmem:[%s1009_s4] sm:$0x3]  ;;  %v803_v6 = vadd.s32 128, %v800_v5 }
   0x9   :  { %214 = vmatprep.subr.bf16.mxu1 %v682_v21  ;;  %v266_v41 = vrot.slane %v261_v38, %v265_v36  ;;  %v270_v42 = vrot.slane %v261_v38, %v269_v37  ;;  %v415_v36 = vld [vmem:[%s1010_s5 + $0x78] sm:$0xff]  ;;  %v430_v37 = vld [vmem:[%s1010_s5 + $0xf0] sm:$0xff] }
   0xa   :  { %v414_v38 = vld [vmem:[%s1010_s5 + $0x70] sm:$0xff] }
   0xb   :  { %654 = vmatpush3.bf16.msra.mxu0 %v673_v3  ;;  %215 = vmatpush1.bf16.msra.mxu1 %v684_v22 }
   0xc   :  { %655 = vmatprep.subr.bf16.mxu0 %v674_v4  ;;  %605 = vmatprep.subr.mxu1 %v431_v35  ;;  %v686_v35 = vmov 1.0  }
   0xf   :  { %656 = vmatpush3.bf16.msra.mxu0 %v674_v4 }
  0x10   :  { %657 = vmatprep.subr.bf16.mxu0 %v675_v10 }
  0x13   :  { %658 = vmatpush3.bf16.msra.mxu0 %v675_v10 }
  0x14   :  { %659 = vmatprep.subr.bf16.mxu0 %v676_v11 }
  0x17   :  { %660 = vmatpush3.bf16.msra.mxu0 %v676_v11 }
  0x18   :  { %661 = vmatprep.subr.bf16.mxu0 %v677_v12 }
  0x1b   :  { %662 = vmatpush3.bf16.msra.mxu0 %v677_v12 }
  0x1c   :  { %663 = vmatprep.subr.bf16.mxu0 %v678_v15 }
  0x1f   :  { %664 = vmatpush3.bf16.msra.mxu0 %v678_v15 }
  0x22   :  { %666 = vmatmul.mubr.bf16.vlgmr.msra.gmra.mxu0 %v564_v18 }
  0xe2   :  { %v667_v23 = vpop.f32.mrf.mxu0 }
  0xe3   :  { %v792_v32 = vadd.f32 %v667_v23, %v562_v26 }
  0xe4   :  { %v152_v24 = vpop.f32.mrf.mxu0 }
  0xe5   :  { %v783_v28 = vadd.f32 %v562_v26, %v152_v24 }
  0xe6   :  { %v668_v25 = vpop.f32.mrf.mxu0 }
  0xe7   :  { %v790_v31 = vadd.f32 %v668_v25, %v562_v26 }
  0xe8   :  { %v155_v27 = vpop.f32.mrf.mxu0 }
  0xe9   :  { %v785_v29 = vadd.f32 %v562_v26, %v155_v27  ;;  %v168_v33 = vpack.c.bf16 %v790_v31, %v792_v32 }
  0xeb   :  { %v167_v30 = vpack.c.bf16 %v785_v29, %v783_v28 }
  0xed   :  { %577 = vmatmul.mubr.msk.bf16.vlgmr.msra.gmra.mxu1 %vm193_vm0, %v167_v30 }
  0xee   :  { %242 = vmatprep.mubr.bf16.mxu1 %v685_v1  ;;  %606 = vmatpush3.msra.mxu1 %v415_v36 }
  0xef   :  { %607 = vmatprep.subr.mxu1 %v430_v37 }
  0xf0   :  { %608 = vmatpush3.msra.mxu1 %v414_v38 }
  0xf5   :  { %578 = vmatmul.mubr.msk.bf16.gmra.mxu1 %vm193_vm0, %v168_v33 }
 0x1ad   :  { %v234_v39 = vpop.f32.mrf.mxu1 }
 0x1ae   :  { %v253_v40 = vmul.f32 2.0, %v234_v39  ;;  %v429_v39 = vld [vmem:[%s1010_s5 + $0xe8] sm:$0xff] }
 0x1af   :  { %v236_v43 = vpop.f32.mrf.mxu1  ;;  %609 = vmatprep.subr.mxu1 %v429_v39 }
 0x1b0   :  { %v254_v44 = vmul.f32 2.0, %v236_v43  ;;  %v273_v47 = vsub.f32 %v253_v40, %v266_v41  ;;  %v413_v40 = vld [vmem:[%s1010_s5 + $0x68] sm:$0xff]  ;;  %v427_v43 = vld [vmem:[%s1010_s5 + $0xd8] sm:$0xff] }
 0x1b1   :  { %v238_v45 = vpop.f32.mrf.mxu1  ;;  %610 = vmatpush3.msra.mxu1 %v413_v40 }
 0x1b2   :  { %v255_v46 = vmul.f32 2.0, %v238_v45  ;;  %v274_v48 = vsub.f32 %v254_v44, %v270_v42  ;;  %v411_v44 = vld [vmem:[%s1010_s5 + $0x58] sm:$0xff]  ;;  %v426_v45 = vld [vmem:[%s1010_s5 + $0xd0] sm:$0xff] }
 0x1b3   :  { %v240_v49 = vpop.f32.mrf.mxu1 }
 0x1b4   :  { %v256_v50 = vmul.f32 2.0, %v240_v49  ;;  %v281_v51 = vmax.f32 %v273_v47, %v274_v48  ;;  %v275_v53 = vsub.f32 %v255_v46, %v266_v41  ;;  %v410_v46 = vld [vmem:[%s1010_s5 + $0x50] sm:$0xff]  ;;  %v424_v49 = vld [vmem:[%s1010_s5 + $0xc0] sm:$0xff] }
 0x1b5   :  { %v244_v52 = vpop.f32.mrf.mxu1 }
 0x1b6   :  { %v276_v54 = vsub.f32 %v256_v50, %v270_v42  ;;  %v257_v55 = vmul.f32 2.0, %v244_v52  ;;  %282 = vmax.xlane.f32.xlu0 %v281_v51  ;;  %v408_v50 = vld [vmem:[%s1010_s5 + $0x40] sm:$0xff]  ;;  %v423_v51 = vld [vmem:[%s1010_s5 + $0xb8] sm:$0xff] }
 0x1b7   :  { %v246_v56 = vpop.f32.mrf.mxu1  ;;  %v407_v52 = vld [vmem:[%s1010_s5 + $0x38] sm:$0xff] }
 0x1b8   :  { %v258_v57 = vmul.f32 2.0, %v246_v56  ;;  %v284_v58 = vmax.f32 %v275_v53, %v276_v54  ;;  %v277_v61 = vsub.f32 %v257_v55, %v266_v41  ;;  %v421_v55 = vld [vmem:[%s1010_s5 + $0xa8] sm:$0xff] }
 0x1b9   :  { %v248_v59 = vpop.f32.mrf.mxu1  ;;  %v405_v56 = vld [vmem:[%s1010_s5 + $0x28] sm:$0xff] }
 0x1ba   :  { %v259_v60 = vmul.f32 2.0, %v248_v59  ;;  %285 = vmax.xlane.f32.xlu0 %v284_v58  ;;  %v278_v62 = vsub.f32 %v258_v57, %v270_v42  ;;  %v420_v57 = vld [vmem:[%s1010_s5 + $0xa0] sm:$0xff]  ;;  %v419_v59 = vld [vmem:[%s1010_s5 + $0x98] sm:$0xff] }
 0x1bb   :  { %v250_v63 = vpop.f32.mrf.mxu1  ;;  %v404_v58 = vld [vmem:[%s1010_s5 + $0x20] sm:$0xff] }
 0x1bc   :  { %v260_v0 = vmul.f32 2.0, %v250_v63  ;;  %v287_v1 = vmax.f32 %v277_v61, %v278_v62  ;;  %v279_v2 = vsub.f32 %v259_v60, %v266_v41  ;;  %v428_v41 = vld [vmem:[%s1010_s5 + $0xe0] sm:$0xff]  ;;  %v403_v60 = vld [vmem:[%s1010_s5 + $0x18] sm:$0xff] }
 0x1bd   :  { %611 = vmatprep.subr.mxu1 %v428_v41 }
 0x1be   :  { %v280_v3 = vsub.f32 %v260_v0, %v270_v42  ;;  %288 = vmax.xlane.f32.xlu1 %v287_v1  ;;  %v412_v42 = vld [vmem:[%s1010_s5 + $0x60] sm:$0xff] }
 0x1bf   :  { %612 = vmatpush3.msra.mxu1 %v412_v42 }
 0x1c0   :  { %v290_v4 = vmax.f32 %v279_v2, %v280_v3  ;;  %613 = vmatprep.subr.mxu1 %v427_v43 }
 0x1c1   :  { %614 = vmatpush3.msra.mxu1 %v411_v44 }
 0x1c2   :  { %291 = vmax.xlane.f32.xlu1 %v290_v4  ;;  %615 = vmatprep.subr.mxu1 %v426_v45 }
 0x1c3   :  { %616 = vmatpush3.msra.mxu1 %v410_v46 }
 0x23f   :  { %v283_v7 = vpop.xlane.xlu0 %282 }
 0x240   :  { %vm296_vm1 = vcmp.eq.f32.partialorder %v273_v47, %v283_v7  ;;  %vm297_vm2 = vcmp.eq.f32.partialorder %v274_v48, %v283_v7  ;;  %v425_v47 = vld [vmem:[%s1010_s5 + $0xc8] sm:$0xff] }
 0x241   :  { %v304_v8 = vsel %vm296_vm1, %v800_v5, 2147483647  ;;  %v305_v9 = vsel %vm297_vm2, %v803_v6, 2147483647  ;;  %v409_v48 = vld [vmem:[%s1010_s5 + $0x48] sm:$0xff]  ;;  %617 = vmatprep.subr.mxu1 %v425_v47  ;;  %vm521_vm2 = vcmask 7168  }
 0x242   :  { %vm312_vm3 = vcmp.lt.s32.totalorder %v304_v8, %v305_v9  ;;  %618 = vmatpush3.msra.mxu1 %v409_v48 }
 0x243   :  { %v286_v10 = vpop.xlane.xlu0 %285  ;;  %v807_v11 = vsel %vm312_vm3, %v304_v8, %v305_v9  ;;  %619 = vmatprep.subr.mxu1 %v424_v49 }
 0x244   :  { %vm298_vm4 = vcmp.eq.f32.partialorder %v275_v53, %v286_v10  ;;  %vm299_vm5 = vcmp.eq.f32.partialorder %v276_v54, %v286_v10  ;;  %v315_v12 = vshra.s32 %v807_v11, 16  ;;  %620 = vmatpush3.msra.mxu1 %v408_v50  ;;  %v422_v53 = vld [vmem:[%s1010_s5 + $0xb0] sm:$0xff] }
 0x245   :  { %v306_v13 = vsel %vm298_vm4, %v800_v5, 2147483647  ;;  %v307_v14 = vsel %vm299_vm5, %v803_v6, 2147483647  ;;  %621 = vmatprep.subr.mxu1 %v423_v51  ;;  %v406_v54 = vld [vmem:[%s1010_s5 + $0x30] sm:$0xff] }
 0x246   :  { %vm328_vm6 = vcmp.lt.s32.totalorder %v306_v13, %v307_v14  ;;  %v812_v15 = vcvt.s32.f32 %v315_v12  ;;  %622 = vmatpush3.msra.mxu1 %v407_v52 }
 0x247   :  { %v289_v16 = vpop.xlane.xlu1 %288  ;;  %v814_v17 = vsel %vm328_vm6, %v306_v13, %v307_v14  ;;  %623 = vmatprep.subr.mxu1 %v422_v53  ;;  %v418_v14 = vld [vmem:[%s1010_s5 + $0x90] sm:$0xff] }
 0x248   :  { %vm300_vm7 = vcmp.eq.f32.partialorder %v277_v61, %v289_v16  ;;  %vm301_vm8 = vcmp.eq.f32.partialorder %v278_v62, %v289_v16  ;;  %318 = vmin.xlane.f32.xlu0 %v812_v15  ;;  %v331_v18 = vshra.s32 %v814_v17, 16  ;;  %624 = vmatpush3.msra.mxu1 %v406_v54  ;;  %v314_v61 = vand.u32 65535, %v807_v11 }
 0x249   :  { %v308_v19 = vsel %vm300_vm7, %v800_v5, 2147483647  ;;  %v309_v20 = vsel %vm301_vm8, %v803_v6, 2147483647  ;;  %625 = vmatprep.subr.mxu1 %v421_v55  ;;  %v330_v0 = vand.u32 65535, %v814_v17  ;;  %v417_v17 = vld [vmem:[%s1010_s5 + $0x88] sm:$0xff] }
 0x24a   :  { %vm344_vm9 = vcmp.lt.s32.totalorder %v308_v19, %v309_v20  ;;  %v820_v21 = vcvt.s32.f32 %v331_v18  ;;  %626 = vmatpush3.msra.mxu1 %v405_v56  ;;  %v316_v63 = vcvt.s32.f32 %v314_v61  ;;  %v401_v18 = vld [vmem:[%s1010_s5 + $0x8] sm:$0xff] }
 0x24b   :  { %v292_v22 = vpop.xlane.xlu1 %291  ;;  %v822_v23 = vsel %vm344_vm9, %v308_v19, %v309_v20  ;;  %627 = vmatprep.subr.mxu1 %v420_v57  ;;  %v416_v19 = vld [vmem:[%s1010_s5 + $0x80] sm:$0xff] }
 0x24c   :  { %vm302_vm10 = vcmp.eq.f32.partialorder %v279_v2, %v292_v22  ;;  %vm303_vm11 = vcmp.eq.f32.partialorder %v280_v3, %v292_v22  ;;  %334 = vmin.xlane.f32.xlu1 %v820_v21  ;;  %v347_v24 = vshra.s32 %v822_v23, 16  ;;  %628 = vmatpush3.msra.mxu1 %v404_v58  ;;  %v332_v3 = vcvt.s32.f32 %v330_v0  ;;  %v400_v20 = vld [vmem:[%s1010_s5] sm:$0xff] }
 0x24d   :  { %v310_v25 = vsel %vm302_vm10, %v800_v5, 2147483647  ;;  %v311_v26 = vsel %vm303_vm11, %v803_v6, 2147483647  ;;  %629 = vmatprep.subr.mxu1 %v419_v59  ;;  %v346_v4 = vand.u32 65535, %v822_v23 }
 0x24e   :  { %vm360_vm12 = vcmp.lt.s32.totalorder %v310_v25, %v311_v26  ;;  %v828_v27 = vcvt.s32.f32 %v347_v24  ;;  %630 = vmatpush3.msra.mxu1 %v403_v60 }
 0x24f   :  { %v830_v30 = vsel %vm360_vm12, %v310_v25, %v311_v26  ;;  %v348_v9 = vcvt.s32.f32 %v346_v4  ;;  %631 = vmatprep.subr.mxu1 %v418_v14 }
 0x250   :  { %350 = vmin.xlane.f32.xlu0 %v828_v27  ;;  %v363_v33 = vshra.s32 %v830_v30, 16  ;;  %v362_v10 = vand.u32 65535, %v830_v30 }
 0x252   :  { %v834_v34 = vcvt.s32.f32 %v363_v33  ;;  %v364_v13 = vcvt.s32.f32 %v362_v10 }
 0x254   :  { %366 = vmin.xlane.f32.xlu1 %v834_v34 }
 0x2d1   :  { %v319_v62 = vpop.xlane.xlu0 %318 }
 0x2d2   :  { %vm320_vm13 = vcmp.eq.f32.partialorder %v812_v15, %v319_v62  ;;  %v402_v15 = vld [vmem:[%s1010_s5 + $0x10] sm:$0xff] }
 0x2d3   :  { %v321_v1 = vsel %vm320_vm13, %v316_v63, inf  ;;  %632 = vmatpush3.msra.mxu1 %v402_v15 }
 0x2d4   :  { %322 = vmin.xlane.f32.xlu0 %v321_v1  ;;  %633 = vmatprep.subr.mxu1 %v417_v17 }
 0x2d5   :  { %v335_v2 = vpop.xlane.xlu1 %334  ;;  %634 = vmatpush3.msra.mxu1 %v401_v18 }
 0x2d6   :  { %vm336_vm14 = vcmp.eq.f32.partialorder %v820_v21, %v335_v2  ;;  %635 = vmatprep.subr.mxu1 %v416_v19  ;;  %v325_v21 = vcvt.f32.s32 %v319_v62  ;;  %v341_v24 = vcvt.f32.s32 %v335_v2 }
 0x2d7   :  { %v337_v7 = vsel %vm336_vm14, %v332_v3, inf  ;;  %636 = vmatpush3.msra.mxu1 %v400_v20 }
 0x2d8   :  { %338 = vmin.xlane.f32.xlu1 %v337_v7  ;;  %v326_v23 = vshll.u32 %v325_v21, 16  ;;  %v342_v33 = vshll.u32 %v341_v24, 16 }
 0x2d9   :  { %v351_v8 = vpop.xlane.xlu0 %350 }
 0x2da   :  { %vm352_vm15 = vcmp.eq.f32.partialorder %v828_v27, %v351_v8  ;;  %v357_v27 = vcvt.f32.s32 %v351_v8 }
 0x2db   :  { %v353_v11 = vsel %vm352_vm15, %v348_v9, inf }
 0x2dc   :  { %354 = vmin.xlane.f32.xlu0 %v353_v11  ;;  %v358_v37 = vshll.u32 %v357_v27, 16 }
 0x2dd   :  { %v367_v12 = vpop.xlane.xlu1 %366 }
 0x2de   :  { %vm368_vm1 = vcmp.eq.f32.partialorder %v834_v34, %v367_v12  ;;  %v373_v39 = vcvt.f32.s32 %v367_v12 }
 0x2df   :  { %v369_v16 = vsel %vm368_vm1, %v364_v13, inf }
 0x2e0   :  { %370 = vmin.xlane.f32.xlu1 %v369_v16  ;;  %v374_v43 = vshll.u32 %v373_v39, 16 }
 0x35d   :  { %v323_v22 = vpop.xlane.xlu0 %322 }
 0x35e   :  { %v324_v25 = vcvt.f32.s32 %v323_v22 }
 0x360   :  { %v327_v26 = vadd.s32 %v326_v23, %v324_v25 }
 0x361   :  { %v339_v30 = vpop.xlane.xlu1 %338 }
 0x362   :  { %vm376_vm3 = vcmp.eq.s32.totalorder %v800_v5, %v327_v26  ;;  %522 = vst.msk [vmem:[%s1011_s7] sm:$0xff] %vm521_vm2, %v327_v26  ;;  %v340_v34 = vcvt.f32.s32 %v339_v30  ;;  %vm377_vm4 = vcmp.eq.s32.totalorder %v803_v6, %v327_v26 }
 0x363   :  { %587 = vmatprep.mubr.msk.f32.mxu1 %vm377_vm4, %v686_v35 }
 0x364   :  { %v343_v36 = vadd.s32 %v342_v33, %v340_v34  ;;  %588 = vmatmul.mubr.msk.f32.vlgmr.msra.gmra.mxu1 %vm376_vm3, %v686_v35 }
 0x365   :  { %v355_v38 = vpop.xlane.xlu0 %354 }
 0x366   :  { %523 = vst.msk [vmem:[%s1011_s7 + $0x8] sm:$0xff] %vm521_vm2, %v343_v36  ;;  %v356_v40 = vcvt.f32.s32 %v355_v38  ;;  %vm379_vm5 = vcmp.eq.s32.totalorder %v803_v6, %v343_v36  ;;  %vm378_vm6 = vcmp.eq.s32.totalorder %v800_v5, %v343_v36 }
 0x367   :  { %589 = vmatprep.mubr.msk.f32.mxu1 %vm379_vm5, %v686_v35 }
 0x368   :  { %v359_v41 = vadd.s32 %v358_v37, %v356_v40  ;;  %590 = vmatmul.mubr.msk.f32.gmra.mxu1 %vm378_vm6, %v686_v35 }
 0x369   :  { %v371_v42 = vpop.xlane.xlu1 %370 }
 0x36a   :  { %524 = vst.msk [vmem:[%s1011_s7 + $0x10] sm:$0xff] %vm521_vm2, %v359_v41  ;;  %v372_v44 = vcvt.f32.s32 %v371_v42  ;;  %vm381_vm7 = vcmp.eq.s32.totalorder %v803_v6, %v359_v41  ;;  %vm380_vm8 = vcmp.eq.s32.totalorder %v800_v5, %v359_v41 }
 0x36b   :  { %591 = vmatprep.mubr.msk.f32.mxu1 %vm381_vm7, %v686_v35 }
 0x36c   :  { %v375_v45 = vadd.s32 %v374_v43, %v372_v44  ;;  %592 = vmatmul.mubr.msk.f32.gmra.mxu1 %vm380_vm8, %v686_v35 }
 0x36e   :  { %525 = vst.msk [vmem:[%s1011_s7 + $0x18] sm:$0xff] %vm521_vm2, %v375_v45  ;;  %vm383_vm9 = vcmp.eq.s32.totalorder %v803_v6, %v375_v45  ;;  %vm382_vm10 = vcmp.eq.s32.totalorder %v800_v5, %v375_v45 }
 0x36f   :  { %593 = vmatprep.mubr.msk.f32.mxu1 %vm383_vm9, %v686_v35 }
 0x370   :  { %594 = vmatmul.mubr.msk.f32.gmra.mxu1 %vm382_vm10, %v686_v35 }
 0x424   :  { %v637_v46 = vpop.f32.mrf.mxu1 }
 0x426   :  { %v638_v47 = vpop.f32.mrf.mxu1 }
 0x427   :  { %v639_v48 = vadd.f32 %v638_v47, %v637_v46 }
 0x428   :  { %v640_v49 = vpop.f32.mrf.mxu1 }
 0x429   :  { %517 = vst.msk [vmem:[%s1012_s6] sm:$0xff] %vm193_vm0, %v639_v48  ;;  %v526_v50 = vsub.f32 %v639_v48, %v783_v28 }
 0x42a   :  { %v641_v51 = vpop.f32.mrf.mxu1 }
 0x42b   :  { %v642_v52 = vadd.f32 %v641_v51, %v640_v49  ;;  %v530_v53 = vmul.f32 %v526_v50, %v526_v50 }
 0x42c   :  { %v643_v54 = vpop.f32.mrf.mxu1 }
 0x42d   :  { %518 = vst.msk [vmem:[%s1012_s6 + $0x8] sm:$0xff] %vm193_vm0, %v642_v52  ;;  %v527_v5 = vsub.f32 %v642_v52, %v785_v29  ;;  %v534_v6 = vsel %vm193_vm0, %v530_v53, 0.0 }
 0x42e   :  { %535 = vadd.xlane.f32.xlu0 %v534_v6  ;;  %v644_v55 = vpop.f32.mrf.mxu1 }
 0x42f   :  { %v645_v56 = vadd.f32 %v644_v55, %v643_v54  ;;  %v531_v57 = vmul.f32 %v527_v5, %v527_v5 }
 0x430   :  { %v646_v58 = vpop.f32.mrf.mxu1 }
 0x431   :  { %519 = vst.msk [vmem:[%s1012_s6 + $0x10] sm:$0xff] %vm193_vm0, %v645_v56  ;;  %v528_v28 = vsub.f32 %v645_v56, %v792_v32  ;;  %v537_v59 = vsel %vm193_vm0, %v531_v57, 0.0 }
 0x432   :  { %538 = vadd.xlane.f32.xlu1 %v537_v59  ;;  %v647_v60 = vpop.f32.mrf.mxu1 }
 0x433   :  { %v648_v61 = vadd.f32 %v647_v60, %v646_v58  ;;  %v532_v29 = vmul.f32 %v528_v28, %v528_v28 }
 0x435   :  { %520 = vst.msk [vmem:[%s1012_s6 + $0x18] sm:$0xff] %vm193_vm0, %v648_v61  ;;  %v529_v62 = vsub.f32 %v648_v61, %v790_v31  ;;  %v540_v63 = vsel %vm193_vm0, %v532_v29, 0.0 }
 0x436   :  { %541 = vadd.xlane.f32.xlu0 %v540_v63 }
 0x437   :  { %v533_v0 = vmul.f32 %v529_v62, %v529_v62 }
 0x439   :  { %v543_v1 = vsel %vm193_vm0, %v533_v0, 0.0 }
 0x43a   :  { %544 = vadd.xlane.f32.xlu1 %v543_v1 }
 0x4b7   :  { %v536_v32 = vpop.xlane.xlu0 %535 }
 0x4b8   :  { %546 = vst.msk [vmem:[%s1013_s8] sm:$0xff] %vm521_vm2, %v536_v32 }
 0x4bb   :  { %v539_v2 = vpop.xlane.xlu1 %538 }
 0x4bc   :  { %547 = vst.msk [vmem:[%s1013_s8 + $0x8] sm:$0xff] %vm521_vm2, %v539_v2 }
 0x4bf   :  { %v542_v31 = vpop.xlane.xlu0 %541 }
 0x4c0   :  { %548 = vst.msk [vmem:[%s1013_s8 + $0x10] sm:$0xff] %vm521_vm2, %v542_v31 }
 0x4c3   :  { %v545_v3 = vpop.xlane.xlu1 %544 }
 0x4c4   :  { %549 = vst.msk [vmem:[%s1013_s8 + $0x18] sm:$0xff] %vm521_vm2, %v545_v3 }

// kernel: tile.13
= control target key start
LH: loop header
LB: loop body
LE: loop exit
PB: predicated region body
PF: predicated region fallthrough
CT: control target
= control target key end

     0   :  { %s22_s0 = inlined_call_operand.vmem [shape: f32[64], index: 0, kind: input, shape index: {}]   ;;  %s23_s1 = inlined_call_operand.vmem [shape: f32[4,64], index: 1, kind: output, shape index: {}]  }
   0x1   :  { %v4_v0 = vld [vmem:[%s22_s0] ss:$0 sm:$0xff] }
   0x2   :  { %5 = vst [vmem:[%s23_s1] sm:$0xf] %v4_v0 }

// kernel: tile.14
= control target key start
LH: loop header
LB: loop body
LE: loop exit
PB: predicated region body
PF: predicated region fallthrough
CT: control target
= control target key end

     0   :  { %s7_s8 = smov 3  ;;  %vm9_vm0 = vcmask 523264   ;;  %s34_s9 = smov 64   ;;  %vm16_vm1 = vcmask 1048064   ;;  %s54_s0 = inlined_call_operand.vmem [shape: f32[4,64], index: 0, kind: input, shape index: {}]   ;;  %s55_s1 = inlined_call_operand.vmem [shape: f32[1,256], index: 1, kind: output, shape index: {}]  }
   0x1   :  { %v5_v0 = vld [vmem:[%s54_s0] sm:$0xf]  ;;  %s12_s0 = smov 3 }
   0x2   :  { %6 = vst [vmem:[#allocation1] sm:$0xf] %v5_v0 }
   0x9   :  { %v13_v1 = vld [vmem:[#allocation1 + $0x1] ss:$2 sm:%s12_s0]   ;;  %v8_v2 = vld [vmem:[#allocation1] ss:$2 sm:%s7_s8]  }
   0xa   :  { %14 = vrot.lane.b32.xlu0 %v13_v1, %s34_s9  ;;  %10 = vst.msk [vmem:[#allocation0] ss:$8 sm:$0x3] %vm9_vm0, %v8_v2  }
  0x7c   :  { %v15_v3 = vpop.permute.xlu0 %14  }
  0x7d   :  { %17 = vst.msk [vmem:[#allocation0] ss:$8 sm:$0x3] %vm16_vm1, %v15_v3  }
  0x84   :  { %v22_v4 = vld [vmem:[#allocation0] sm:$0x1]  ;;  %v27_v5 = vld [vmem:[#allocation0 + $0x8] sm:$0x1] }
  0x85   :  { %25 = vst [vmem:[%s55_s1] sm:$0x1] %v22_v4  ;;  %32 = vst [vmem:[%s55_s1 + $0x1] sm:$0x1] %v27_v5 }

// kernel: s_vqvae_forward.17
= control target key start
LH: loop header
LB: loop body
LE: loop exit
PB: predicated region body
PF: predicated region fallthrough
CT: control target
= control target key end

     0   :  { %vm204_vm0 = vcmask 261120   ;;  %s546_s1 = inlined_call_operand.vmem [shape: bf16[288,128], index: 1, kind: input, shape index: {}]   ;;  %s547_s0 = inlined_call_operand.vmem [shape: bf16[32,288], index: 0, kind: input, shape index: {}]   ;;  %s548_s2 = inlined_call_operand.vmem [shape: f32[1,128], index: 2, kind: input, shape index: {}]   ;;  %s549_s3 = inlined_call_operand.vmem [shape: bf16[32,128], index: 3, kind: output, shape index: {}]  }
   0x1   :  { %v419_v0 = vld [vmem:[%s546_s1 + $0x78] sm:$0xff]   ;;  %v421_v2 = vld [vmem:[%s546_s1 + $0x70] sm:$0xff]   ;;  %v423_v4 = vld [vmem:[%s546_s1 + $0x68] sm:$0xff]  }
   0x2   :  { %v420_v1 = vld [vmem:[%s546_s1 + $0x38] sm:$0xff]   ;;  %379 = vmatprep.subr.bf16.mxu0 %v419_v0  ;;  %v422_v3 = vld [vmem:[%s546_s1 + $0x30] sm:$0xff]   ;;  %v424_v5 = vld [vmem:[%s546_s1 + $0x28] sm:$0xff]  }
   0x3   :  { %380 = vmatpush3.bf16.msra.mxu0 %v420_v1  ;;  %v425_v6 = vld [vmem:[%s546_s1 + $0x60] sm:$0xff]   ;;  %v427_v8 = vld [vmem:[%s546_s1 + $0x58] sm:$0xff]   ;;  %v434_v10 = vld [vmem:[%s546_s1 + $0x88] sm:$0xff]  }
   0x4   :  { %381 = vmatprep.subr.bf16.mxu0 %v421_v2  ;;  %v426_v7 = vld [vmem:[%s546_s1 + $0x20] sm:$0xff]   ;;  %v428_v9 = vld [vmem:[%s546_s1 + $0x18] sm:$0xff]   ;;  %v429_v11 = vld [vmem:[%s546_s1 + $0x50] sm:$0xff]   ;;  %411 = vmatprep.subr.bf16.mxu1 %v434_v10 }
   0x5   :  { %v430_v12 = vld [vmem:[%s546_s1 + $0x10] sm:$0xff]   ;;  %v431_v13 = vld [vmem:[%s546_s1 + $0x48] sm:$0xff]   ;;  %412 = vmatpush3.bf16.msra.mxu1 %v434_v10  ;;  %v439_v15 = vld [vmem:[%s546_s1 + $0x80] sm:$0xff]  }
   0x6   :  { %v438_v14 = vld [vmem:[%s547_s0 + $0x4] ss:$12 sps:$4 sm:$0xff]   ;;  %v440_v16 = vld [vmem:[%s547_s0 + $0x8] ss:$12 sps:$4 sm:$0xff]   ;;  %413 = vmatprep.subr.bf16.mxu1 %v439_v15  ;;  %v441_v17 = vld [vmem:[%s547_s0 + $0x20] ss:$12 sps:$4 sm:$0xff]  }
   0x7   :  { %382 = vmatpush3.bf16.msra.mxu0 %v422_v3  ;;  %243 = vmatprep.mubr.bf16.mxu0 %v438_v14  ;;  %v432_v18 = vld [vmem:[%s546_s1 + $0x8] sm:$0xff]   ;;  %v433_v19 = vld [vmem:[%s546_s1 + $0x40] sm:$0xff]  }
   0x8   :  { %383 = vmatprep.subr.bf16.mxu0 %v423_v4  ;;  %415 = vmatprep.mubr.msk.bf16.mxu1 %vm204_vm0, %v440_v16  ;;  %v435_v20 = vld [vmem:[%s546_s1] sm:$0xff]   ;;  %v442_v22 = vld [vmem:[%s547_s0 + $0x1c] ss:$12 sps:$4 sm:$0xff]  }
   0x9   :  { %414 = vmatpush3.bf16.msra.mxu1 %v439_v15  ;;  %v436_v21 = vld [vmem:[%s547_s0] ss:$12 sps:$4 sm:$0xff]   ;;  %v444_v23 = vld [vmem:[%s547_s0 + $0x18] ss:$12 sps:$4 sm:$0xff]  }
   0xa   :  { %v333_v30 = vld [vmem:[%s548_s2] ss:$0 sm:$0xff] }
   0xb   :  { %384 = vmatpush3.bf16.msra.mxu0 %v424_v5 }
   0xc   :  { %385 = vmatprep.subr.bf16.mxu0 %v425_v6  ;;  %416 = vmatmul.mubr.msk.bf16.vlgmr.msra.gmra.mxu1 %vm204_vm0, %v441_v17 }
   0xf   :  { %386 = vmatpush3.bf16.msra.mxu0 %v426_v7 }
  0x10   :  { %387 = vmatprep.subr.bf16.mxu0 %v427_v8 }
  0x13   :  { %388 = vmatpush3.bf16.msra.mxu0 %v428_v9 }
  0x14   :  { %389 = vmatprep.subr.bf16.mxu0 %v429_v11 }
  0x17   :  { %390 = vmatpush3.bf16.msra.mxu0 %v430_v12 }
  0x18   :  { %391 = vmatprep.subr.bf16.mxu0 %v431_v13 }
  0x1b   :  { %392 = vmatpush3.bf16.msra.mxu0 %v432_v18 }
  0x1c   :  { %393 = vmatprep.subr.bf16.mxu0 %v433_v19 }
  0x1f   :  { %394 = vmatpush3.bf16.msra.mxu0 %v435_v20 }
  0x22   :  { %244 = vmatmul.mubr.bf16.vlgmr.msra.gmra.mxu0 %v436_v21 }
  0x23   :  { %251 = vmatprep.mubr.bf16.mxu0 %v442_v22 }
  0x2a   :  { %252 = vmatmul.mubr.bf16.gmra.mxu0 %v444_v23 }
  0xcc   :  { %v417_v24 = vpop.f32.mrf.mxu1 }
  0xce   :  { %v294_v26 = vpop.f32.mrf.mxu1 }
  0xd0   :  { %v418_v31 = vpop.f32.mrf.mxu1 }
  0xd2   :  { %v297_v36 = vpop.f32.mrf.mxu1 }
  0xe2   :  { %v395_v25 = vpop.f32.mrf.mxu0 }
  0xe4   :  { %v396_v27 = vpop.f32.mrf.mxu0 }
  0xe5   :  { %v397_v28 = vadd.f32 %v396_v27, %v395_v25 }
  0xe6   :  { %v398_v29 = vpop.f32.mrf.mxu0 }
  0xe7   :  { %v246_v34 = vadd.f32 %v397_v28, %v333_v30 }
  0xe8   :  { %v399_v32 = vpop.f32.mrf.mxu0 }
  0xe9   :  { %v400_v33 = vadd.f32 %v399_v32, %v398_v29  ;;  %v295_v39 = vadd.f32 %v294_v26, %v246_v34 }
  0xea   :  { %v401_v35 = vpop.f32.mrf.mxu0 }
  0xeb   :  { %v249_v37 = vadd.f32 %v400_v33, %v333_v30 }
  0xec   :  { %v402_v38 = vpop.f32.mrf.mxu0 }
  0xed   :  { %v403_v40 = vadd.f32 %v402_v38, %v401_v35  ;;  %v298_v41 = vadd.f32 %v297_v36, %v249_v37 }
  0xee   :  { %v404_v42 = vpop.f32.mrf.mxu0 }
  0xef   :  { %v371_v43 = vpack.c.bf16 %v298_v41, %v295_v39  ;;  %v254_v45 = vadd.f32 %v403_v40, %v333_v30 }
  0xf0   :  { %v405_v44 = vpop.f32.mrf.mxu0 }
  0xf1   :  { %372 = vst [vmem:[%s549_s3] sm:$0xff] %v371_v43   ;;  %v406_v46 = vadd.f32 %v405_v44, %v404_v42  ;;  %v303_v48 = vadd.f32 %v417_v24, %v254_v45 }
  0xf3   :  { %v257_v47 = vadd.f32 %v406_v46, %v333_v30 }
  0xf5   :  { %v306_v49 = vadd.f32 %v418_v31, %v257_v47 }
  0xf7   :  { %v376_v50 = vpack.c.bf16 %v306_v49, %v303_v48 }
  0xf9   :  { %378 = vst [vmem:[%s549_s3 + $0x8] sm:$0xff] %v376_v50  }

// kernel: s_vqvae_forward.20
= control target key start
LH: loop header
LB: loop body
LE: loop exit
PB: predicated region body
PF: predicated region fallthrough
CT: control target
= control target key end

     0   :  { %v1731_v50 = vmov 0   ;;  %s2297_s1 = inlined_call_operand.vmem [shape: bf16[1152,256], index: 1, kind: input, shape index: {}]   ;;  %s2298_s0 = inlined_call_operand.vmem [shape: bf16[32,1152], index: 0, kind: input, shape index: {}]   ;;  %s2299_s2 = inlined_call_operand.vmem [shape: f32[1,256], index: 2, kind: input, shape index: {}]   ;;  %s2300_s3 = inlined_call_operand.vmem [shape: bf16[32,256], index: 3, kind: output, shape index: {}]  }
   0x1   :  { %v1515_v0 = vld [vmem:[%s2297_s1 + $0x74] ss:$8 sps:$4 sm:$0xff]   ;;  %v1519_v2 = vld [vmem:[%s2297_s1 + $0x70] ss:$8 sps:$4 sm:$0xff]   ;;  %v1521_v4 = vld [vmem:[%s2297_s1 + $0x64] ss:$8 sps:$4 sm:$0xff]  }
   0x2   :  { %v1517_v1 = vld [vmem:[%s2297_s1 + $0x174] ss:$8 sps:$4 sm:$0xff]   ;;  %1023 = vmatprep.subr.bf16.mxu0 %v1515_v0  ;;  %v1520_v3 = vld [vmem:[%s2297_s1 + $0x170] ss:$8 sps:$4 sm:$0xff]   ;;  %v1523_v5 = vld [vmem:[%s2297_s1 + $0x164] ss:$8 sps:$4 sm:$0xff]  }
   0x3   :  { %1076 = vmatprep.subr.bf16.mxu1 %v1517_v1  ;;  %1024 = vmatpush1.bf16.msra.mxu0 %v1519_v2  ;;  %v1525_v6 = vld [vmem:[%s2297_s1 + $0x60] ss:$8 sps:$4 sm:$0xff]   ;;  %v1527_v8 = vld [vmem:[%s2297_s1 + $0x54] ss:$8 sps:$4 sm:$0xff]   ;;  %v1531_v10 = vld [vmem:[%s2297_s1 + $0x50] ss:$8 sps:$4 sm:$0xff]  }
   0x4   :  { %1077 = vmatpush1.bf16.msra.mxu1 %v1520_v3  ;;  %1025 = vmatprep.subr.bf16.mxu0 %v1521_v4  ;;  %v1526_v7 = vld [vmem:[%s2297_s1 + $0x160] ss:$8 sps:$4 sm:$0xff]   ;;  %v1529_v9 = vld [vmem:[%s2297_s1 + $0x154] ss:$8 sps:$4 sm:$0xff]   ;;  %v1532_v11 = vld [vmem:[%s2297_s1 + $0x150] ss:$8 sps:$4 sm:$0xff]  }
   0x5   :  { %1078 = vmatprep.subr.bf16.mxu1 %v1523_v5  ;;  %v1533_v12 = vld [vmem:[%s2297_s1 + $0x44] ss:$8 sps:$4 sm:$0xff]   ;;  %v1537_v14 = vld [vmem:[%s2297_s1 + $0x40] ss:$8 sps:$4 sm:$0xff]   ;;  %v1539_v16 = vld [vmem:[%s2297_s1 + $0x34] ss:$8 sps:$4 sm:$0xff]  }
   0x6   :  { %v1535_v13 = vld [vmem:[%s2297_s1 + $0x144] ss:$8 sps:$4 sm:$0xff]   ;;  %v1538_v15 = vld [vmem:[%s2297_s1 + $0x140] ss:$8 sps:$4 sm:$0xff]   ;;  %v1541_v17 = vld [vmem:[%s2297_s1 + $0x134] ss:$8 sps:$4 sm:$0xff]  }
   0x7   :  { %1026 = vmatpush1.bf16.msra.mxu0 %v1525_v6  ;;  %v1543_v18 = vld [vmem:[%s2297_s1 + $0x30] ss:$8 sps:$4 sm:$0xff]   ;;  %v1545_v20 = vld [vmem:[%s2297_s1 + $0x24] ss:$8 sps:$4 sm:$0xff]   ;;  %v1549_v22 = vld [vmem:[%s2297_s1 + $0x20] ss:$8 sps:$4 sm:$0xff]  }
   0x8   :  { %1079 = vmatpush1.bf16.msra.mxu1 %v1526_v7  ;;  %1027 = vmatprep.subr.bf16.mxu0 %v1527_v8  ;;  %v1544_v19 = vld [vmem:[%s2297_s1 + $0x130] ss:$8 sps:$4 sm:$0xff]   ;;  %v1547_v21 = vld [vmem:[%s2297_s1 + $0x124] ss:$8 sps:$4 sm:$0xff]   ;;  %v1550_v23 = vld [vmem:[%s2297_s1 + $0x120] ss:$8 sps:$4 sm:$0xff]  }
   0x9   :  { %1080 = vmatprep.subr.bf16.mxu1 %v1529_v9  ;;  %v1551_v24 = vld [vmem:[%s2297_s1 + $0x14] ss:$8 sps:$4 sm:$0xff]   ;;  %v1555_v26 = vld [vmem:[%s2297_s1 + $0x10] ss:$8 sps:$4 sm:$0xff]   ;;  %v1557_v28 = vld [vmem:[%s2297_s1 + $0x4] ss:$8 sps:$4 sm:$0xff]  }
   0xa   :  { %v1553_v25 = vld [vmem:[%s2297_s1 + $0x114] ss:$8 sps:$4 sm:$0xff]   ;;  %v1556_v27 = vld [vmem:[%s2297_s1 + $0x110] ss:$8 sps:$4 sm:$0xff]   ;;  %v1559_v29 = vld [vmem:[%s2297_s1 + $0x104] ss:$8 sps:$4 sm:$0xff]  }
   0xb   :  { %1028 = vmatpush1.bf16.msra.mxu0 %v1531_v10  ;;  %v1561_v30 = vld [vmem:[%s2297_s1] ss:$8 sps:$4 sm:$0xff]   ;;  %v1563_v32 = vld [vmem:[%s2297_s1 + $0xf4] ss:$8 sps:$4 sm:$0xff]   ;;  %v1567_v34 = vld [vmem:[%s2297_s1 + $0xf0] ss:$8 sps:$4 sm:$0xff]  }
   0xc   :  { %1081 = vmatpush1.bf16.msra.mxu1 %v1532_v11  ;;  %1029 = vmatprep.subr.bf16.mxu0 %v1533_v12  ;;  %v1562_v31 = vld [vmem:[%s2297_s1 + $0x100] ss:$8 sps:$4 sm:$0xff]   ;;  %v1565_v33 = vld [vmem:[%s2297_s1 + $0x1f4] ss:$8 sps:$4 sm:$0xff]   ;;  %v1568_v35 = vld [vmem:[%s2297_s1 + $0x1f0] ss:$8 sps:$4 sm:$0xff]  }
   0xd   :  { %1082 = vmatprep.subr.bf16.mxu1 %v1535_v13  ;;  %v1569_v36 = vld [vmem:[%s2297_s1 + $0xe4] ss:$8 sps:$4 sm:$0xff]   ;;  %v1573_v38 = vld [vmem:[%s2297_s1 + $0xe0] ss:$8 sps:$4 sm:$0xff]   ;;  %v1575_v40 = vld [vmem:[%s2297_s1 + $0xd4] ss:$8 sps:$4 sm:$0xff]  }
   0xe   :  { %v1571_v37 = vld [vmem:[%s2297_s1 + $0x1e4] ss:$8 sps:$4 sm:$0xff]   ;;  %v1574_v39 = vld [vmem:[%s2297_s1 + $0x1e0] ss:$8 sps:$4 sm:$0xff]   ;;  %v1577_v41 = vld [vmem:[%s2297_s1 + $0x1d4] ss:$8 sps:$4 sm:$0xff]  }
   0xf   :  { %1030 = vmatpush1.bf16.msra.mxu0 %v1537_v14  ;;  %v1579_v42 = vld [vmem:[%s2297_s1 + $0xd0] ss:$8 sps:$4 sm:$0xff]   ;;  %v1581_v44 = vld [vmem:[%s2297_s1 + $0xc4] ss:$8 sps:$4 sm:$0xff]   ;;  %v1585_v46 = vld [vmem:[%s2297_s1 + $0xc0] ss:$8 sps:$4 sm:$0xff]  }
  0x10   :  { %1083 = vmatpush1.bf16.msra.mxu1 %v1538_v15  ;;  %1031 = vmatprep.subr.bf16.mxu0 %v1539_v16  ;;  %v1580_v43 = vld [vmem:[%s2297_s1 + $0x1d0] ss:$8 sps:$4 sm:$0xff]   ;;  %v1583_v45 = vld [vmem:[%s2297_s1 + $0x1c4] ss:$8 sps:$4 sm:$0xff]   ;;  %v1586_v47 = vld [vmem:[%s2297_s1 + $0x1c0] ss:$8 sps:$4 sm:$0xff]  }
  0x11   :  { %1084 = vmatprep.subr.bf16.mxu1 %v1541_v17  ;;  %v15_v48 = vld [vmem:[%s2298_s0] sm:$0xff]  ;;  %v16_v52 = vld [vmem:[%s2298_s0 + $0x8] sm:$0xff]  ;;  %v1587_v54 = vld [vmem:[%s2297_s1 + $0xb4] ss:$8 sps:$4 sm:$0xff]  }
  0x12   :  { %v20_v49 = vld [vmem:[%s2298_s0 + $0x24] sm:$0xff]  ;;  %v35_v51 = vmax.bf16 %v1731_v50, %v15_v48  ;;  %v21_v53 = vld [vmem:[%s2298_s0 + $0x2c] sm:$0xff]  ;;  %v36_v56 = vmax.bf16 %v1731_v50, %v16_v52  ;;  %v1589_v58 = vld [vmem:[%s2297_s1 + $0x1b4] ss:$8 sps:$4 sm:$0xff]  }
  0x13   :  { %1032 = vmatpush1.bf16.msra.mxu0 %v1543_v18  ;;  %v40_v55 = vmax.bf16 %v1731_v50, %v20_v49  ;;  %v41_v57 = vmax.bf16 %v1731_v50, %v21_v53  ;;  %v1591_v61 = vld [vmem:[%s2297_s1 + $0xb0] ss:$8 sps:$4 sm:$0xff]   ;;  %v1593_v63 = vld [vmem:[%s2297_s1 + $0xa4] ss:$8 sps:$4 sm:$0xff]   ;;  %v1597_v1 = vld [vmem:[%s2297_s1 + $0xa0] ss:$8 sps:$4 sm:$0xff]  }
  0x14   :  { %1085 = vmatpush1.bf16.msra.mxu1 %v1544_v19  ;;  %1033 = vmatprep.subr.bf16.mxu0 %v1545_v20  ;;  %v1592_v62 = vld [vmem:[%s2297_s1 + $0x1b0] ss:$8 sps:$4 sm:$0xff]   ;;  %v1595_v0 = vld [vmem:[%s2297_s1 + $0x1a4] ss:$8 sps:$4 sm:$0xff]   ;;  %v1598_v2 = vld [vmem:[%s2297_s1 + $0x1a0] ss:$8 sps:$4 sm:$0xff]  }
  0x15   :  { %1086 = vmatprep.subr.bf16.mxu1 %v1547_v21  ;;  %v1329_v59 = vcombine.high %v35_v51, %v40_v55  ;;  %v1331_v60 = vcombine.high %v36_v56, %v41_v57  ;;  %v1599_v3 = vld [vmem:[%s2297_s1 + $0x94] ss:$8 sps:$4 sm:$0xff]   ;;  %v1603_v5 = vld [vmem:[%s2297_s1 + $0x90] ss:$8 sps:$4 sm:$0xff]   ;;  %v1605_v7 = vld [vmem:[%s2297_s1 + $0x84] ss:$8 sps:$4 sm:$0xff]   ;;  %v1328_v13 = vcombine.low %v35_v51, %v40_v55  ;;  %v1330_v14 = vcombine.low %v36_v56, %v41_v57 }
  0x16   :  { %v1601_v4 = vld [vmem:[%s2297_s1 + $0x194] ss:$8 sps:$4 sm:$0xff]   ;;  %v1604_v6 = vld [vmem:[%s2297_s1 + $0x190] ss:$8 sps:$4 sm:$0xff]   ;;  %v1607_v8 = vld [vmem:[%s2297_s1 + $0x184] ss:$8 sps:$4 sm:$0xff]  }
  0x17   :  { %1034 = vmatpush1.bf16.msra.mxu0 %v1549_v22  ;;  %1055 = vmatprep.mubr.bf16.mxu0 %v1329_v59  ;;  %v1609_v9 = vld [vmem:[%s2297_s1 + $0x80] ss:$8 sps:$4 sm:$0xff]   ;;  %v1613_v11 = vld [vmem:[%s2297_s1 + $0x274] ss:$8 sps:$4 sm:$0xff]   ;;  %v1611_v15 = vld [vmem:[%s2297_s1 + $0x270] ss:$8 sps:$4 sm:$0xff]  }
  0x18   :  { %1087 = vmatpush1.bf16.msra.mxu1 %v1550_v23  ;;  %1035 = vmatprep.subr.bf16.mxu0 %v1551_v24  ;;  %v1610_v10 = vld [vmem:[%s2297_s1 + $0x180] ss:$8 sps:$4 sm:$0xff]   ;;  %v1616_v12 = vld [vmem:[%s2297_s1 + $0x374] ss:$8 sps:$4 sm:$0xff]   ;;  %v1614_v16 = vld [vmem:[%s2297_s1 + $0x370] ss:$8 sps:$4 sm:$0xff]  }
  0x19   :  { %1088 = vmatprep.subr.bf16.mxu1 %v1553_v25  ;;  %1108 = vmatprep.mubr.bf16.mxu1 %v1331_v60  ;;  %v1619_v17 = vld [vmem:[%s2297_s1 + $0x264] ss:$8 sps:$4 sm:$0xff]   ;;  %v1617_v19 = vld [vmem:[%s2297_s1 + $0x260] ss:$8 sps:$4 sm:$0xff]   ;;  %v1625_v21 = vld [vmem:[%s2297_s1 + $0x254] ss:$8 sps:$4 sm:$0xff]  }
  0x1a   :  { %v1622_v18 = vld [vmem:[%s2297_s1 + $0x364] ss:$8 sps:$4 sm:$0xff]   ;;  %v1620_v20 = vld [vmem:[%s2297_s1 + $0x360] ss:$8 sps:$4 sm:$0xff]   ;;  %v1628_v22 = vld [vmem:[%s2297_s1 + $0x354] ss:$8 sps:$4 sm:$0xff]  }
  0x1b   :  { %1036 = vmatpush1.bf16.msra.mxu0 %v1555_v26  ;;  %v1623_v23 = vld [vmem:[%s2297_s1 + $0x250] ss:$8 sps:$4 sm:$0xff]   ;;  %v1631_v25 = vld [vmem:[%s2297_s1 + $0x244] ss:$8 sps:$4 sm:$0xff]   ;;  %v1649_v49 = vld [vmem:[%s2297_s1 + $0x214] ss:$8 sps:$4 sm:$0xff]  }
  0x1c   :  { %1089 = vmatpush1.bf16.msra.mxu1 %v1556_v27  ;;  %1037 = vmatprep.subr.bf16.mxu0 %v1557_v28  ;;  %v1626_v24 = vld [vmem:[%s2297_s1 + $0x350] ss:$8 sps:$4 sm:$0xff]   ;;  %v1634_v26 = vld [vmem:[%s2297_s1 + $0x344] ss:$8 sps:$4 sm:$0xff]   ;;  %v1629_v27 = vld [vmem:[%s2297_s1 + $0x240] ss:$8 sps:$4 sm:$0xff]  }
  0x1d   :  { %1090 = vmatprep.subr.bf16.mxu1 %v1559_v29  ;;  %v1632_v28 = vld [vmem:[%s2297_s1 + $0x340] ss:$8 sps:$4 sm:$0xff]   ;;  %v1652_v51 = vld [vmem:[%s2297_s1 + $0x314] ss:$8 sps:$4 sm:$0xff]   ;;  %v1647_v52 = vld [vmem:[%s2297_s1 + $0x210] ss:$8 sps:$4 sm:$0xff]  }
  0x1e   :  { %v25_v29 = vld [vmem:[%s2298_s0 + $0x48] sm:$0xff]  ;;  %v1650_v53 = vld [vmem:[%s2297_s1 + $0x310] ss:$8 sps:$4 sm:$0xff]  }
  0x1f   :  { %1038 = vmatpush1.bf16.msra.mxu0 %v1561_v30  ;;  %v30_v30 = vld [vmem:[%s2298_s0 + $0x6c] sm:$0xff]  ;;  %v22_v57 = vld [vmem:[%s2298_s0 + $0x34] sm:$0xff] }
  0x20   :  { %1091 = vmatpush1.bf16.msra.mxu1 %v1562_v31  ;;  %1039 = vmatprep.subr.bf16.mxu0 %v1563_v32  ;;  %v1637_v31 = vld [vmem:[%s2297_s1 + $0x234] ss:$8 sps:$4 sm:$0xff]   ;;  %v1658_v55 = vld [vmem:[%s2297_s1 + $0x304] ss:$8 sps:$4 sm:$0xff]   ;;  %v2079_v60 = vmax.bf16 %v1731_v50, %v22_v57 }
  0x21   :  { %1092 = vmatprep.subr.bf16.mxu1 %v1565_v33  ;;  %v1640_v32 = vld [vmem:[%s2297_s1 + $0x334] ss:$8 sps:$4 sm:$0xff]   ;;  %v45_v33 = vmax.bf16 %v1731_v50, %v25_v29  ;;  %v1718_v57 = vld [vmem:[%s2297_s1 + $0x444] ss:$8 sps:$4 sm:$0xff]  }
  0x22   :  { %v17_v56 = vld [vmem:[%s2298_s0 + $0x10] sm:$0xff] }
  0x23   :  { %1040 = vmatpush2.bf16.msra.mxu0 %v1567_v34  ;;  %v50_v34 = vmax.bf16 %v1731_v50, %v30_v30  ;;  %v2076_v59 = vmax.bf16 %v1731_v50, %v17_v56  ;;  %v1700_v29 = vld [vmem:[%s2297_s1 + $0x394] ss:$8 sps:$4 sm:$0xff]   ;;  %v1695_v30 = vld [vmem:[%s2297_s1 + $0x290] ss:$8 sps:$4 sm:$0xff]  }
  0x24   :  { %1093 = vmatpush2.bf16.msra.mxu1 %v1568_v35  ;;  %1041 = vmatprep.subr.bf16.mxu0 %v1569_v36  ;;  %v1635_v35 = vld [vmem:[%s2297_s1 + $0x230] ss:$8 sps:$4 sm:$0xff]  }
  0x25   :  { %1094 = vmatprep.subr.bf16.mxu1 %v1571_v37  ;;  %v1638_v36 = vld [vmem:[%s2297_s1 + $0x330] ss:$8 sps:$4 sm:$0xff]   ;;  %v1338_v37 = vcombine.high %v45_v33, %v50_v34 }
  0x26   :  { %v1713_v56 = vld [vmem:[%s2297_s1 + $0x450] ss:$8 sps:$4 sm:$0xff]  }
  0x27   :  { %1042 = vmatpush2.bf16.msra.mxu0 %v1573_v38  ;;  %v1337_v38 = vcombine.low %v45_v33, %v50_v34  ;;  %v1706_v33 = vld [vmem:[%s2297_s1 + $0x384] ss:$8 sps:$4 sm:$0xff]   ;;  %v27_v34 = vld [vmem:[%s2298_s0 + $0x58] sm:$0xff] }
  0x28   :  { %1095 = vmatpush2.bf16.msra.mxu1 %v1574_v39  ;;  %1043 = vmatprep.subr.bf16.mxu0 %v1575_v40  ;;  %v26_v39 = vld [vmem:[%s2298_s0 + $0x50] sm:$0xff] }
  0x29   :  { %1096 = vmatprep.subr.bf16.mxu1 %v1577_v41  ;;  %v31_v40 = vld [vmem:[%s2298_s0 + $0x74] sm:$0xff]  ;;  %v1643_v41 = vld [vmem:[%s2297_s1 + $0x224] ss:$8 sps:$4 sm:$0xff]  }
  0x2b   :  { %1044 = vmatpush2.bf16.msra.mxu0 %v1579_v42  ;;  %v46_v42 = vmax.bf16 %v1731_v50, %v26_v39  ;;  %v1704_v39 = vld [vmem:[%s2297_s1 + $0x380] ss:$8 sps:$4 sm:$0xff]  }
  0x2c   :  { %1097 = vmatpush2.bf16.msra.mxu1 %v1580_v43  ;;  %1045 = vmatprep.subr.bf16.mxu0 %v1581_v44  ;;  %v51_v43 = vmax.bf16 %v1731_v50, %v31_v40  ;;  %v1646_v44 = vld [vmem:[%s2297_s1 + $0x324] ss:$8 sps:$4 sm:$0xff]   ;;  %v1709_v40 = vld [vmem:[%s2297_s1 + $0x474] ss:$8 sps:$4 sm:$0xff]  }
  0x2d   :  { %1098 = vmatprep.subr.bf16.mxu1 %v1583_v45 }
  0x2e   :  { %v1340_v45 = vcombine.high %v46_v42, %v51_v43  ;;  %v1339_v48 = vcombine.low %v46_v42, %v51_v43 }
  0x2f   :  { %1046 = vmatpush2.bf16.msra.mxu0 %v1585_v46  ;;  %v1641_v46 = vld [vmem:[%s2297_s1 + $0x220] ss:$8 sps:$4 sm:$0xff]  }
  0x30   :  { %1099 = vmatpush2.bf16.msra.mxu1 %v1586_v47  ;;  %1047 = vmatprep.subr.bf16.mxu0 %v1587_v54  ;;  %v1644_v47 = vld [vmem:[%s2297_s1 + $0x320] ss:$8 sps:$4 sm:$0xff]   ;;  %v1655_v54 = vld [vmem:[%s2297_s1 + $0x204] ss:$8 sps:$4 sm:$0xff]  }
  0x31   :  { %1100 = vmatprep.subr.bf16.mxu1 %v1589_v58  ;;  %v18_v58 = vld [vmem:[%s2298_s0 + $0x18] sm:$0xff] }
  0x33   :  { %1048 = vmatpush2.bf16.msra.mxu0 %v1591_v61  ;;  %v23_v61 = vld [vmem:[%s2298_s0 + $0x3c] sm:$0xff] }
  0x34   :  { %1101 = vmatpush2.bf16.msra.mxu1 %v1592_v62  ;;  %1049 = vmatprep.subr.bf16.mxu0 %v1593_v63  ;;  %v2085_v62 = vmax.bf16 %v1731_v50, %v18_v58  ;;  %v2088_v63 = vmax.bf16 %v1731_v50, %v23_v61  ;;  %v1716_v58 = vld [vmem:[%s2297_s1 + $0x440] ss:$8 sps:$4 sm:$0xff]   ;;  %v1724_v61 = vld [vmem:[%s2297_s1 + $0x424] ss:$8 sps:$4 sm:$0xff]  }
  0x35   :  { %1102 = vmatprep.subr.bf16.mxu1 %v1595_v0  ;;  %v1333_v0 = vcombine.high %v2076_v59, %v2079_v60 }
  0x37   :  { %1050 = vmatpush2.bf16.msra.mxu0 %v1597_v1  ;;  %v1653_v1 = vld [vmem:[%s2297_s1 + $0x200] ss:$8 sps:$4 sm:$0xff]  }
  0x38   :  { %1103 = vmatpush2.bf16.msra.mxu1 %v1598_v2  ;;  %1051 = vmatprep.subr.bf16.mxu0 %v1599_v3  ;;  %v1656_v2 = vld [vmem:[%s2297_s1 + $0x300] ss:$8 sps:$4 sm:$0xff]   ;;  %v1335_v3 = vcombine.high %v2085_v62, %v2088_v63 }
  0x39   :  { %1104 = vmatprep.subr.bf16.mxu1 %v1601_v4  ;;  %v1661_v4 = vld [vmem:[%s2297_s1 + $0x2f4] ss:$8 sps:$4 sm:$0xff]  }
  0x3b   :  { %1052 = vmatpush2.bf16.msra.mxu0 %v1603_v5  ;;  %v1664_v5 = vld [vmem:[%s2297_s1 + $0x3f4] ss:$8 sps:$4 sm:$0xff]  }
  0x3c   :  { %1105 = vmatpush2.bf16.msra.mxu1 %v1604_v6  ;;  %1053 = vmatprep.subr.bf16.mxu0 %v1605_v7  ;;  %v1659_v6 = vld [vmem:[%s2297_s1 + $0x2f0] ss:$8 sps:$4 sm:$0xff]  }
  0x3d   :  { %1106 = vmatprep.subr.bf16.mxu1 %v1607_v8  ;;  %v1662_v7 = vld [vmem:[%s2297_s1 + $0x3f0] ss:$8 sps:$4 sm:$0xff]   ;;  %v1667_v8 = vld [vmem:[%s2297_s1 + $0x2e4] ss:$8 sps:$4 sm:$0xff]  }
  0x3f   :  { %1054 = vmatpush2.bf16.msra.mxu0 %v1609_v9  ;;  %v1670_v9 = vld [vmem:[%s2297_s1 + $0x3e4] ss:$8 sps:$4 sm:$0xff]  }
  0x40   :  { %1107 = vmatpush2.bf16.msra.mxu1 %v1610_v10  ;;  %1129 = vmatprep.subr.bf16.mxu0 %v1613_v11  ;;  %v1665_v10 = vld [vmem:[%s2297_s1 + $0x2e0] ss:$8 sps:$4 sm:$0xff]  }
  0x41   :  { %1182 = vmatprep.subr.bf16.mxu1 %v1616_v12  ;;  %v1668_v11 = vld [vmem:[%s2297_s1 + $0x3e0] ss:$8 sps:$4 sm:$0xff]   ;;  %v1673_v12 = vld [vmem:[%s2297_s1 + $0x2d4] ss:$8 sps:$4 sm:$0xff]  }
  0x42   :  { %1056 = vmatmul.mubr.bf16.vlgmr.msra.gmra.mxu0 %v1328_v13  ;;  %v1676_v13 = vld [vmem:[%s2297_s1 + $0x3d4] ss:$8 sps:$4 sm:$0xff]  }
  0x43   :  { %1109 = vmatmul.mubr.bf16.vlgmr.msra.gmra.mxu1 %v1330_v14  ;;  %1130 = vmatpush1.bf16.msra.mxu0 %v1611_v15  ;;  %v1671_v14 = vld [vmem:[%s2297_s1 + $0x2d0] ss:$8 sps:$4 sm:$0xff]  }
  0x44   :  { %1183 = vmatpush1.bf16.msra.mxu1 %v1614_v16  ;;  %1131 = vmatprep.subr.bf16.mxu0 %v1619_v17  ;;  %v1674_v15 = vld [vmem:[%s2297_s1 + $0x3d0] ss:$8 sps:$4 sm:$0xff]   ;;  %v1679_v16 = vld [vmem:[%s2297_s1 + $0x2c4] ss:$8 sps:$4 sm:$0xff]  }
  0x45   :  { %1184 = vmatprep.subr.bf16.mxu1 %v1622_v18  ;;  %1065 = vmatprep.mubr.bf16.mxu0 %v1338_v37  ;;  %v1682_v17 = vld [vmem:[%s2297_s1 + $0x3c4] ss:$8 sps:$4 sm:$0xff]   ;;  %v1677_v18 = vld [vmem:[%s2297_s1 + $0x2c0] ss:$8 sps:$4 sm:$0xff]  }
  0x46   :  { %1118 = vmatprep.mubr.bf16.mxu1 %v1340_v45  ;;  %v33_v37 = vld [vmem:[%s2298_s0 + $0x84] sm:$0xff]  ;;  %v1332_v45 = vcombine.low %v2076_v59, %v2079_v60  ;;  %v1721_v59 = vld [vmem:[%s2297_s1 + $0x434] ss:$8 sps:$4 sm:$0xff]   ;;  %v1719_v60 = vld [vmem:[%s2297_s1 + $0x430] ss:$8 sps:$4 sm:$0xff]  }
  0x47   :  { %1132 = vmatpush1.bf16.msra.mxu0 %v1617_v19  ;;  %v1680_v19 = vld [vmem:[%s2297_s1 + $0x3c0] ss:$8 sps:$4 sm:$0xff]  }
  0x48   :  { %1185 = vmatpush1.bf16.msra.mxu1 %v1620_v20  ;;  %1133 = vmatprep.subr.bf16.mxu0 %v1625_v21  ;;  %v1685_v20 = vld [vmem:[%s2297_s1 + $0x2b4] ss:$8 sps:$4 sm:$0xff]  }
  0x49   :  { %1186 = vmatprep.subr.bf16.mxu1 %v1628_v22  ;;  %v1688_v21 = vld [vmem:[%s2297_s1 + $0x3b4] ss:$8 sps:$4 sm:$0xff]   ;;  %v1683_v22 = vld [vmem:[%s2297_s1 + $0x2b0] ss:$8 sps:$4 sm:$0xff]  }
  0x4a   :  { %1066 = vmatmul.mubr.bf16.gmra.mxu0 %v1337_v38  ;;  %v1701_v38 = vld [vmem:[%s2297_s1 + $0x280] ss:$8 sps:$4 sm:$0xff]  }
  0x4b   :  { %1134 = vmatpush1.bf16.msra.mxu0 %v1623_v23  ;;  %1119 = vmatmul.mubr.bf16.gmra.mxu1 %v1339_v48  ;;  %v1686_v23 = vld [vmem:[%s2297_s1 + $0x3b0] ss:$8 sps:$4 sm:$0xff]   ;;  %v1712_v48 = vld [vmem:[%s2297_s1 + $0x464] ss:$8 sps:$4 sm:$0xff]  }
  0x4c   :  { %1187 = vmatpush1.bf16.msra.mxu1 %v1626_v24  ;;  %1135 = vmatprep.subr.bf16.mxu0 %v1631_v25  ;;  %v1691_v24 = vld [vmem:[%s2297_s1 + $0x2a4] ss:$8 sps:$4 sm:$0xff]  }
  0x4d   :  { %1188 = vmatprep.subr.bf16.mxu1 %v1634_v26  ;;  %1161 = vmatprep.mubr.bf16.mxu0 %v1333_v0  ;;  %v1694_v25 = vld [vmem:[%s2297_s1 + $0x3a4] ss:$8 sps:$4 sm:$0xff]   ;;  %v1689_v26 = vld [vmem:[%s2297_s1 + $0x2a0] ss:$8 sps:$4 sm:$0xff]   ;;  %v1725_v0 = vld [vmem:[%s2297_s1 + $0x410] ss:$8 sps:$4 sm:$0xff]  }
  0x4e   :  { %1214 = vmatprep.mubr.bf16.mxu1 %v1335_v3  ;;  %v29_v3 = vld [vmem:[%s2298_s0 + $0x68] sm:$0xf] }
  0x4f   :  { %1136 = vmatpush1.bf16.msra.mxu0 %v1629_v27  ;;  %v1692_v27 = vld [vmem:[%s2297_s1 + $0x3a0] ss:$8 sps:$4 sm:$0xff]  }
  0x50   :  { %1189 = vmatpush1.bf16.msra.mxu1 %v1632_v28  ;;  %1137 = vmatprep.subr.bf16.mxu0 %v1637_v31  ;;  %v1697_v28 = vld [vmem:[%s2297_s1 + $0x294] ss:$8 sps:$4 sm:$0xff]   ;;  %v1698_v31 = vld [vmem:[%s2297_s1 + $0x390] ss:$8 sps:$4 sm:$0xff]  }
  0x51   :  { %1190 = vmatprep.subr.bf16.mxu1 %v1640_v32  ;;  %v1703_v32 = vld [vmem:[%s2297_s1 + $0x284] ss:$8 sps:$4 sm:$0xff]  }
  0x53   :  { %1138 = vmatpush1.bf16.msra.mxu0 %v1635_v35  ;;  %v32_v35 = vld [vmem:[%s2298_s0 + $0x7c] sm:$0xff] }
  0x54   :  { %1191 = vmatpush1.bf16.msra.mxu1 %v1638_v36  ;;  %1139 = vmatprep.subr.bf16.mxu0 %v1643_v41  ;;  %v28_v36 = vld [vmem:[%s2298_s0 + $0x60] sm:$0xff]  ;;  %v47_v41 = vmax.bf16 %v1731_v50, %v27_v34  ;;  %v52_v42 = vmax.bf16 %v1731_v50, %v32_v35 }
  0x55   :  { %1192 = vmatprep.subr.bf16.mxu1 %v1646_v44  ;;  %v48_v43 = vmax.bf16 %v1731_v50, %v28_v36  ;;  %v53_v44 = vmax.bf16 %v1731_v50, %v33_v37  ;;  %v199_v37 = vld [vmem:[%s2299_s2] sm:$0x3] }
  0x57   :  { %1140 = vmatpush1.bf16.msra.mxu0 %v1641_v46  ;;  %v1334_v46 = vcombine.low %v2085_v62, %v2088_v63  ;;  %v1722_v62 = vld [vmem:[%s2297_s1 + $0x420] ss:$8 sps:$4 sm:$0xff]   ;;  %v1727_v63 = vld [vmem:[%s2297_s1 + $0x414] ss:$8 sps:$4 sm:$0xff]  }
  0x58   :  { %1193 = vmatpush1.bf16.msra.mxu1 %v1644_v47  ;;  %1141 = vmatprep.subr.bf16.mxu0 %v1649_v49  ;;  %v1707_v47 = vld [vmem:[%s2297_s1 + $0x470] ss:$8 sps:$4 sm:$0xff]   ;;  %v1342_v49 = vcombine.high %v47_v41, %v52_v42 }
  0x59   :  { %1194 = vmatprep.subr.bf16.mxu1 %v1652_v51  ;;  %v1344_v51 = vcombine.high %v48_v43, %v53_v44 }
  0x5b   :  { %1142 = vmatpush1.bf16.msra.mxu0 %v1647_v52  ;;  %v1710_v52 = vld [vmem:[%s2297_s1 + $0x460] ss:$8 sps:$4 sm:$0xff]  }
  0x5c   :  { %1195 = vmatpush1.bf16.msra.mxu1 %v1650_v53  ;;  %1143 = vmatprep.subr.bf16.mxu0 %v1655_v54  ;;  %v1715_v53 = vld [vmem:[%s2297_s1 + $0x454] ss:$8 sps:$4 sm:$0xff]   ;;  %v1341_v54 = vcombine.low %v47_v41, %v52_v42 }
  0x5d   :  { %1196 = vmatprep.subr.bf16.mxu1 %v1658_v55  ;;  %v1343_v55 = vcombine.low %v48_v43, %v53_v44 }
  0x5f   :  { %1144 = vmatpush1.bf16.msra.mxu0 %v1653_v1  ;;  %v19_v1 = vld [vmem:[%s2298_s0 + $0x20] sm:$0xf] }
  0x60   :  { %1197 = vmatpush1.bf16.msra.mxu1 %v1656_v2  ;;  %1145 = vmatprep.subr.bf16.mxu0 %v1661_v4  ;;  %v24_v2 = vld [vmem:[%s2298_s0 + $0x44] sm:$0xf]  ;;  %v34_v4 = vld [vmem:[%s2298_s0 + $0x8c] sm:$0xf] }
  0x61   :  { %1198 = vmatprep.subr.bf16.mxu1 %v1664_v5  ;;  %v1730_v5 = vld [vmem:[%s2297_s1 + $0x404] ss:$8 sps:$4 sm:$0xff]  }
  0x63   :  { %1146 = vmatpush2.bf16.msra.mxu0 %v1659_v6  ;;  %v39_v6 = vmax.bf16 %v1731_v50, %v19_v1 }
  0x64   :  { %1199 = vmatpush2.bf16.msra.mxu1 %v1662_v7  ;;  %1147 = vmatprep.subr.bf16.mxu0 %v1667_v8  ;;  %v44_v7 = vmax.bf16 %v1731_v50, %v24_v2  ;;  %v49_v8 = vmax.bf16 %v1731_v50, %v29_v3 }
  0x65   :  { %1200 = vmatprep.subr.bf16.mxu1 %v1670_v9  ;;  %v54_v9 = vmax.bf16 %v1731_v50, %v34_v4 }
  0x67   :  { %1148 = vmatpush2.bf16.msra.mxu0 %v1665_v10  ;;  %v1728_v10 = vld [vmem:[%s2297_s1 + $0x400] ss:$8 sps:$4 sm:$0xff]  }
  0x68   :  { %1201 = vmatpush2.bf16.msra.mxu1 %v1668_v11  ;;  %1149 = vmatprep.subr.bf16.mxu0 %v1673_v12  ;;  %v1336_v11 = vcombine.low %v39_v6, %v44_v7  ;;  %v1345_v12 = vcombine.low %v49_v8, %v54_v9 }
  0x69   :  { %1202 = vmatprep.subr.bf16.mxu1 %v1676_v13 }
  0x6b   :  { %1150 = vmatpush2.bf16.msra.mxu0 %v1671_v14 }
  0x6c   :  { %1203 = vmatpush2.bf16.msra.mxu1 %v1674_v15  ;;  %1151 = vmatprep.subr.bf16.mxu0 %v1679_v16 }
  0x6d   :  { %1204 = vmatprep.subr.bf16.mxu1 %v1682_v17 }
  0x6f   :  { %1152 = vmatpush2.bf16.msra.mxu0 %v1677_v18 }
  0x70   :  { %1205 = vmatpush2.bf16.msra.mxu1 %v1680_v19  ;;  %1153 = vmatprep.subr.bf16.mxu0 %v1685_v20 }
  0x71   :  { %1206 = vmatprep.subr.bf16.mxu1 %v1688_v21 }
  0x73   :  { %1154 = vmatpush2.bf16.msra.mxu0 %v1683_v22 }
  0x74   :  { %1207 = vmatpush2.bf16.msra.mxu1 %v1686_v23  ;;  %1155 = vmatprep.subr.bf16.mxu0 %v1691_v24 }
  0x75   :  { %1208 = vmatprep.subr.bf16.mxu1 %v1694_v25 }
  0x77   :  { %1156 = vmatpush2.bf16.msra.mxu0 %v1689_v26 }
  0x78   :  { %1209 = vmatpush2.bf16.msra.mxu1 %v1692_v27  ;;  %1157 = vmatprep.subr.bf16.mxu0 %v1697_v28 }
  0x79   :  { %1210 = vmatprep.subr.bf16.mxu1 %v1700_v29 }
  0x7b   :  { %1158 = vmatpush2.bf16.msra.mxu0 %v1695_v30  ;;  %v201_v30 = vlaneseq }
  0x7c   :  { %1211 = vmatpush2.bf16.msra.mxu1 %v1698_v31  ;;  %1159 = vmatprep.subr.bf16.mxu0 %v1703_v32 }
  0x7d   :  { %1212 = vmatprep.subr.bf16.mxu1 %v1706_v33  ;;  %v202_v33 = vshrl.u32 %v201_v30, 7 }
  0x7f   :  { %1160 = vmatpush2.bf16.msra.mxu0 %v1701_v38  ;;  %v203_v36 = vsub.s32 0, %v202_v33 }
  0x80   :  { %1213 = vmatpush2.bf16.msra.mxu1 %v1704_v39  ;;  %1235 = vmatprep.subr.bf16.mxu0 %v1709_v40  ;;  %v207_v39 = vsub.s32 1, %v202_v33 }
  0x81   :  { %1498 = vmatprep.subr.bf16.mxu1 %v1709_v40  ;;  %v204_v41 = vrot.slane %v199_v37, %v203_v36 }
  0x82   :  { %1162 = vmatmul.mubr.bf16.vlgmr.msra.gmra.mxu0 %v1332_v45  ;;  %v208_v44 = vrot.slane %v199_v37, %v207_v39 }
  0x83   :  { %1215 = vmatmul.mubr.bf16.vlgmr.msra.gmra.mxu1 %v1334_v46  ;;  %1236 = vmatpush1.bf16.msra.mxu0 %v1707_v47 }
  0x84   :  { %1506 = vmatpush1.bf16.msra.mxu1 %v1707_v47  ;;  %1237 = vmatprep.subr.bf16.mxu0 %v1712_v48 }
  0x85   :  { %1499 = vmatprep.subr.bf16.mxu1 %v1712_v48  ;;  %1171 = vmatprep.mubr.bf16.mxu0 %v1342_v49 }
  0x86   :  { %1224 = vmatprep.mubr.bf16.mxu1 %v1344_v51 }
  0x87   :  { %1238 = vmatpush1.bf16.msra.mxu0 %v1710_v52 }
  0x88   :  { %1507 = vmatpush1.bf16.msra.mxu1 %v1710_v52  ;;  %1239 = vmatprep.subr.bf16.mxu0 %v1715_v53 }
  0x89   :  { %1500 = vmatprep.subr.bf16.mxu1 %v1715_v53 }
  0x8a   :  { %1172 = vmatmul.mubr.bf16.gmra.mxu0 %v1341_v54 }
  0x8b   :  { %1225 = vmatmul.mubr.bf16.gmra.mxu1 %v1343_v55  ;;  %1240 = vmatpush1.bf16.msra.mxu0 %v1713_v56 }
  0x8c   :  { %1508 = vmatpush1.bf16.msra.mxu1 %v1713_v56  ;;  %1241 = vmatprep.subr.bf16.mxu0 %v1718_v57 }
  0x8d   :  { %1501 = vmatprep.subr.bf16.mxu1 %v1718_v57  ;;  %1267 = vmatprep.mubr.bf16.mxu0 %v1731_v50 }
  0x8e   :  { %1277 = vmatprep.mubr.bf16.mxu1 %v1731_v50 }
  0x8f   :  { %1242 = vmatpush1.bf16.msra.mxu0 %v1716_v58 }
  0x90   :  { %1509 = vmatpush1.bf16.msra.mxu1 %v1716_v58  ;;  %1243 = vmatprep.subr.bf16.mxu0 %v1721_v59 }
  0x91   :  { %1502 = vmatprep.subr.bf16.mxu1 %v1721_v59 }
  0x93   :  { %1244 = vmatpush1.bf16.msra.mxu0 %v1719_v60 }
  0x94   :  { %1510 = vmatpush1.bf16.msra.mxu1 %v1719_v60  ;;  %1245 = vmatprep.subr.bf16.mxu0 %v1724_v61 }
  0x95   :  { %1503 = vmatprep.subr.bf16.mxu1 %v1724_v61 }
  0x97   :  { %1246 = vmatpush1.bf16.msra.mxu0 %v1722_v62 }
  0x98   :  { %1511 = vmatpush1.bf16.msra.mxu1 %v1722_v62  ;;  %1247 = vmatprep.subr.bf16.mxu0 %v1727_v63 }
  0x99   :  { %1504 = vmatprep.subr.bf16.mxu1 %v1727_v63 }
  0x9b   :  { %1248 = vmatpush1.bf16.msra.mxu0 %v1725_v0 }
  0x9c   :  { %1512 = vmatpush1.bf16.msra.mxu1 %v1725_v0  ;;  %1249 = vmatprep.subr.bf16.mxu0 %v1730_v5 }
  0x9d   :  { %1505 = vmatprep.subr.bf16.mxu1 %v1730_v5 }
  0x9f   :  { %1250 = vmatpush1.bf16.msra.mxu0 %v1728_v10 }
  0xa0   :  { %1513 = vmatpush1.bf16.msra.mxu1 %v1728_v10 }
  0xa2   :  { %1268 = vmatmul.mubr.bf16.vlgmr.msra.gmra.mxu0 %v1336_v11 }
  0xa3   :  { %1278 = vmatmul.mubr.bf16.vlgmr.msra.gmra.mxu1 %v1345_v12 }
 0x102   :  { %v1057_v13 = vpop.f32.mrf.mxu0 }
 0x103   :  { %v1110_v14 = vpop.f32.mrf.mxu1  ;;  %v1058_v45 = vadd.f32 %v1057_v13, %v204_v41 }
 0x104   :  { %v1059_v15 = vpop.f32.mrf.mxu0 }
 0x105   :  { %v1112_v16 = vpop.f32.mrf.mxu1  ;;  %v1060_v49 = vadd.f32 %v1059_v15, %v208_v44  ;;  %v1111_v52 = vadd.f32 %v1110_v14, %v1058_v45 }
 0x106   :  { %v1061_v17 = vpop.f32.mrf.mxu0 }
 0x107   :  { %v1114_v50 = vpop.f32.mrf.mxu1  ;;  %v1062_v54 = vadd.f32 %v1061_v17, %v204_v41  ;;  %v1113_v58 = vadd.f32 %v1112_v16, %v1060_v49 }
 0x108   :  { %v1063_v18 = vpop.f32.mrf.mxu0 }
 0x109   :  { %v1116_v19 = vpop.f32.mrf.mxu1  ;;  %v1064_v62 = vadd.f32 %v1063_v18, %v208_v44  ;;  %v1115_v2 = vadd.f32 %v1114_v50, %v1062_v54 }
 0x10a   :  { %v1067_v20 = vpop.f32.mrf.mxu0 }
 0x10b   :  { %v1120_v21 = vpop.f32.mrf.mxu1  ;;  %v1068_v46 = vadd.f32 %v1067_v20, %v204_v41  ;;  %v1117_v8 = vadd.f32 %v1116_v19, %v1064_v62 }
 0x10c   :  { %v1069_v22 = vpop.f32.mrf.mxu0 }
 0x10d   :  { %v1122_v23 = vpop.f32.mrf.mxu1  ;;  %v1070_v51 = vadd.f32 %v1069_v22, %v208_v44  ;;  %v1121_v53 = vadd.f32 %v1120_v21, %v1068_v46 }
 0x10e   :  { %v1071_v24 = vpop.f32.mrf.mxu0 }
 0x10f   :  { %v1124_v25 = vpop.f32.mrf.mxu1  ;;  %v1072_v55 = vadd.f32 %v1071_v24, %v204_v41  ;;  %v1123_v59 = vadd.f32 %v1122_v23, %v1070_v51 }
 0x110   :  { %v1073_v26 = vpop.f32.mrf.mxu0 }
 0x111   :  { %v1126_v27 = vpop.f32.mrf.mxu1  ;;  %v1074_v63 = vadd.f32 %v1073_v26, %v208_v44  ;;  %v1125_v3 = vadd.f32 %v1124_v25, %v1072_v55 }
 0x113   :  { %v1127_v9 = vadd.f32 %v1126_v27, %v1074_v63 }
 0x142   :  { %v1163_v28 = vpop.f32.mrf.mxu0 }
 0x143   :  { %v1216_v29 = vpop.f32.mrf.mxu1  ;;  %v1164_v60 = vadd.f32 %v1163_v28, %v1111_v52 }
 0x144   :  { %v1165_v31 = vpop.f32.mrf.mxu0 }
 0x145   :  { %v1218_v32 = vpop.f32.mrf.mxu1  ;;  %v1166_v0 = vadd.f32 %v1165_v31, %v1113_v58  ;;  %v1217_v6 = vadd.f32 %v1216_v29, %v1164_v60 }
 0x146   :  { %v1167_v34 = vpop.f32.mrf.mxu0 }
 0x147   :  { %v1220_v35 = vpop.f32.mrf.mxu1  ;;  %v1168_v10 = vadd.f32 %v1167_v34, %v1115_v2  ;;  %v1219_v14 = vadd.f32 %v1218_v32, %v1166_v0 }
 0x148   :  { %v1169_v38 = vpop.f32.mrf.mxu0 }
 0x149   :  { %v1222_v40 = vpop.f32.mrf.mxu1  ;;  %v1170_v18 = vadd.f32 %v1169_v38, %v1117_v8  ;;  %v1221_v24 = vadd.f32 %v1220_v35, %v1168_v10 }
 0x14a   :  { %v1173_v42 = vpop.f32.mrf.mxu0 }
 0x14b   :  { %v1226_v43 = vpop.f32.mrf.mxu1  ;;  %v1174_v61 = vadd.f32 %v1173_v42, %v1121_v53  ;;  %v1223_v31 = vadd.f32 %v1222_v40, %v1170_v18 }
 0x14c   :  { %v1175_v47 = vpop.f32.mrf.mxu0 }
 0x14d   :  { %v1228_v48 = vpop.f32.mrf.mxu1  ;;  %v1176_v1 = vadd.f32 %v1175_v47, %v1123_v59  ;;  %v1227_v7 = vadd.f32 %v1226_v43, %v1174_v61 }
 0x14e   :  { %v1177_v56 = vpop.f32.mrf.mxu0 }
 0x14f   :  { %v1230_v57 = vpop.f32.mrf.mxu1  ;;  %v1178_v11 = vadd.f32 %v1177_v56, %v1125_v3  ;;  %v1229_v15 = vadd.f32 %v1228_v48, %v1176_v1 }
 0x150   :  { %v1179_v4 = vpop.f32.mrf.mxu0 }
 0x151   :  { %v1232_v5 = vpop.f32.mrf.mxu1  ;;  %v1180_v20 = vadd.f32 %v1179_v4, %v1127_v9  ;;  %v1231_v25 = vadd.f32 %v1230_v57, %v1178_v11 }
 0x153   :  { %v1233_v33 = vadd.f32 %v1232_v5, %v1180_v20 }
 0x162   :  { %v1269_v12 = vpop.f32.mrf.mxu0 }
 0x163   :  { %v1279_v13 = vpop.f32.mrf.mxu1  ;;  %v1270_v16 = vadd.f32 %v1269_v12, %v1217_v6 }
 0x164   :  { %v1280_v17 = vadd.f32 %v1279_v13, %v1227_v7  ;;  %v1271_v21 = vpop.f32.mrf.mxu0 }
 0x165   :  { %v1281_v22 = vpop.f32.mrf.mxu1  ;;  %v1272_v50 = vadd.f32 %v1271_v21, %v1219_v14  ;;  %v1288_v19 = vmax.f32 %v1270_v16, 0.0 }
 0x166   :  { %v1282_v23 = vadd.f32 %v1281_v22, %v1229_v15  ;;  %v1273_v26 = vpop.f32.mrf.mxu0  ;;  %v1292_v27 = vmax.f32 %v1280_v17, 0.0 }
 0x167   :  { %v1283_v28 = vpop.f32.mrf.mxu1  ;;  %v1289_v29 = vmax.f32 %v1272_v50, 0.0  ;;  %v1274_v32 = vadd.f32 %v1273_v26, %v1221_v24 }
 0x168   :  { %v1293_v30 = vmax.f32 %v1282_v23, 0.0  ;;  %v1284_v34 = vadd.f32 %v1283_v28, %v1231_v25  ;;  %v1275_v36 = vpop.f32.mrf.mxu0 }
 0x169   :  { %v1285_v37 = vpop.f32.mrf.mxu1  ;;  %v1494_v38 = vpack.c.bf16 %v1289_v29, %v1288_v19  ;;  %v1276_v41 = vadd.f32 %v1275_v36, %v1223_v31  ;;  %v1290_v35 = vmax.f32 %v1274_v32, 0.0 }
 0x16a   :  { %v1496_v39 = vpack.c.bf16 %v1293_v30, %v1292_v27  ;;  %v1286_v42 = vadd.f32 %v1285_v37, %v1233_v33  ;;  %v1294_v43 = vmax.f32 %v1284_v34, 0.0 }
 0x16b   :  { %1320 = vst [vmem:[%s2300_s3] sm:$0xff] %v1494_v38  ;;  %v1291_v40 = vmax.f32 %v1276_v41, 0.0 }
 0x16c   :  { %1322 = vst [vmem:[%s2300_s3 + $0x10] sm:$0xff] %v1496_v39  ;;  %v1295_v44 = vmax.f32 %v1286_v42, 0.0 }
 0x16d   :  { %v1495_v45 = vpack.c.bf16 %v1291_v40, %v1290_v35 }
 0x16e   :  { %v1497_v46 = vpack.c.bf16 %v1295_v44, %v1294_v43 }
 0x16f   :  { %1321 = vst [vmem:[%s2300_s3 + $0x8] sm:$0xff] %v1495_v45 }
 0x170   :  { %1323 = vst [vmem:[%s2300_s3 + $0x18] sm:$0xff] %v1497_v46 }

// kernel: tile.18
= control target key start
LH: loop header
LB: loop body
LE: loop exit
PB: predicated region body
PF: predicated region fallthrough
CT: control target
= control target key end

     0   :  { %s22_s0 = inlined_call_operand.vmem [shape: f32[3], index: 0, kind: input, shape index: {}]   ;;  %s23_s1 = inlined_call_operand.vmem [shape: f32[4,3], index: 1, kind: output, shape index: {}]  }
   0x1   :  { %v4_v0 = vld [vmem:[%s22_s0] ss:$0 sm:$0xff] }
   0x2   :  { %5 = vst [vmem:[%s23_s1] sm:$0xf] %v4_v0 }

// kernel: tile.19
= control target key start
LH: loop header
LB: loop body
LE: loop exit
PB: predicated region body
PF: predicated region fallthrough
CT: control target
= control target key end

     0   :  { %vm8_vm0 = vcmask 23552   ;;  %s40_s8 = smov 3   ;;  %s41_s9 = smov 6   ;;  %vm14_vm1 = vcmask 97352   ;;  %vm20_vm2 = vcmask 72752   ;;  %vm26_vm3 = vcmask 48152   ;;  %s58_s0 = inlined_call_operand.vmem [shape: f32[4,3], index: 0, kind: input, shape index: {}]   ;;  %s59_s1 = inlined_call_operand.vmem [shape: f32[1,12], index: 1, kind: output, shape index: {}]  }
   0x1   :  { %v5_v0 = vld [vmem:[%s58_s0] sm:$0xf]  ;;  %s39_s0 = smov 9  }
   0x2   :  { %6 = vst [vmem:[#allocation1] sm:$0xf] %v5_v0 }
   0x9   :  { %v11_v1 = vld [vmem:[#allocation1 + $0x3] sm:$0x1]   ;;  %v23_v2 = vld [vmem:[#allocation1 + $0x1] sm:$0x1]   ;;  %v7_v3 = vld [vmem:[#allocation1] sm:$0x1]  }
   0xa   :  { %12 = vrot.lane.b32.xlu0 %v11_v1, %s39_s0  ;;  %24 = vrot.lane.b32.xlu1 %v23_v2, %s40_s8  ;;  %v17_v4 = vld [vmem:[#allocation1 + $0x2] sm:$0x1]   ;;  %9 = vst.msk [vmem:[#allocation0] sm:$0x1] %vm8_vm0, %v7_v3  }
   0xe   :  { %18 = vrot.lane.b32.xlu0 %v17_v4, %s41_s9 }
  0x7c   :  { %v13_v5 = vpop.permute.xlu0 %12   ;;  %v25_v6 = vpop.permute.xlu1 %24  }
  0x7d   :  { %15 = vst.msk [vmem:[#allocation0] sm:$0x1] %vm14_vm1, %v13_v5  }
  0x80   :  { %v19_v7 = vpop.permute.xlu0 %18  }
  0x81   :  { %21 = vst.msk [vmem:[#allocation0] sm:$0x1] %vm20_vm2, %v19_v7  }
  0x82   :  { %27 = vst.msk [vmem:[#allocation0] sm:$0x1] %vm26_vm3, %v25_v6  }
  0x89   :  { %v32_v8 = vld [vmem:[#allocation0] sm:$0x1] }
  0x8a   :  { %35 = vst [vmem:[%s59_s1] sm:$0x1] %v32_v8 }

// kernel: s_vqvae_forward.21
= control target key start
LH: loop header
LB: loop body
LE: loop exit
PB: predicated region body
PF: predicated region fallthrough
CT: control target
= control target key end

     0   :  { %s1155_s12 = smov 0   ;;  %s1329_s0 = inlined_call_operand.vmem [shape: bf16[128,576], index: 0, kind: input, shape index: {}]   ;;  %s1330_s1 = inlined_call_operand.vmem [shape: bf16[576,12], index: 1, kind: input, shape index: {}]   ;;  %s1331_s2 = inlined_call_operand.vmem [shape: f32[1,12], index: 2, kind: input, shape index: {}]   ;;  %s1332_s3 = inlined_call_operand.vmem [shape: f32[128,12], index: 3, kind: output, shape index: {}]  }
   0x1 LB: > { %s870_s13 = sadd.s32 4294967295, %s1133_s12   ;;  %p874_p0 = scmp.ge.s32.totalorder %s1133_s12, 1  ;;  %s1133_s12 = sphi %s1155_s12, %s13_s12  }
   0x2   : > { %p139_p1 = scmp.lt.s32.totalorder %s1133_s12, 3 }
   0x4   : > { %p140_p2 = pnand %p874_p0, %p139_p1 }
   0x5   : > { %s875_s19 = sshll.u32 (!%p140_p2), %s870_s13, 3 }
   0x6   : > { %143 = sbr.rel (%p140_p2) target bundleno = 280 (0x118), region = 32  ;;  %p165_p3 = scmp.lt.s32.totalorder (!%p140_p2), %s875_s19, 15 }
   0xb   : > { %v1063_v0 = vld [vmem:[%s1330_s1 + $0x78] sm:$0xff]   ;;  %v1067_v4 = vld [vmem:[%s1330_s1 + $0x70] sm:$0xff]   ;;  %v1071_v8 = vld [vmem:[%s1330_s1 + $0x68] sm:$0xff]   ;;  %s1334_s19 = smov (!%p165_p3, %s875_s19), 15  ;;  %vm597_vm0 = vcmask 523264   ;;  %vm805_vm1 = vcmask 97280  }
   0xc   : > { %v1064_v1 = vld [vmem:[%s1330_s1 + $0xf8] sm:$0xff]   ;;  %942 = vmatprep.subr.bf16.mxu0 %v1063_v0  ;;  %v1068_v5 = vld [vmem:[%s1330_s1 + $0xf0] sm:$0xff]   ;;  %v1072_v9 = vld [vmem:[%s1330_s1 + $0xe8] sm:$0xff]   ;;  %s1054_s16 = smul.u32 20, %s1334_s19  ;;  %s878_s17 = sshll.u32 %s1334_s19, 3 }
   0xd   : > { %v1065_v2 = vld [vmem:[%s1330_s1 + $0x38] sm:$0xff]   ;;  %982 = vmatprep.subr.bf16.mxu1 %v1064_v1  ;;  %v1069_v6 = vld [vmem:[%s1330_s1 + $0x30] sm:$0xff]   ;;  %v1073_v10 = vld [vmem:[%s1330_s1 + $0x28] sm:$0xff]   ;;  %s1308_s21 = scalar_lea.vmem %s1332_s3, %s878_s17 }
   0xe   : > { %v1066_v3 = vld [vmem:[%s1330_s1 + $0xb8] sm:$0xff]   ;;  %943 = vmatpush3.bf16.msra.mxu0 %v1065_v2  ;;  %v1070_v7 = vld [vmem:[%s1330_s1 + $0xb0] sm:$0xff]   ;;  %v1074_v11 = vld [vmem:[%s1330_s1 + $0xa8] sm:$0xff]   ;;  %s1261_s13 = scalar_lea.vmem %s1329_s0, %s1054_s16 }
   0xf   : > { %983 = vmatpush3.bf16.msra.mxu1 %v1066_v3  ;;  %944 = vmatprep.subr.bf16.mxu0 %v1067_v4  ;;  %v1075_v12 = vld [vmem:[%s1330_s1 + $0x60] sm:$0xff]   ;;  %v1079_v16 = vld [vmem:[%s1330_s1 + $0x58] sm:$0xff]   ;;  %v1083_v20 = vld [vmem:[%s1330_s1 + $0x50] sm:$0xff]  }
  0x10   : > { %984 = vmatprep.subr.bf16.mxu1 %v1068_v5  ;;  %v1076_v13 = vld [vmem:[%s1330_s1 + $0xe0] sm:$0xff]   ;;  %v1080_v17 = vld [vmem:[%s1330_s1 + $0xd8] sm:$0xff]   ;;  %v1084_v21 = vld [vmem:[%s1330_s1 + $0xd0] sm:$0xff]  }
  0x11   : > { %v1077_v14 = vld [vmem:[%s1330_s1 + $0x20] sm:$0xff]   ;;  %v1081_v18 = vld [vmem:[%s1330_s1 + $0x18] sm:$0xff]   ;;  %v1085_v22 = vld [vmem:[%s1330_s1 + $0x10] sm:$0xff]  }
  0x12   : > { %945 = vmatpush3.bf16.msra.mxu0 %v1069_v6  ;;  %v1078_v15 = vld [vmem:[%s1330_s1 + $0xa0] sm:$0xff]   ;;  %v1082_v19 = vld [vmem:[%s1330_s1 + $0x98] sm:$0xff]   ;;  %v1086_v23 = vld [vmem:[%s1330_s1 + $0x90] sm:$0xff]  }
  0x13   : > { %985 = vmatpush3.bf16.msra.mxu1 %v1070_v7  ;;  %946 = vmatprep.subr.bf16.mxu0 %v1071_v8  ;;  %v1087_v24 = vld [vmem:[%s1330_s1 + $0x48] sm:$0xff]   ;;  %v1091_v28 = vld [vmem:[%s1330_s1 + $0x40] sm:$0xff]   ;;  %v1101_v36 = vld [vmem:[%s1330_s1 + $0x118] sm:$0xff]  }
  0x14   : > { %986 = vmatprep.subr.bf16.mxu1 %v1072_v9  ;;  %v1088_v25 = vld [vmem:[%s1330_s1 + $0xc8] sm:$0xff]   ;;  %v1092_v29 = vld [vmem:[%s1330_s1 + $0xc0] sm:$0xff]   ;;  %v1108_v39 = vld [vmem:[%s1330_s1 + $0x110] sm:$0xff]  }
  0x15   : > { %v1089_v26 = vld [vmem:[%s1330_s1 + $0x8] sm:$0xff]   ;;  %v1093_v30 = vld [vmem:[%s1330_s1] sm:$0xff]   ;;  %v1111_v43 = vld [vmem:[%s1261_s13 + $0x5c] ss:$20 sps:$4 sm:$0xff]  }
  0x16   : > { %947 = vmatpush3.bf16.msra.mxu0 %v1073_v10  ;;  %v1090_v27 = vld [vmem:[%s1330_s1 + $0x88] sm:$0xff]   ;;  %v1094_v31 = vld [vmem:[%s1330_s1 + $0x80] sm:$0xff]   ;;  %v1116_v48 = vld [vmem:[%s1261_s13 + $0x7c] ss:$20 sps:$4 sm:$0xff]  }
  0x17   : > { %987 = vmatpush3.bf16.msra.mxu1 %v1074_v11  ;;  %948 = vmatprep.subr.bf16.mxu0 %v1075_v12  ;;  %v1095_v32 = vld [vmem:[%s1261_s13] ss:$20 sps:$4 sm:$0xff]   ;;  %v1097_v33 = vld [vmem:[%s1261_s13 + $0x4] ss:$20 sps:$4 sm:$0xff]   ;;  %v1098_v34 = vld [vmem:[%s1261_s13 + $0x8] ss:$20 sps:$4 sm:$0xff]  }
  0x18   : > { %988 = vmatprep.subr.bf16.mxu1 %v1076_v13  ;;  %v1100_v35 = vld [vmem:[%s1261_s13 + $0xc] ss:$20 sps:$4 sm:$0xff]   ;;  %642 = vmatprep.mubr.bf16.mxu0 %v1097_v33  ;;  %v1104_v38 = vld [vmem:[%s1261_s13 + $0x34] ss:$20 sps:$4 sm:$0xff]   ;;  %v1107_v41 = vld [vmem:[%s1261_s13 + $0x30] ss:$20 sps:$4 sm:$0xff]  }
  0x19   : > { %707 = vmatprep.mubr.bf16.mxu1 %v1100_v35  ;;  %v1102_v37 = vld [vmem:[%s1261_s13 + $0x2c] ss:$20 sps:$4 sm:$0xff]   ;;  %v1106_v40 = vld [vmem:[%s1261_s13 + $0x28] ss:$20 sps:$4 sm:$0xff]   ;;  %v1113_v46 = vld [vmem:[%s1261_s13 + $0x50] ss:$20 sps:$4 sm:$0xff]  }
  0x1a   : > { %949 = vmatpush3.bf16.msra.mxu0 %v1077_v14  ;;  %v1109_v42 = vld [vmem:[%s1261_s13 + $0x54] ss:$20 sps:$4 sm:$0xff]   ;;  %v1122_v45 = vld [vmem:[%s1330_s1 + $0x100] sm:$0xff]   ;;  %v1114_v47 = vld [vmem:[%s1261_s13 + $0x58] ss:$20 sps:$4 sm:$0xff]  }
  0x1b   : > { %989 = vmatpush3.bf16.msra.mxu1 %v1078_v15  ;;  %950 = vmatprep.subr.bf16.mxu0 %v1079_v16  ;;  %v1115_v44 = vld [vmem:[%s1330_s1 + $0x108] sm:$0xff]   ;;  %v1118_v49 = vld [vmem:[%s1261_s13 + $0x84] ss:$20 sps:$4 sm:$0xff]   ;;  %v1121_v51 = vld [vmem:[%s1261_s13 + $0x80] ss:$20 sps:$4 sm:$0xff]  }
  0x1c   : > { %990 = vmatprep.subr.bf16.mxu1 %v1080_v17  ;;  %v1120_v50 = vld [vmem:[%s1261_s13 + $0x78] ss:$20 sps:$4 sm:$0xff]   ;;  %v1123_v52 = vld [vmem:[%s1261_s13 + $0x10] ss:$20 sps:$4 sm:$0xff]   ;;  %v1124_v53 = vld [vmem:[%s1261_s13 + $0x60] ss:$20 sps:$4 sm:$0xff]  }
  0x1d   : > { %v1125_v54 = vld [vmem:[%s1261_s13 + $0x38] ss:$20 sps:$4 sm:$0xff]   ;;  %v1126_v55 = vld [vmem:[%s1261_s13 + $0x88] ss:$20 sps:$4 sm:$0xff]  }
  0x1e   : > { %951 = vmatpush3.bf16.msra.mxu0 %v1081_v18 }
  0x1f   : > { %991 = vmatpush3.bf16.msra.mxu1 %v1082_v19  ;;  %952 = vmatprep.subr.bf16.mxu0 %v1083_v20  ;;  %v879_v19 = vld [vmem:[%s1331_s2] ss:$0 sm:$0xff] }
  0x20   : > { %992 = vmatprep.subr.bf16.mxu1 %v1084_v21 }
  0x22   : > { %953 = vmatpush3.bf16.msra.mxu0 %v1085_v22 }
  0x23   : > { %993 = vmatpush3.bf16.msra.mxu1 %v1086_v23  ;;  %954 = vmatprep.subr.bf16.mxu0 %v1087_v24 }
  0x24   : > { %994 = vmatprep.subr.bf16.mxu1 %v1088_v25 }
  0x26   : > { %955 = vmatpush3.bf16.msra.mxu0 %v1089_v26 }
  0x27   : > { %995 = vmatpush3.bf16.msra.mxu1 %v1090_v27  ;;  %956 = vmatprep.subr.bf16.mxu0 %v1091_v28 }
  0x28   : > { %996 = vmatprep.subr.bf16.mxu1 %v1092_v29 }
  0x2a   : > { %957 = vmatpush3.bf16.msra.mxu0 %v1093_v30 }
  0x2b   : > { %997 = vmatpush3.bf16.msra.mxu1 %v1094_v31  ;;  %1030 = vmatprep.subr.bf16.mxu0 %v1101_v36 }
  0x2c   : > { %1046 = vmatprep.subr.bf16.mxu1 %v1101_v36 }
  0x2d   : > { %643 = vmatmul.mubr.bf16.vlgmr.msra.gmra.mxu0 %v1095_v32 }
  0x2e   : > { %708 = vmatmul.mubr.bf16.vlgmr.msra.gmra.mxu1 %v1098_v34  ;;  %1031 = vmatpush3.bf16.msra.mxu0 %v1101_v36 }
  0x2f   : > { %1050 = vmatpush3.bf16.msra.mxu1 %v1101_v36  ;;  %650 = vmatprep.mubr.bf16.mxu0 %v1102_v37 }
  0x30   : > { %715 = vmatprep.mubr.bf16.mxu1 %v1104_v38  ;;  %1032 = vmatprep.subr.bf16.mxu0 %v1108_v39 }
  0x31   : > { %1047 = vmatprep.subr.bf16.mxu1 %v1108_v39 }
  0x32   : > { %1033 = vmatpush3.bf16.msra.mxu0 %v1108_v39 }
  0x33   : > { %1051 = vmatpush3.bf16.msra.mxu1 %v1108_v39  ;;  %1034 = vmatprep.subr.bf16.mxu0 %v1115_v44 }
  0x34   : > { %1048 = vmatprep.subr.bf16.mxu1 %v1115_v44 }
  0x35   : > { %651 = vmatmul.mubr.bf16.gmra.mxu0 %v1106_v40 }
  0x36   : > { %716 = vmatmul.mubr.bf16.gmra.mxu1 %v1107_v41  ;;  %658 = vmatprep.mubr.bf16.mxu0 %v1109_v42 }
  0x37   : > { %723 = vmatprep.mubr.bf16.mxu1 %v1111_v43  ;;  %1035 = vmatpush3.bf16.msra.mxu0 %v1115_v44 }
  0x38   : > { %1052 = vmatpush3.bf16.msra.mxu1 %v1115_v44  ;;  %1036 = vmatprep.subr.bf16.mxu0 %v1122_v45 }
  0x39   : > { %1049 = vmatprep.subr.bf16.mxu1 %v1122_v45 }
  0x3b   : > { %1037 = vmatpush3.bf16.msra.mxu0 %v1122_v45 }
  0x3c   : > { %1053 = vmatpush3.bf16.msra.mxu1 %v1122_v45 }
  0x3d   : > { %659 = vmatmul.mubr.bf16.gmra.mxu0 %v1113_v46 }
  0x3e   : > { %724 = vmatmul.mubr.bf16.gmra.mxu1 %v1114_v47  ;;  %666 = vmatprep.mubr.bf16.mxu0 %v1116_v48 }
  0x3f   : > { %731 = vmatprep.mubr.bf16.mxu1 %v1118_v49 }
  0x45   : > { %667 = vmatmul.mubr.bf16.gmra.mxu0 %v1120_v50 }
  0x46   : > { %732 = vmatmul.mubr.bf16.gmra.mxu1 %v1121_v51  ;;  %1038 = vmatprep.mubr.msk.bf16.mxu0 %vm597_vm0, %v1123_v52 }
  0x47   : > { %1042 = vmatprep.mubr.msk.bf16.mxu1 %vm597_vm0, %v1124_v53 }
  0x4d   : > { %1039 = vmatmul.mubr.msk.bf16.vlgmr.msra.gmra.mxu0 %vm597_vm0, %v1125_v54 }
  0x4e   : > { %1043 = vmatmul.mubr.msk.bf16.vlgmr.msra.gmra.mxu1 %vm597_vm0, %v1126_v55 }
  0xed   : > { %v958_v56 = vpop.f32.mrf.mxu0 }
  0xee   : > { %v998_v57 = vpop.f32.mrf.mxu1 }
  0xef   : > { %v959_v58 = vpop.f32.mrf.mxu0 }
  0xf0   : > { %v999_v59 = vpop.f32.mrf.mxu1  ;;  %v960_v17 = vadd.f32 %v959_v58, %v958_v56 }
  0xf1   : > { %v961_v60 = vpop.f32.mrf.mxu0  ;;  %v1000_v34 = vadd.f32 %v999_v59, %v998_v57 }
  0xf2   : > { %v1001_v61 = vpop.f32.mrf.mxu1  ;;  %v645_v27 = vadd.f32 %v960_v17, %v879_v19 }
  0xf3   : > { %v962_v62 = vpop.f32.mrf.mxu0 }
  0xf4   : > { %v1002_v63 = vpop.f32.mrf.mxu1  ;;  %v963_v28 = vadd.f32 %v962_v62, %v961_v60  ;;  %v710_v46 = vadd.f32 %v1000_v34, %v645_v27 }
  0xf5   : > { %v964_v0 = vpop.f32.mrf.mxu0  ;;  %v1003_v56 = vadd.f32 %v1002_v63, %v1001_v61 }
  0xf6   : > { %v1004_v1 = vpop.f32.mrf.mxu1  ;;  %v648_v43 = vadd.f32 %v963_v28, %v879_v19 }
  0xf7   : > { %v965_v2 = vpop.f32.mrf.mxu0 }
  0xf8   : > { %v1005_v3 = vpop.f32.mrf.mxu1  ;;  %v966_v15 = vadd.f32 %v965_v2, %v964_v0  ;;  %v713_v61 = vadd.f32 %v1003_v56, %v648_v43 }
  0xf9   : > { %v967_v4 = vpop.f32.mrf.mxu0  ;;  %v1006_v30 = vadd.f32 %v1005_v3, %v1004_v1 }
  0xfa   : > { %v1007_v5 = vpop.f32.mrf.mxu1  ;;  %v653_v23 = vadd.f32 %v966_v15, %v879_v19 }
  0xfb   : > { %v968_v6 = vpop.f32.mrf.mxu0 }
  0xfc   : > { %v1008_v7 = vpop.f32.mrf.mxu1  ;;  %v969_v24 = vadd.f32 %v968_v6, %v967_v4  ;;  %v718_v41 = vadd.f32 %v1006_v30, %v653_v23 }
  0xfd   : > { %v970_v8 = vpop.f32.mrf.mxu0  ;;  %v1009_v47 = vadd.f32 %v1008_v7, %v1007_v5 }
  0xfe   : > { %v1010_v9 = vpop.f32.mrf.mxu1  ;;  %v656_v38 = vadd.f32 %v969_v24, %v879_v19 }
  0xff   : > { %v971_v10 = vpop.f32.mrf.mxu0 }
 0x100   : > { %v1011_v11 = vpop.f32.mrf.mxu1  ;;  %v972_v21 = vadd.f32 %v971_v10, %v970_v8  ;;  %v721_v59 = vadd.f32 %v1009_v47, %v656_v38 }
 0x101   : > { %v973_v12 = vpop.f32.mrf.mxu0  ;;  %v1012_v44 = vadd.f32 %v1011_v11, %v1010_v9 }
 0x102   : > { %v1013_v13 = vpop.f32.mrf.mxu1  ;;  %v661_v35 = vadd.f32 %v972_v21, %v879_v19 }
 0x103   : > { %v974_v14 = vpop.f32.mrf.mxu0 }
 0x104   : > { %v1014_v16 = vpop.f32.mrf.mxu1  ;;  %v975_v36 = vadd.f32 %v974_v14, %v973_v12  ;;  %v726_v55 = vadd.f32 %v1012_v44, %v661_v35 }
 0x105   : > { %v976_v18 = vpop.f32.mrf.mxu0  ;;  %v1015_v62 = vadd.f32 %v1014_v16, %v1013_v13 }
 0x106   : > { %v1016_v20 = vpop.f32.mrf.mxu1  ;;  %v664_v52 = vadd.f32 %v975_v36, %v879_v19 }
 0x107   : > { %v977_v22 = vpop.f32.mrf.mxu0 }
 0x108   : > { %v978_v25 = vadd.f32 %v977_v22, %v976_v18  ;;  %v1017_v26 = vpop.f32.mrf.mxu1  ;;  %v729_v5 = vadd.f32 %v1015_v62, %v664_v52 }
 0x109   : > { %v979_v29 = vpop.f32.mrf.mxu0  ;;  %v1018_v32 = vadd.f32 %v1017_v26, %v1016_v20 }
 0x10a   : > { %v669_v31 = vadd.f32 %v978_v25, %v879_v19  ;;  %v1019_v33 = vpop.f32.mrf.mxu1 }
 0x10b   : > { %v980_v37 = vpop.f32.mrf.mxu0 }
 0x10c   : > { %v981_v39 = vadd.f32 %v980_v37, %v979_v29  ;;  %v1020_v40 = vpop.f32.mrf.mxu1  ;;  %v734_v42 = vadd.f32 %v1018_v32, %v669_v31 }
 0x10d   : > { %v1040_v45 = vpop.f32.mrf.mxu0  ;;  %v1021_v49 = vadd.f32 %v1020_v40, %v1019_v33 }
 0x10e   : > { %v672_v48 = vadd.f32 %v981_v39, %v879_v19  ;;  %v783_v50 = vadd.f32 %v1040_v45, %v718_v41  ;;  %v1044_v51 = vpop.f32.mrf.mxu1 }
 0x10f   : > { %v799_v53 = vadd.f32 %v1044_v51, %v734_v42  ;;  %v774_v54 = vpop.f32.mrf.mxu0 }
 0x110   : > { %808 = vst.msk [vmem:[%s1308_s21 + $0x10] sm:$0xff] %vm805_vm1, %v783_v50  ;;  %v775_v57 = vadd.f32 %v774_v54, %v710_v46  ;;  %v790_v58 = vpop.f32.mrf.mxu1  ;;  %v737_v60 = vadd.f32 %v1021_v49, %v672_v48 }
 0x111   : > { %812 = vst.msk [vmem:[%s1308_s21 + $0x30] sm:$0xff] %vm805_vm1, %v799_v53  ;;  %v791_v0 = vadd.f32 %v790_v58, %v726_v55  ;;  %v1041_v1 = vpop.f32.mrf.mxu0 }
 0x112   : > { %806 = vst.msk [vmem:[%s1308_s21] sm:$0xff] %vm805_vm1, %v775_v57  ;;  %v786_v2 = vadd.f32 %v1041_v1, %v721_v59  ;;  %v1045_v3 = vpop.f32.mrf.mxu1 }
 0x113   : > { %810 = vst.msk [vmem:[%s1308_s21 + $0x20] sm:$0xff] %vm805_vm1, %v791_v0  ;;  %v802_v63 = vadd.f32 %v1045_v3, %v737_v60  ;;  %v777_v4 = vpop.f32.mrf.mxu0 }
 0x114   : > { %809 = vst.msk [vmem:[%s1308_s21 + $0x18] sm:$0xff] %vm805_vm1, %v786_v2  ;;  %v778_v6 = vadd.f32 %v777_v4, %v713_v61  ;;  %v793_v7 = vpop.f32.mrf.mxu1 }
 0x115   : > { %813 = vst.msk [vmem:[%s1308_s21 + $0x38] sm:$0xff] %vm805_vm1, %v802_v63  ;;  %v794_v8 = vadd.f32 %v793_v7, %v729_v5 }
 0x116   : > { %807 = vst.msk [vmem:[%s1308_s21 + $0x8] sm:$0xff] %vm805_vm1, %v778_v6 }
 0x117   : > { %811 = vst.msk [vmem:[%s1308_s21 + $0x28] sm:$0xff] %vm805_vm1, %v794_v8 }
 0x118 PF: > { %s13_s12 = sadd.s32 1, %s1133_s12  }
 0x119   : > { %p10_p4 = scmp.ge.s32.totalorder %s13_s12, 4  }
 0x11b   :  { %12 = sbr.rel (!%p10_p4) target bundleno = 1 (0x1), region = 62 }

// kernel: squeeze.33
= control target key start
LH: loop header
LB: loop body
LE: loop exit
PB: predicated region body
PF: predicated region fallthrough
CT: control target
= control target key end

     0   :  { %s139_s0 = inlined_call_operand.vmem [shape: s32[32], index: 0, kind: input, shape index: {}]   ;;  %s140_s1 = inlined_call_operand.hbm [shape: s32[2,4,4], index: 1, kind: output, shape index: {}]  }
   0x1   :  { %v6_v0 = vld [vmem:[%s139_s0] sm:$0x1] }
   0x2   :  { %7 = vst [vmem:[#allocation3] sm:$0x1] %v6_v0 }
   0x3   :  { %2 = vsyncpa [#allocation1], 0  ;;  %s107_s0 = smov 124   ;;  %s108_s8 = smov 116   ;;  %vm9_vm0 = vcmask 31744  }
   0x4   :  { %s109_s9 = smov 120   ;;  %s110_s10 = smov 112  }
   0x5   :  { %s111_s11 = smov 108   ;;  %s112_s12 = smov 104  }
   0x6   :  { %s113_s13 = smov 100   ;;  %s114_s14 = smov [#allocation0]  }
   0x7   :  { %s71_s15 = sshll.u32 %s114_s14, 4  ;;  %s72_s15 = int_to_ptr.vmem [resolvable:$true] %s71_s15 }
   0x8   :  { %s85_s16 = scalar_lea.vmem %s72_s15, 128  ;;  %p90_p1 = scmp.lt.s32.totalorder %s72_s15, %s72_s15 }
   0x9   :  { %v11_v1 = vld [vmem:[#allocation3] sm:$0x1]   ;;  %p86_p0 = scmp.ne.s32.totalorder %s72_s15, %s85_s16  ;;  %p91_p2 = scmp.lt.s32.totalorder %s85_s16, %s85_s16 }
   0xa   :  { %v23_v2 = vld [vmem:[#allocation3] sm:$0x1]   ;;  %12 = vrot.lane.b32.xlu0 %v11_v1, %s107_s0 }
   0xb   :  { %24 = vrot.lane.b32.xlu1 %v23_v2, %s108_s8  ;;  %v17_v3 = vld [vmem:[#allocation3] sm:$0x1]   ;;  %p92_p3 = por %p91_p2, %p90_p1 }
   0xc   :  { %v29_v4 = vld [vmem:[#allocation3] sm:$0x1]  }
   0xd   :  { %v8_v5 = vld [vmem:[#allocation3] sm:$0x1]   ;;  %p93_p4 = pnand %p92_p3, %p86_p0 }
   0xe   :  { %10 = vst.msk [vmem:[#allocation2] sm:$0x1] %vm9_vm0, %v8_v5   ;;  %18 = vrot.lane.b32.xlu0 %v17_v3, %s109_s9  ;;  %v35_v6 = vld [vmem:[#allocation3] sm:$0x1]  }
   0xf   :  { %30 = vrot.lane.b32.xlu1 %v29_v4, %s110_s10  ;;  %v41_v7 = vld [vmem:[#allocation3] sm:$0x1]  }
  0x10   :  { %v47_v8 = vld [vmem:[#allocation3] sm:$0x1]  }
  0x12   :  { %36 = vrot.lane.b32.xlu0 %v35_v6, %s111_s11 }
  0x13   :  { %42 = vrot.lane.b32.xlu1 %v41_v7, %s112_s12 }
  0x16   :  { %48 = vrot.lane.b32.xlu0 %v47_v8, %s113_s13 }
  0x7c   :  { %v13_v9 = vpop.permute.xlu0 %12  }
  0x7d   :  { %v25_v10 = vpop.permute.xlu1 %24   ;;  %16 = vst.msk [vmem:[#allocation2 + $0x1] sm:$0x1] %vm9_vm0, %v13_v9  }
  0x7e   :  { %28 = vst.msk [vmem:[#allocation2 + $0x3] sm:$0x1] %vm9_vm0, %v25_v10  }
  0x80   :  { %v19_v11 = vpop.permute.xlu0 %18  }
  0x81   :  { %v31_v12 = vpop.permute.xlu1 %30   ;;  %22 = vst.msk [vmem:[#allocation2 + $0x2] sm:$0x1] %vm9_vm0, %v19_v11  }
  0x82   :  { %34 = vst.msk [vmem:[#allocation2 + $0x8] sm:$0x1] %vm9_vm0, %v31_v12  }
  0x84   :  { %v37_v13 = vpop.permute.xlu0 %36  }
  0x85   :  { %v43_v14 = vpop.permute.xlu1 %42   ;;  %40 = vst.msk [vmem:[#allocation2 + $0x9] sm:$0x1] %vm9_vm0, %v37_v13  }
  0x86   :  { %46 = vst.msk [vmem:[#allocation2 + $0xa] sm:$0x1] %vm9_vm0, %v43_v14  }
  0x88   :  { %v49_v15 = vpop.permute.xlu0 %48   ;;  %v57_v16 = vld [vmem:[#allocation2] sm:$0xf] }
  0x89   :  { %52 = vst.msk [vmem:[#allocation2 + $0xb] sm:$0x1] %vm9_vm0, %v49_v15   ;;  %60 = vst [vmem:[#allocation0] sm:$0xf] %v57_v16 }
  0x90   :  { %v62_v17 = vld [vmem:[#allocation2 + $0x8] sm:$0xf] }
  0x91   :  { %66 = vst [vmem:[#allocation0 + $0x4] sm:$0xf] %v62_v17 }
  0x92   :  { %96 = shalt.err (!%p93_p4)
}
  0x93   :  { %74 = dma.vmem_to_hbm [thread:$0]  %s72_s15, 128, %s140_s1, [#allocation1]  }
  0x94   :  { %105 = dma.done.wait [#allocation1], 128  }
  0x95   :  { %106 = vsyncadd [#allocation1], 4294967168 }
  0x96   :  { %76 = vsyncpa [#allocation1], 1 }

</bundles_post_ra>
